<compile_context>
chip_gen: v7x
topology: tpu7x:2x2x1
jax: 0.10.0
libtpu: 0.0.40
codegen_flags: <defaults>
</compile_context>

<pallas_src>
from functools import partial

import jax
import jax.numpy as jnp
import numpy as np
from jax.experimental import pallas as pl
from jax.experimental.pallas import tpu as pltpu

# ----- hyperparameters (mirroring KcatPrediction.__init__, small sizes) -----
DIM = 32            # `dim`
N_FINGERPRINT = 30  # `n_fingerprint`
N_WORD = 40         # `n_word`
LAYER_GNN = 2       # `layer_gnn`
LAYER_CNN = 2       # `layer_cnn`
WINDOW = 2          # `window` -> conv kernel = 2*window+1 = 5
LAYER_OUTPUT = 2    # `layer_output`
N_ATOMS = 8         # atoms / fingerprints per compound graph
SEQ = 16            # protein words (n-grams) per sample
KSIZE = 2 * WINDOW + 1
NUM_BLOCKS = 2      # one batch block per v7x TensorCore


def _kcat_kernel(xs0_ref, ys0_ref, adj_ref,            # per-block slabs
                 p_atoms_ref, p_seq_ref, e_seq_ref,     # resident pooling mats
                 wg_ref, bg_ref, convT_ref,             # resident weights
                 wa_ref, ba_ref, wout_ref, bout_ref,
                 wint_ref, scal_ref,                     # SMEM scalars
                 out_ref):                               # [B_blk, 128]
    f32 = jnp.float32
    rows_seq = ys0_ref.shape[0]      # B_blk * SEQ
    b_blk = p_atoms_ref.shape[0]     # B_blk

    xs = xs0_ref[...]                # [B_blk*N_ATOMS, DIM] gathered fp embeddings
    ys = ys0_ref[...]                # [B_blk*SEQ, DIM]     gathered word embeddings
    A = adj_ref[0]                   # [B_blk*N_ATOMS, B_blk*N_ATOMS] block-diag

    # ---------- GNN over all compound graphs at once ----------
    for i in range(LAYER_GNN):
        hs = jnp.maximum(
            jnp.dot(xs, wg_ref[i], preferred_element_type=f32) + bg_ref[i], 0.0)
        xs = xs + jnp.dot(A, hs, preferred_element_type=f32)
    # per-sample mean over atoms via pooling matmul -> [B_blk, DIM]
    compound = jnp.dot(p_atoms_ref[...], xs, preferred_element_type=f32)

    # ---------- CNN on the merged [B_blk*SEQ, DIM] slab ----------
    # Each of the KSIZE kernel rows: seq shift via pltpu.roll on the merged row
    # axis + per-sample edge mask ((row % SEQ)+di in [0,SEQ)), feature-axis taps
    # folded into a banded Toeplitz matmul; tap results are tree-summed.
    row_mod = jax.lax.broadcasted_iota(jnp.int32, (rows_seq, DIM), 0) % SEQ
    for l in range(LAYER_CNN):
        parts = []
        for ki in range(KSIZE):
            di = ki - WINDOW
            if di == 0:
                shifted = ys
            else:
                rolled = pltpu.roll(ys, shift=(-di) % rows_seq, axis=0)
                valid = jnp.logical_and(row_mod + di >= 0, row_mod + di < SEQ)
                shifted = jnp.where(valid, rolled, 0.0)
            parts.append(jnp.dot(shifted, convT_ref[l, ki],
                                 preferred_element_type=f32))
        total = ((parts[0] + parts[1]) + (parts[2] + parts[3])) + parts[4]
        ys = jnp.maximum(total + scal_ref[l], 0.0)       # conv bias from SMEM

    # ---------- attention (no 17-row concat; two aligned projections) ----------
    hs_att = jnp.maximum(
        jnp.dot(ys, wa_ref[...], preferred_element_type=f32) + ba_ref[...], 0.0)
    h = jnp.maximum(
        jnp.dot(compound, wa_ref[...], preferred_element_type=f32) + ba_ref[...], 0.0)
    # broadcast each sample's query to its SEQ rows via expansion matmul
    h_exp = jnp.dot(e_seq_ref[...], h, preferred_element_type=f32)   # [B_blk*SEQ, DIM]
    # weights = tanh(h @ hs.T) as a lane reduction (no transpose)
    w_col = jnp.tanh(jnp.sum(hs_att * h_exp, axis=1, keepdims=True))  # [B_blk*SEQ, 1]
    # per-sample mean of weighted rows via pooling matmul -> [B_blk, DIM]
    protein = jnp.dot(p_seq_ref[...], w_col * hs_att, preferred_element_type=f32)

    # ---------- output MLP (all samples of the block at once) ----------
    cat = jnp.concatenate([compound, protein], axis=1)               # [B_blk, 2*DIM]
    for j in range(LAYER_OUTPUT):
        cat = jnp.maximum(
            jnp.dot(cat, wout_ref[j], preferred_element_type=f32) + bout_ref[j], 0.0)
    result = (jnp.sum(cat * wint_ref[...], axis=1, keepdims=True)
              + scal_ref[LAYER_CNN])                                  # [B_blk, 1]

    # single lane-dense writeback per block; wrapper reads column 0
    out_ref[...] = jnp.broadcast_to(result, (b_blk, 128))


@partial(jax.jit, static_argnames=("num_blocks",))
def kcat_forward(params, fingerprints, adjacency, words, num_blocks=NUM_BLOCKS):
    """Batched forward: fingerprints [B, N_ATOMS], adjacency [B, A, A], words [B, SEQ]."""
    f32 = jnp.float32
    B = fingerprints.shape[0]
    if B % num_blocks != 0 or (B // num_blocks) % 8 != 0:
        num_blocks = 1
    b_blk = B // num_blocks

    # --- one-time wrapper-side re-layouts (plain XLA, outside the kernel) ---
    wg_t = jnp.transpose(params['wg'], (0, 2, 1)).astype(f32)        # [L, in, out]
    wa_t = params['wa'].T.astype(f32)
    wout_t = jnp.transpose(params['wout'], (0, 2, 1)).astype(f32)

    # banded Toeplitz matrices realizing conv taps along the feature axis:
    # convT[l, ki, a, b] = conv_w[l, ki, a - b + WINDOW] inside the band
    a_idx = jnp.arange(DIM)[:, None]
    b_idx = jnp.arange(DIM)[None, :]
    off = a_idx - b_idx + WINDOW
    band = jnp.logical_and(off >= 0, off < KSIZE)
    off_c = jnp.clip(off, 0, KSIZE - 1)
    convT = jnp.where(band[None, None],
                      params['conv_w'][:, :, off_c], 0.0).astype(f32)  # [L,K,DIM,DIM]

    # wrapper-side embedding gathers -> row-stacked per-block slabs
    xs0 = params['emb_fp'].astype(f32)[fingerprints].reshape(B * N_ATOMS, DIM)
    ys0 = params['emb_word'].astype(f32)[words].reshape(B * SEQ, DIM)

    # block-diagonal adjacency per batch block: [num_blocks, B_blk*A, B_blk*A]
    eye_b = jnp.eye(b_blk, dtype=f32)
    adj_r = adjacency.astype(f32).reshape(num_blocks, b_blk, N_ATOMS, N_ATOMS)
    A_bd = jnp.einsum('nbij,bc->nbicj', adj_r, eye_b).reshape(
        num_blocks, b_blk * N_ATOMS, b_blk * N_ATOMS)

    # per-sample pooling / expansion matrices (resident, shared by all blocks)
    p_atoms = jnp.kron(eye_b, jnp.full((1, N_ATOMS), 1.0 / N_ATOMS, f32))  # [B_blk, B_blk*A]
    p_seq = jnp.kron(eye_b, jnp.full((1, SEQ), 1.0 / SEQ, f32))            # [B_blk, B_blk*SEQ]
    e_seq = jnp.kron(eye_b, jnp.ones((SEQ, 1), f32))                        # [B_blk*SEQ, B_blk]

    # scalar constants -> SMEM: [conv_b_0, conv_b_1, bint]
    scalars = jnp.concatenate([params['conv_b'].astype(f32).reshape(-1),
                               params['bint'].astype(f32).reshape(-1)])

    res2 = lambda n: (0, 0)
    res3 = lambda n: (0, 0, 0)
    res4 = lambda n: (0, 0, 0, 0)

    out = pl.pallas_call(
        _kcat_kernel,
        out_shape=jax.ShapeDtypeStruct((B, 128), f32),
        grid=(num_blocks,),
        in_specs=[
            pl.BlockSpec((b_blk * N_ATOMS, DIM), lambda n: (n, 0)),          # xs0 slab
            pl.BlockSpec((b_blk * SEQ, DIM), lambda n: (n, 0)),              # ys0 slab
            pl.BlockSpec((1, b_blk * N_ATOMS, b_blk * N_ATOMS),
                         lambda n: (n, 0, 0)),                               # block-diag A
            pl.BlockSpec(p_atoms.shape, res2),                               # pooling (atoms)
            pl.BlockSpec(p_seq.shape, res2),                                 # pooling (seq)
            pl.BlockSpec(e_seq.shape, res2),                                 # expansion (seq)
            pl.BlockSpec(wg_t.shape, res3),
            pl.BlockSpec(params['bg'].shape, res3),
            pl.BlockSpec(convT.shape, res4),
            pl.BlockSpec(wa_t.shape, res2),
            pl.BlockSpec(params['ba'].shape, res2),
            pl.BlockSpec(wout_t.shape, res3),
            pl.BlockSpec(params['bout'].shape, res3),
            pl.BlockSpec(params['wint'].shape, res2),
            pl.BlockSpec(memory_space=pltpu.MemorySpace.SMEM),               # scalars
        ],
        out_specs=pl.BlockSpec((b_blk, 128), lambda n: (n, 0)),
        compiler_params=pltpu.CompilerParams(
            dimension_semantics=("parallel",)),
    )(
        xs0, ys0, A_bd, p_atoms, p_seq, e_seq,
        wg_t, params['bg'].astype(f32), convT,
        wa_t, params['ba'].astype(f32),
        wout_t, params['bout'].astype(f32),
        params['wint'].astype(f32), scalars,
    )
    return out[:, 0]                                                   # [B]


def reference_forward(params, fingerprints, adjacency, words):
    """Pure-JAX replica of the PyTorch forward (single sample) for verification."""
    xs = params['emb_fp'][fingerprints].astype(jnp.float32)
    A = adjacency.astype(jnp.float32)
    for i in range(LAYER_GNN):
        hs = jax.nn.relu(xs @ params['wg'][i].T + params['bg'][i, 0])
        xs = xs + A @ hs
    compound = jnp.mean(xs, axis=0, keepdims=True)

    ys = params['emb_word'][words].astype(jnp.float32)
    for l in range(LAYER_CNN):
        img = ys[None, None]                                  # NCHW
        w = params['conv_w'][l].reshape(1, 1, KSIZE, KSIZE)   # OIHW
        out = jax.lax.conv_general_dilated(
            img, w, window_strides=(1, 1),
            padding=[(WINDOW, WINDOW), (WINDOW, WINDOW)],
            dimension_numbers=('NCHW', 'OIHW', 'NCHW'))
        ys = jax.nn.relu(out[0, 0] + params['conv_b'][l])

    h = jax.nn.relu(compound @ params['wa'].T + params['ba'])
    hs = jax.nn.relu(ys @ params['wa'].T + params['ba'])
    weights = jnp.tanh(h @ hs.T)
    ys_att = weights.T * hs
    protein = jnp.mean(ys_att, axis=0, keepdims=True)

    cat = jnp.concatenate([compound, protein], axis=1)
    for j in range(LAYER_OUTPUT):
        cat = jax.nn.relu(cat @ params['wout'][j].T + params['bout'][j, 0])
    return cat @ params['wint'].T + params['bint']


if __name__ == "__main__":
    B = 16
    key = jax.random.PRNGKey(0)
    keys = jax.random.split(key, 16)

    def normal(k, shape, scale=0.1):
        return (scale * jax.random.normal(k, shape)).astype(jnp.float32)

    params = {
        'emb_fp':   normal(keys[0], (N_FINGERPRINT, DIM), 1.0),
        'emb_word': normal(keys[1], (N_WORD, DIM), 1.0),
        'wg':       normal(keys[2], (LAYER_GNN, DIM, DIM)),
        'bg':       normal(keys[3], (LAYER_GNN, 1, DIM)),
        'conv_w':   normal(keys[4], (LAYER_CNN, KSIZE, KSIZE)),
        'conv_b':   normal(keys[5], (LAYER_CNN,)),
        'wa':       normal(keys[6], (DIM, DIM)),
        'ba':       normal(keys[7], (1, DIM)),
        'wout':     normal(keys[8], (LAYER_OUTPUT, 2 * DIM, 2 * DIM)),
        'bout':     normal(keys[9], (LAYER_OUTPUT, 1, 2 * DIM)),
        'wint':     normal(keys[10], (1, 2 * DIM)),
        'bint':     normal(keys[11], (1, 1)),
    }

    fingerprints = jax.random.randint(keys[12], (B, N_ATOMS), 0, N_FINGERPRINT)
    words = jax.random.randint(keys[13], (B, SEQ), 0, N_WORD)
    adjacency = (jax.random.uniform(keys[14], (B, N_ATOMS, N_ATOMS)) < 0.3).astype(jnp.float32)
    adjacency = jnp.maximum(adjacency, jnp.transpose(adjacency, (0, 2, 1)))  # symmetric

    out = jax.block_until_ready(kcat_forward(params, fingerprints, adjacency, words))

    ref = jnp.stack([
        reference_forward(params, fingerprints[b], adjacency[b], words[b])[0, 0]
        for b in range(B)])

    assert out.shape == (B,) and out.dtype == jnp.float32
    if not np.allclose(np.asarray(out), np.asarray(ref), rtol=1e-3, atol=1e-3):
        raise AssertionError(f"mismatch:\nkernel={np.asarray(out)}\nref   ={np.asarray(ref)}")
    print("KERNEL_OK")
</pallas_src>

<mosaic_0001>
module attributes {stable_mosaic.version = 11 : i64} {
  func.func @_kcat_kernel(%arg0: i32, %arg1: memref<64x32xf32, #tpu.memory_space<vmem>>, %arg2: memref<128x32xf32, #tpu.memory_space<vmem>>, %arg3: memref<1x64x64xf32, #tpu.memory_space<vmem>>, %arg4: memref<8x64xf32, #tpu.memory_space<vmem>>, %arg5: memref<8x128xf32, #tpu.memory_space<vmem>>, %arg6: memref<128x8xf32, #tpu.memory_space<vmem>>, %arg7: memref<2x32x32xf32, #tpu.memory_space<vmem>>, %arg8: memref<2x1x32xf32, #tpu.memory_space<vmem>>, %arg9: memref<2x5x32x32xf32, #tpu.memory_space<vmem>>, %arg10: memref<32x32xf32, #tpu.memory_space<vmem>>, %arg11: memref<1x32xf32, #tpu.memory_space<vmem>>, %arg12: memref<2x64x64xf32, #tpu.memory_space<vmem>>, %arg13: memref<2x1x64xf32, #tpu.memory_space<vmem>>, %arg14: memref<1x64xf32, #tpu.memory_space<vmem>>, %arg15: memref<3xf32, #tpu.memory_space<smem>>, %arg16: memref<8x128xf32, #tpu.memory_space<vmem>>) attributes {dimension_semantics = [#tpu.dimension_semantics<parallel>], iteration_bounds = array<i64: 2>, scalar_prefetch = 0 : i64, scratch_operands = 0 : i64, tpu.core_type = #tpu.core_type<tc>, window_params = [{transform_indices = @transform_0, window_bounds = array<i64: 64, 32>}, {transform_indices = @transform_1, window_bounds = array<i64: 128, 32>}, {transform_indices = @transform_2, window_bounds = array<i64: 1, 64, 64>}, {pipeline_mode = #tpu.pipeline_mode<synchronous>, transform_indices = @transform_3, window_bounds = array<i64: 8, 64>}, {pipeline_mode = #tpu.pipeline_mode<synchronous>, transform_indices = @transform_4, window_bounds = array<i64: 8, 128>}, {pipeline_mode = #tpu.pipeline_mode<synchronous>, transform_indices = @transform_5, window_bounds = array<i64: 128, 8>}, {pipeline_mode = #tpu.pipeline_mode<synchronous>, transform_indices = @transform_6, window_bounds = array<i64: 2, 32, 32>}, {pipeline_mode = #tpu.pipeline_mode<synchronous>, transform_indices = @transform_7, window_bounds = array<i64: 2, 1, 32>}, {pipeline_mode = #tpu.pipeline_mode<synchronous>, transform_indices = @transform_8, window_bounds = array<i64: 2, 5, 32, 32>}, {pipeline_mode = #tpu.pipeline_mode<synchronous>, transform_indices = @transform_9, window_bounds = array<i64: 32, 32>}, {pipeline_mode = #tpu.pipeline_mode<synchronous>, transform_indices = @transform_10, window_bounds = array<i64: 1, 32>}, {pipeline_mode = #tpu.pipeline_mode<synchronous>, transform_indices = @transform_11, window_bounds = array<i64: 2, 64, 64>}, {pipeline_mode = #tpu.pipeline_mode<synchronous>, transform_indices = @transform_12, window_bounds = array<i64: 2, 1, 64>}, {pipeline_mode = #tpu.pipeline_mode<synchronous>, transform_indices = @transform_13, window_bounds = array<i64: 1, 64>}, {transform_indices = @transform_14, window_bounds = array<i64: 3>}, {transform_indices = @transform_15, window_bounds = array<i64: 8, 128>}]} {
    %c0 = arith.constant 0 : index
    %c0_0 = arith.constant 0 : index
    %0 = vector.load %arg1[%c0, %c0_0] : memref<64x32xf32, #tpu.memory_space<vmem>>, vector<64x32xf32>
    %c0_1 = arith.constant 0 : index
    %c0_2 = arith.constant 0 : index
    %1 = vector.load %arg2[%c0_1, %c0_2] : memref<128x32xf32, #tpu.memory_space<vmem>>, vector<128x32xf32>
    %c0_3 = arith.constant 0 : index
    %c0_4 = arith.constant 0 : index
    %c0_5 = arith.constant 0 : index
    %2 = vector.load %arg3[%c0_3, %c0_4, %c0_5] : memref<1x64x64xf32, #tpu.memory_space<vmem>>, vector<1x64x64xf32>
    %3 = vector.shape_cast %2 : vector<1x64x64xf32> to vector<64x64xf32>
    %c0_6 = arith.constant 0 : index
    %c0_7 = arith.constant 0 : index
    %c0_8 = arith.constant 0 : index
    %4 = vector.load %arg7[%c0_6, %c0_7, %c0_8] : memref<2x32x32xf32, #tpu.memory_space<vmem>>, vector<1x32x32xf32>
    %5 = vector.shape_cast %4 : vector<1x32x32xf32> to vector<32x32xf32>
    %cst = arith.constant dense<0.000000e+00> : vector<64x32xf32>
    %6 = tpu.matmul %0, %5, %cst {dimension_numbers = #tpu.dot_dimension_numbers<[1], [0], [0], [1], [0, 0, 1, 1], [], []>} : vector<64x32xf32>, vector<32x32xf32>, vector<64x32xf32> -> vector<64x32xf32>
    %c0_9 = arith.constant 0 : index
    %c0_10 = arith.constant 0 : index
    %c0_11 = arith.constant 0 : index
    %7 = vector.load %arg8[%c0_9, %c0_10, %c0_11] : memref<2x1x32xf32, #tpu.memory_space<vmem>>, vector<1x1x32xf32>
    %8 = vector.shape_cast %7 : vector<1x1x32xf32> to vector<1x32xf32>
    %9 = vector.broadcast %8 : vector<1x32xf32> to vector<64x32xf32>
    %10 = arith.addf %6, %9 : vector<64x32xf32>
    %cst_12 = arith.constant 0.000000e+00 : f32
    %11 = vector.broadcast %cst_12 : f32 to vector<64x32xf32>
    %12 = arith.maximumf %10, %11 : vector<64x32xf32>
    %cst_13 = arith.constant dense<0.000000e+00> : vector<64x32xf32>
    %13 = tpu.matmul %3, %12, %cst_13 {dimension_numbers = #tpu.dot_dimension_numbers<[1], [0], [0], [1], [0, 0, 1, 1], [], []>} : vector<64x64xf32>, vector<64x32xf32>, vector<64x32xf32> -> vector<64x32xf32>
    %14 = arith.addf %0, %13 : vector<64x32xf32>
    %c1 = arith.constant 1 : index
    %c0_14 = arith.constant 0 : index
    %c0_15 = arith.constant 0 : index
    %15 = vector.load %arg7[%c1, %c0_14, %c0_15] : memref<2x32x32xf32, #tpu.memory_space<vmem>>, vector<1x32x32xf32>
    %16 = vector.shape_cast %15 : vector<1x32x32xf32> to vector<32x32xf32>
    %cst_16 = arith.constant dense<0.000000e+00> : vector<64x32xf32>
    %17 = tpu.matmul %14, %16, %cst_16 {dimension_numbers = #tpu.dot_dimension_numbers<[1], [0], [0], [1], [0, 0, 1, 1], [], []>} : vector<64x32xf32>, vector<32x32xf32>, vector<64x32xf32> -> vector<64x32xf32>
    %c1_17 = arith.constant 1 : index
    %c0_18 = arith.constant 0 : index
    %c0_19 = arith.constant 0 : index
    %18 = vector.load %arg8[%c1_17, %c0_18, %c0_19] : memref<2x1x32xf32, #tpu.memory_space<vmem>>, vector<1x1x32xf32>
    %19 = vector.shape_cast %18 : vector<1x1x32xf32> to vector<1x32xf32>
    %20 = vector.broadcast %19 : vector<1x32xf32> to vector<64x32xf32>
    %21 = arith.addf %17, %20 : vector<64x32xf32>
    %cst_20 = arith.constant 0.000000e+00 : f32
    %22 = vector.broadcast %cst_20 : f32 to vector<64x32xf32>
    %23 = arith.maximumf %21, %22 : vector<64x32xf32>
    %cst_21 = arith.constant dense<0.000000e+00> : vector<64x32xf32>
    %24 = tpu.matmul %3, %23, %cst_21 {dimension_numbers = #tpu.dot_dimension_numbers<[1], [0], [0], [1], [0, 0, 1, 1], [], []>} : vector<64x64xf32>, vector<64x32xf32>, vector<64x32xf32> -> vector<64x32xf32>
    %25 = arith.addf %14, %24 : vector<64x32xf32>
    %c0_22 = arith.constant 0 : index
    %c0_23 = arith.constant 0 : index
    %26 = vector.load %arg4[%c0_22, %c0_23] : memref<8x64xf32, #tpu.memory_space<vmem>>, vector<8x64xf32>
    %cst_24 = arith.constant dense<0.000000e+00> : vector<8x32xf32>
    %27 = tpu.matmul %26, %25, %cst_24 {dimension_numbers = #tpu.dot_dimension_numbers<[1], [0], [0], [1], [0, 0, 1, 1], [], []>} : vector<8x64xf32>, vector<64x32xf32>, vector<8x32xf32> -> vector<8x32xf32>
    %28 = tpu.iota {dimensions = array<i32: 0>} : vector<128x32xi32>
    %c16_i32 = arith.constant 16 : i32
    %c0_i32 = arith.constant 0 : i32
    %29 = arith.cmpi eq, %c16_i32, %c0_i32 : i32
    %c1_i32 = arith.constant 1 : i32
    %30 = arith.select %29, %c1_i32, %c16_i32 : i32
    %31 = vector.broadcast %30 : i32 to vector<128x32xi32>
    %32 = arith.remsi %28, %31 : vector<128x32xi32>
    %c0_i32_25 = arith.constant 0 : i32
    %33 = vector.broadcast %c0_i32_25 : i32 to vector<128x32xi32>
    %34 = arith.cmpi ne, %32, %33 : vector<128x32xi32>
    %c0_i32_26 = arith.constant 0 : i32
    %35 = vector.broadcast %c0_i32_26 : i32 to vector<128x32xi32>
    %36 = arith.cmpi slt, %32, %35 : vector<128x32xi32>
    %c0_i32_27 = arith.constant 0 : i32
    %37 = arith.cmpi slt, %30, %c0_i32_27 : i32
    %38 = vector.broadcast %37 : i1 to vector<128x32xi1>
    %39 = vector.broadcast %38 : vector<128x32xi1> to vector<128x32xi1>
    %40 = arith.xori %36, %39 : vector<128x32xi1>
    %41 = arith.andi %40, %34 : vector<128x32xi1>
    %42 = vector.broadcast %30 : i32 to vector<128x32xi32>
    %43 = arith.addi %32, %42 : vector<128x32xi32>
    %44 = arith.select %41, %43, %32 : vector<128x32xi1>, vector<128x32xi32>
    %c2_i32 = arith.constant 2 : i32
    %45 = tpu.dynamic_rotate %1 by %c2_i32 dim 0 : vector<128x32xf32>, i32 -> vector<128x32xf32>
    %c-2_i32 = arith.constant -2 : i32
    %46 = vector.broadcast %c-2_i32 : i32 to vector<128x32xi32>
    %47 = arith.addi %44, %46 : vector<128x32xi32>
    %c0_i32_28 = arith.constant 0 : i32
    %48 = vector.broadcast %c0_i32_28 : i32 to vector<128x32xi32>
    %49 = arith.cmpi sge, %47, %48 : vector<128x32xi32>
    %c-2_i32_29 = arith.constant -2 : i32
    %50 = vector.broadcast %c-2_i32_29 : i32 to vector<128x32xi32>
    %51 = arith.addi %44, %50 : vector<128x32xi32>
    %c16_i32_30 = arith.constant 16 : i32
    %52 = vector.broadcast %c16_i32_30 : i32 to vector<128x32xi32>
    %53 = arith.cmpi slt, %51, %52 : vector<128x32xi32>
    %54 = arith.andi %49, %53 : vector<128x32xi1>
    %cst_31 = arith.constant 0.000000e+00 : f32
    %55 = vector.broadcast %cst_31 : f32 to vector<128x32xf32>
    %56 = arith.select %54, %45, %55 : vector<128x32xi1>, vector<128x32xf32>
    %c0_32 = arith.constant 0 : index
    %c0_33 = arith.constant 0 : index
    %c0_34 = arith.constant 0 : index
    %c0_35 = arith.constant 0 : index
    %57 = vector.load %arg9[%c0_32, %c0_33, %c0_34, %c0_35] : memref<2x5x32x32xf32, #tpu.memory_space<vmem>>, vector<1x1x32x32xf32>
    %58 = vector.shape_cast %57 : vector<1x1x32x32xf32> to vector<32x32xf32>
    %cst_36 = arith.constant dense<0.000000e+00> : vector<128x32xf32>
    %59 = tpu.matmul %56, %58, %cst_36 {dimension_numbers = #tpu.dot_dimension_numbers<[1], [0], [0], [1], [0, 0, 1, 1], [], []>} : vector<128x32xf32>, vector<32x32xf32>, vector<128x32xf32> -> vector<128x32xf32>
    %c1_i32_37 = arith.constant 1 : i32
    %60 = tpu.dynamic_rotate %1 by %c1_i32_37 dim 0 : vector<128x32xf32>, i32 -> vector<128x32xf32>
    %c-1_i32 = arith.constant -1 : i32
    %61 = vector.broadcast %c-1_i32 : i32 to vector<128x32xi32>
    %62 = arith.addi %44, %61 : vector<128x32xi32>
    %c0_i32_38 = arith.constant 0 : i32
    %63 = vector.broadcast %c0_i32_38 : i32 to vector<128x32xi32>
    %64 = arith.cmpi sge, %62, %63 : vector<128x32xi32>
    %c-1_i32_39 = arith.constant -1 : i32
    %65 = vector.broadcast %c-1_i32_39 : i32 to vector<128x32xi32>
    %66 = arith.addi %44, %65 : vector<128x32xi32>
    %c16_i32_40 = arith.constant 16 : i32
    %67 = vector.broadcast %c16_i32_40 : i32 to vector<128x32xi32>
    %68 = arith.cmpi slt, %66, %67 : vector<128x32xi32>
    %69 = arith.andi %64, %68 : vector<128x32xi1>
    %cst_41 = arith.constant 0.000000e+00 : f32
    %70 = vector.broadcast %cst_41 : f32 to vector<128x32xf32>
    %71 = arith.select %69, %60, %70 : vector<128x32xi1>, vector<128x32xf32>
    %c0_42 = arith.constant 0 : index
    %c1_43 = arith.constant 1 : index
    %c0_44 = arith.constant 0 : index
    %c0_45 = arith.constant 0 : index
    %72 = vector.load %arg9[%c0_42, %c1_43, %c0_44, %c0_45] : memref<2x5x32x32xf32, #tpu.memory_space<vmem>>, vector<1x1x32x32xf32>
    %73 = vector.shape_cast %72 : vector<1x1x32x32xf32> to vector<32x32xf32>
    %cst_46 = arith.constant dense<0.000000e+00> : vector<128x32xf32>
    %74 = tpu.matmul %71, %73, %cst_46 {dimension_numbers = #tpu.dot_dimension_numbers<[1], [0], [0], [1], [0, 0, 1, 1], [], []>} : vector<128x32xf32>, vector<32x32xf32>, vector<128x32xf32> -> vector<128x32xf32>
    %c0_47 = arith.constant 0 : index
    %c2 = arith.constant 2 : index
    %c0_48 = arith.constant 0 : index
    %c0_49 = arith.constant 0 : index
    %75 = vector.load %arg9[%c0_47, %c2, %c0_48, %c0_49] : memref<2x5x32x32xf32, #tpu.memory_space<vmem>>, vector<1x1x32x32xf32>
    %76 = vector.shape_cast %75 : vector<1x1x32x32xf32> to vector<32x32xf32>
    %cst_50 = arith.constant dense<0.000000e+00> : vector<128x32xf32>
    %77 = tpu.matmul %1, %76, %cst_50 {dimension_numbers = #tpu.dot_dimension_numbers<[1], [0], [0], [1], [0, 0, 1, 1], [], []>} : vector<128x32xf32>, vector<32x32xf32>, vector<128x32xf32> -> vector<128x32xf32>
    %c127_i32 = arith.constant 127 : i32
    %78 = tpu.dynamic_rotate %1 by %c127_i32 dim 0 : vector<128x32xf32>, i32 -> vector<128x32xf32>
    %c1_i32_51 = arith.constant 1 : i32
    %79 = vector.broadcast %c1_i32_51 : i32 to vector<128x32xi32>
    %80 = arith.addi %44, %79 : vector<128x32xi32>
    %c0_i32_52 = arith.constant 0 : i32
    %81 = vector.broadcast %c0_i32_52 : i32 to vector<128x32xi32>
    %82 = arith.cmpi sge, %80, %81 : vector<128x32xi32>
    %c1_i32_53 = arith.constant 1 : i32
    %83 = vector.broadcast %c1_i32_53 : i32 to vector<128x32xi32>
    %84 = arith.addi %44, %83 : vector<128x32xi32>
    %c16_i32_54 = arith.constant 16 : i32
    %85 = vector.broadcast %c16_i32_54 : i32 to vector<128x32xi32>
    %86 = arith.cmpi slt, %84, %85 : vector<128x32xi32>
    %87 = arith.andi %82, %86 : vector<128x32xi1>
    %cst_55 = arith.constant 0.000000e+00 : f32
    %88 = vector.broadcast %cst_55 : f32 to vector<128x32xf32>
    %89 = arith.select %87, %78, %88 : vector<128x32xi1>, vector<128x32xf32>
    %c0_56 = arith.constant 0 : index
    %c3 = arith.constant 3 : index
    %c0_57 = arith.constant 0 : index
    %c0_58 = arith.constant 0 : index
    %90 = vector.load %arg9[%c0_56, %c3, %c0_57, %c0_58] : memref<2x5x32x32xf32, #tpu.memory_space<vmem>>, vector<1x1x32x32xf32>
    %91 = vector.shape_cast %90 : vector<1x1x32x32xf32> to vector<32x32xf32>
    %cst_59 = arith.constant dense<0.000000e+00> : vector<128x32xf32>
    %92 = tpu.matmul %89, %91, %cst_59 {dimension_numbers = #tpu.dot_dimension_numbers<[1], [0], [0], [1], [0, 0, 1, 1], [], []>} : vector<128x32xf32>, vector<32x32xf32>, vector<128x32xf32> -> vector<128x32xf32>
    %c126_i32 = arith.constant 126 : i32
    %93 = tpu.dynamic_rotate %1 by %c126_i32 dim 0 : vector<128x32xf32>, i32 -> vector<128x32xf32>
    %c2_i32_60 = arith.constant 2 : i32
    %94 = vector.broadcast %c2_i32_60 : i32 to vector<128x32xi32>
    %95 = arith.addi %44, %94 : vector<128x32xi32>
    %c0_i32_61 = arith.constant 0 : i32
    %96 = vector.broadcast %c0_i32_61 : i32 to vector<128x32xi32>
    %97 = arith.cmpi sge, %95, %96 : vector<128x32xi32>
    %c2_i32_62 = arith.constant 2 : i32
    %98 = vector.broadcast %c2_i32_62 : i32 to vector<128x32xi32>
    %99 = arith.addi %44, %98 : vector<128x32xi32>
    %c16_i32_63 = arith.constant 16 : i32
    %100 = vector.broadcast %c16_i32_63 : i32 to vector<128x32xi32>
    %101 = arith.cmpi slt, %99, %100 : vector<128x32xi32>
    %102 = arith.andi %97, %101 : vector<128x32xi1>
    %cst_64 = arith.constant 0.000000e+00 : f32
    %103 = vector.broadcast %cst_64 : f32 to vector<128x32xf32>
    %104 = arith.select %102, %93, %103 : vector<128x32xi1>, vector<128x32xf32>
    %c0_65 = arith.constant 0 : index
    %c4 = arith.constant 4 : index
    %c0_66 = arith.constant 0 : index
    %c0_67 = arith.constant 0 : index
    %105 = vector.load %arg9[%c0_65, %c4, %c0_66, %c0_67] : memref<2x5x32x32xf32, #tpu.memory_space<vmem>>, vector<1x1x32x32xf32>
    %106 = vector.shape_cast %105 : vector<1x1x32x32xf32> to vector<32x32xf32>
    %cst_68 = arith.constant dense<0.000000e+00> : vector<128x32xf32>
    %107 = tpu.matmul %104, %106, %cst_68 {dimension_numbers = #tpu.dot_dimension_numbers<[1], [0], [0], [1], [0, 0, 1, 1], [], []>} : vector<128x32xf32>, vector<32x32xf32>, vector<128x32xf32> -> vector<128x32xf32>
    %108 = arith.addf %59, %74 : vector<128x32xf32>
    %109 = arith.addf %77, %92 : vector<128x32xf32>
    %110 = arith.addf %108, %109 : vector<128x32xf32>
    %111 = arith.addf %110, %107 : vector<128x32xf32>
    %c0_69 = arith.constant 0 : index
    %112 = memref.load %arg15[%c0_69] : memref<3xf32, #tpu.memory_space<smem>>
    %113 = vector.broadcast %112 : f32 to vector<128x32xf32>
    %114 = arith.addf %111, %113 : vector<128x32xf32>
    %cst_70 = arith.constant 0.000000e+00 : f32
    %115 = vector.broadcast %cst_70 : f32 to vector<128x32xf32>
    %116 = arith.maximumf %114, %115 : vector<128x32xf32>
    %c2_i32_71 = arith.constant 2 : i32
    %117 = tpu.dynamic_rotate %116 by %c2_i32_71 dim 0 : vector<128x32xf32>, i32 -> vector<128x32xf32>
    %c-2_i32_72 = arith.constant -2 : i32
    %118 = vector.broadcast %c-2_i32_72 : i32 to vector<128x32xi32>
    %119 = arith.addi %44, %118 : vector<128x32xi32>
    %c0_i32_73 = arith.constant 0 : i32
    %120 = vector.broadcast %c0_i32_73 : i32 to vector<128x32xi32>
    %121 = arith.cmpi sge, %119, %120 : vector<128x32xi32>
    %c-2_i32_74 = arith.constant -2 : i32
    %122 = vector.broadcast %c-2_i32_74 : i32 to vector<128x32xi32>
    %123 = arith.addi %44, %122 : vector<128x32xi32>
    %c16_i32_75 = arith.constant 16 : i32
    %124 = vector.broadcast %c16_i32_75 : i32 to vector<128x32xi32>
    %125 = arith.cmpi slt, %123, %124 : vector<128x32xi32>
    %126 = arith.andi %121, %125 : vector<128x32xi1>
    %cst_76 = arith.constant 0.000000e+00 : f32
    %127 = vector.broadcast %cst_76 : f32 to vector<128x32xf32>
    %128 = arith.select %126, %117, %127 : vector<128x32xi1>, vector<128x32xf32>
    %c1_77 = arith.constant 1 : index
    %c0_78 = arith.constant 0 : index
    %c0_79 = arith.constant 0 : index
    %c0_80 = arith.constant 0 : index
    %129 = vector.load %arg9[%c1_77, %c0_78, %c0_79, %c0_80] : memref<2x5x32x32xf32, #tpu.memory_space<vmem>>, vector<1x1x32x32xf32>
    %130 = vector.shape_cast %129 : vector<1x1x32x32xf32> to vector<32x32xf32>
    %cst_81 = arith.constant dense<0.000000e+00> : vector<128x32xf32>
    %131 = tpu.matmul %128, %130, %cst_81 {dimension_numbers = #tpu.dot_dimension_numbers<[1], [0], [0], [1], [0, 0, 1, 1], [], []>} : vector<128x32xf32>, vector<32x32xf32>, vector<128x32xf32> -> vector<128x32xf32>
    %c1_i32_82 = arith.constant 1 : i32
    %132 = tpu.dynamic_rotate %116 by %c1_i32_82 dim 0 : vector<128x32xf32>, i32 -> vector<128x32xf32>
    %c-1_i32_83 = arith.constant -1 : i32
    %133 = vector.broadcast %c-1_i32_83 : i32 to vector<128x32xi32>
    %134 = arith.addi %44, %133 : vector<128x32xi32>
    %c0_i32_84 = arith.constant 0 : i32
    %135 = vector.broadcast %c0_i32_84 : i32 to vector<128x32xi32>
    %136 = arith.cmpi sge, %134, %135 : vector<128x32xi32>
    %c-1_i32_85 = arith.constant -1 : i32
    %137 = vector.broadcast %c-1_i32_85 : i32 to vector<128x32xi32>
    %138 = arith.addi %44, %137 : vector<128x32xi32>
    %c16_i32_86 = arith.constant 16 : i32
    %139 = vector.broadcast %c16_i32_86 : i32 to vector<128x32xi32>
    %140 = arith.cmpi slt, %138, %139 : vector<128x32xi32>
    %141 = arith.andi %136, %140 : vector<128x32xi1>
    %cst_87 = arith.constant 0.000000e+00 : f32
    %142 = vector.broadcast %cst_87 : f32 to vector<128x32xf32>
    %143 = arith.select %141, %132, %142 : vector<128x32xi1>, vector<128x32xf32>
    %c1_88 = arith.constant 1 : index
    %c1_89 = arith.constant 1 : index
    %c0_90 = arith.constant 0 : index
    %c0_91 = arith.constant 0 : index
    %144 = vector.load %arg9[%c1_88, %c1_89, %c0_90, %c0_91] : memref<2x5x32x32xf32, #tpu.memory_space<vmem>>, vector<1x1x32x32xf32>
    %145 = vector.shape_cast %144 : vector<1x1x32x32xf32> to vector<32x32xf32>
    %cst_92 = arith.constant dense<0.000000e+00> : vector<128x32xf32>
    %146 = tpu.matmul %143, %145, %cst_92 {dimension_numbers = #tpu.dot_dimension_numbers<[1], [0], [0], [1], [0, 0, 1, 1], [], []>} : vector<128x32xf32>, vector<32x32xf32>, vector<128x32xf32> -> vector<128x32xf32>
    %c1_93 = arith.constant 1 : index
    %c2_94 = arith.constant 2 : index
    %c0_95 = arith.constant 0 : index
    %c0_96 = arith.constant 0 : index
    %147 = vector.load %arg9[%c1_93, %c2_94, %c0_95, %c0_96] : memref<2x5x32x32xf32, #tpu.memory_space<vmem>>, vector<1x1x32x32xf32>
    %148 = vector.shape_cast %147 : vector<1x1x32x32xf32> to vector<32x32xf32>
    %cst_97 = arith.constant dense<0.000000e+00> : vector<128x32xf32>
    %149 = tpu.matmul %116, %148, %cst_97 {dimension_numbers = #tpu.dot_dimension_numbers<[1], [0], [0], [1], [0, 0, 1, 1], [], []>} : vector<128x32xf32>, vector<32x32xf32>, vector<128x32xf32> -> vector<128x32xf32>
    %c127_i32_98 = arith.constant 127 : i32
    %150 = tpu.dynamic_rotate %116 by %c127_i32_98 dim 0 : vector<128x32xf32>, i32 -> vector<128x32xf32>
    %c1_i32_99 = arith.constant 1 : i32
    %151 = vector.broadcast %c1_i32_99 : i32 to vector<128x32xi32>
    %152 = arith.addi %44, %151 : vector<128x32xi32>
    %c0_i32_100 = arith.constant 0 : i32
    %153 = vector.broadcast %c0_i32_100 : i32 to vector<128x32xi32>
    %154 = arith.cmpi sge, %152, %153 : vector<128x32xi32>
    %c1_i32_101 = arith.constant 1 : i32
    %155 = vector.broadcast %c1_i32_101 : i32 to vector<128x32xi32>
    %156 = arith.addi %44, %155 : vector<128x32xi32>
    %c16_i32_102 = arith.constant 16 : i32
    %157 = vector.broadcast %c16_i32_102 : i32 to vector<128x32xi32>
    %158 = arith.cmpi slt, %156, %157 : vector<128x32xi32>
    %159 = arith.andi %154, %158 : vector<128x32xi1>
    %cst_103 = arith.constant 0.000000e+00 : f32
    %160 = vector.broadcast %cst_103 : f32 to vector<128x32xf32>
    %161 = arith.select %159, %150, %160 : vector<128x32xi1>, vector<128x32xf32>
    %c1_104 = arith.constant 1 : index
    %c3_105 = arith.constant 3 : index
    %c0_106 = arith.constant 0 : index
    %c0_107 = arith.constant 0 : index
    %162 = vector.load %arg9[%c1_104, %c3_105, %c0_106, %c0_107] : memref<2x5x32x32xf32, #tpu.memory_space<vmem>>, vector<1x1x32x32xf32>
    %163 = vector.shape_cast %162 : vector<1x1x32x32xf32> to vector<32x32xf32>
    %cst_108 = arith.constant dense<0.000000e+00> : vector<128x32xf32>
    %164 = tpu.matmul %161, %163, %cst_108 {dimension_numbers = #tpu.dot_dimension_numbers<[1], [0], [0], [1], [0, 0, 1, 1], [], []>} : vector<128x32xf32>, vector<32x32xf32>, vector<128x32xf32> -> vector<128x32xf32>
    %c126_i32_109 = arith.constant 126 : i32
    %165 = tpu.dynamic_rotate %116 by %c126_i32_109 dim 0 : vector<128x32xf32>, i32 -> vector<128x32xf32>
    %c2_i32_110 = arith.constant 2 : i32
    %166 = vector.broadcast %c2_i32_110 : i32 to vector<128x32xi32>
    %167 = arith.addi %44, %166 : vector<128x32xi32>
    %c0_i32_111 = arith.constant 0 : i32
    %168 = vector.broadcast %c0_i32_111 : i32 to vector<128x32xi32>
    %169 = arith.cmpi sge, %167, %168 : vector<128x32xi32>
    %c2_i32_112 = arith.constant 2 : i32
    %170 = vector.broadcast %c2_i32_112 : i32 to vector<128x32xi32>
    %171 = arith.addi %44, %170 : vector<128x32xi32>
    %c16_i32_113 = arith.constant 16 : i32
    %172 = vector.broadcast %c16_i32_113 : i32 to vector<128x32xi32>
    %173 = arith.cmpi slt, %171, %172 : vector<128x32xi32>
    %174 = arith.andi %169, %173 : vector<128x32xi1>
    %cst_114 = arith.constant 0.000000e+00 : f32
    %175 = vector.broadcast %cst_114 : f32 to vector<128x32xf32>
    %176 = arith.select %174, %165, %175 : vector<128x32xi1>, vector<128x32xf32>
    %c1_115 = arith.constant 1 : index
    %c4_116 = arith.constant 4 : index
    %c0_117 = arith.constant 0 : index
    %c0_118 = arith.constant 0 : index
    %177 = vector.load %arg9[%c1_115, %c4_116, %c0_117, %c0_118] : memref<2x5x32x32xf32, #tpu.memory_space<vmem>>, vector<1x1x32x32xf32>
    %178 = vector.shape_cast %177 : vector<1x1x32x32xf32> to vector<32x32xf32>
    %cst_119 = arith.constant dense<0.000000e+00> : vector<128x32xf32>
    %179 = tpu.matmul %176, %178, %cst_119 {dimension_numbers = #tpu.dot_dimension_numbers<[1], [0], [0], [1], [0, 0, 1, 1], [], []>} : vector<128x32xf32>, vector<32x32xf32>, vector<128x32xf32> -> vector<128x32xf32>
    %180 = arith.addf %131, %146 : vector<128x32xf32>
    %181 = arith.addf %149, %164 : vector<128x32xf32>
    %182 = arith.addf %180, %181 : vector<128x32xf32>
    %183 = arith.addf %182, %179 : vector<128x32xf32>
    %c1_120 = arith.constant 1 : index
    %184 = memref.load %arg15[%c1_120] : memref<3xf32, #tpu.memory_space<smem>>
    %185 = vector.broadcast %184 : f32 to vector<128x32xf32>
    %186 = arith.addf %183, %185 : vector<128x32xf32>
    %cst_121 = arith.constant 0.000000e+00 : f32
    %187 = vector.broadcast %cst_121 : f32 to vector<128x32xf32>
    %188 = arith.maximumf %186, %187 : vector<128x32xf32>
    %c0_122 = arith.constant 0 : index
    %c0_123 = arith.constant 0 : index
    %189 = vector.load %arg10[%c0_122, %c0_123] : memref<32x32xf32, #tpu.memory_space<vmem>>, vector<32x32xf32>
    %cst_124 = arith.constant dense<0.000000e+00> : vector<128x32xf32>
    %190 = tpu.matmul %188, %189, %cst_124 {dimension_numbers = #tpu.dot_dimension_numbers<[1], [0], [0], [1], [0, 0, 1, 1], [], []>} : vector<128x32xf32>, vector<32x32xf32>, vector<128x32xf32> -> vector<128x32xf32>
    %c0_125 = arith.constant 0 : index
    %c0_126 = arith.constant 0 : index
    %191 = vector.load %arg11[%c0_125, %c0_126] : memref<1x32xf32, #tpu.memory_space<vmem>>, vector<1x32xf32>
    %192 = vector.broadcast %191 : vector<1x32xf32> to vector<128x32xf32>
    %193 = arith.addf %190, %192 : vector<128x32xf32>
    %cst_127 = arith.constant 0.000000e+00 : f32
    %194 = vector.broadcast %cst_127 : f32 to vector<128x32xf32>
    %195 = arith.maximumf %193, %194 : vector<128x32xf32>
    %c0_128 = arith.constant 0 : index
    %c0_129 = arith.constant 0 : index
    %196 = vector.load %arg10[%c0_128, %c0_129] : memref<32x32xf32, #tpu.memory_space<vmem>>, vector<32x32xf32>
    %cst_130 = arith.constant dense<0.000000e+00> : vector<8x32xf32>
    %197 = tpu.matmul %27, %196, %cst_130 {dimension_numbers = #tpu.dot_dimension_numbers<[1], [0], [0], [1], [0, 0, 1, 1], [], []>} : vector<8x32xf32>, vector<32x32xf32>, vector<8x32xf32> -> vector<8x32xf32>
    %c0_131 = arith.constant 0 : index
    %c0_132 = arith.constant 0 : index
    %198 = vector.load %arg11[%c0_131, %c0_132] : memref<1x32xf32, #tpu.memory_space<vmem>>, vector<1x32xf32>
    %199 = vector.broadcast %198 : vector<1x32xf32> to vector<8x32xf32>
    %200 = arith.addf %197, %199 : vector<8x32xf32>
    %cst_133 = arith.constant 0.000000e+00 : f32
    %201 = vector.broadcast %cst_133 : f32 to vector<8x32xf32>
    %202 = arith.maximumf %200, %201 : vector<8x32xf32>
    %c0_134 = arith.constant 0 : index
    %c0_135 = arith.constant 0 : index
    %203 = vector.load %arg6[%c0_134, %c0_135] : memref<128x8xf32, #tpu.memory_space<vmem>>, vector<128x8xf32>
    %cst_136 = arith.constant dense<0.000000e+00> : vector<128x32xf32>
    %204 = tpu.matmul %203, %202, %cst_136 {dimension_numbers = #tpu.dot_dimension_numbers<[1], [0], [0], [1], [0, 0, 1, 1], [], []>} : vector<128x8xf32>, vector<8x32xf32>, vector<128x32xf32> -> vector<128x32xf32>
    %205 = arith.mulf %195, %204 : vector<128x32xf32>
    %cst_137 = arith.constant dense<0.000000e+00> : vector<128xf32>
    %206 = vector.multi_reduction <add>, %205, %cst_137 [1] : vector<128x32xf32> to vector<128xf32>
    %207 = vector.shape_cast %206 : vector<128xf32> to vector<128x1xf32>
    %208 = math.tanh %207 : vector<128x1xf32>
    %c0_138 = arith.constant 0 : index
    %c0_139 = arith.constant 0 : index
    %209 = vector.load %arg5[%c0_138, %c0_139] : memref<8x128xf32, #tpu.memory_space<vmem>>, vector<8x128xf32>
    %210 = vector.broadcast %208 : vector<128x1xf32> to vector<128x32xf32>
    %211 = arith.mulf %210, %195 : vector<128x32xf32>
    %cst_140 = arith.constant dense<0.000000e+00> : vector<8x32xf32>
    %212 = tpu.matmul %209, %211, %cst_140 {dimension_numbers = #tpu.dot_dimension_numbers<[1], [0], [0], [1], [0, 0, 1, 1], [], []>} : vector<8x128xf32>, vector<128x32xf32>, vector<8x32xf32> -> vector<8x32xf32>
    %213 = tpu.concatenate %27, %212 in 1 : vector<8x32xf32>, vector<8x32xf32> -> vector<8x64xf32>
    %c0_141 = arith.constant 0 : index
    %c0_142 = arith.constant 0 : index
    %c0_143 = arith.constant 0 : index
    %214 = vector.load %arg12[%c0_141, %c0_142, %c0_143] : memref<2x64x64xf32, #tpu.memory_space<vmem>>, vector<1x64x64xf32>
    %215 = vector.shape_cast %214 : vector<1x64x64xf32> to vector<64x64xf32>
    %cst_144 = arith.constant dense<0.000000e+00> : vector<8x64xf32>
    %216 = tpu.matmul %213, %215, %cst_144 {dimension_numbers = #tpu.dot_dimension_numbers<[1], [0], [0], [1], [0, 0, 1, 1], [], []>} : vector<8x64xf32>, vector<64x64xf32>, vector<8x64xf32> -> vector<8x64xf32>
    %c0_145 = arith.constant 0 : index
    %c0_146 = arith.constant 0 : index
    %c0_147 = arith.constant 0 : index
    %217 = vector.load %arg13[%c0_145, %c0_146, %c0_147] : memref<2x1x64xf32, #tpu.memory_space<vmem>>, vector<1x1x64xf32>
    %218 = vector.shape_cast %217 : vector<1x1x64xf32> to vector<1x64xf32>
    %219 = vector.broadcast %218 : vector<1x64xf32> to vector<8x64xf32>
    %220 = arith.addf %216, %219 : vector<8x64xf32>
    %cst_148 = arith.constant 0.000000e+00 : f32
    %221 = vector.broadcast %cst_148 : f32 to vector<8x64xf32>
    %222 = arith.maximumf %220, %221 : vector<8x64xf32>
    %c1_149 = arith.constant 1 : index
    %c0_150 = arith.constant 0 : index
    %c0_151 = arith.constant 0 : index
    %223 = vector.load %arg12[%c1_149, %c0_150, %c0_151] : memref<2x64x64xf32, #tpu.memory_space<vmem>>, vector<1x64x64xf32>
    %224 = vector.shape_cast %223 : vector<1x64x64xf32> to vector<64x64xf32>
    %cst_152 = arith.constant dense<0.000000e+00> : vector<8x64xf32>
    %225 = tpu.matmul %222, %224, %cst_152 {dimension_numbers = #tpu.dot_dimension_numbers<[1], [0], [0], [1], [0, 0, 1, 1], [], []>} : vector<8x64xf32>, vector<64x64xf32>, vector<8x64xf32> -> vector<8x64xf32>
    %c1_153 = arith.constant 1 : index
    %c0_154 = arith.constant 0 : index
    %c0_155 = arith.constant 0 : index
    %226 = vector.load %arg13[%c1_153, %c0_154, %c0_155] : memref<2x1x64xf32, #tpu.memory_space<vmem>>, vector<1x1x64xf32>
    %227 = vector.shape_cast %226 : vector<1x1x64xf32> to vector<1x64xf32>
    %228 = vector.broadcast %227 : vector<1x64xf32> to vector<8x64xf32>
    %229 = arith.addf %225, %228 : vector<8x64xf32>
    %cst_156 = arith.constant 0.000000e+00 : f32
    %230 = vector.broadcast %cst_156 : f32 to vector<8x64xf32>
    %231 = arith.maximumf %229, %230 : vector<8x64xf32>
    %c0_157 = arith.constant 0 : index
    %c0_158 = arith.constant 0 : index
    %232 = vector.load %arg14[%c0_157, %c0_158] : memref<1x64xf32, #tpu.memory_space<vmem>>, vector<1x64xf32>
    %233 = vector.broadcast %232 : vector<1x64xf32> to vector<8x64xf32>
    %234 = arith.mulf %231, %233 : vector<8x64xf32>
    %cst_159 = arith.constant dense<0.000000e+00> : vector<8xf32>
    %235 = vector.multi_reduction <add>, %234, %cst_159 [1] : vector<8x64xf32> to vector<8xf32>
    %236 = vector.shape_cast %235 : vector<8xf32> to vector<8x1xf32>
    %c2_160 = arith.constant 2 : index
    %237 = memref.load %arg15[%c2_160] : memref<3xf32, #tpu.memory_space<smem>>
    %238 = vector.broadcast %237 : f32 to vector<8x1xf32>
    %239 = arith.addf %236, %238 : vector<8x1xf32>
    %240 = vector.shape_cast %239 : vector<8x1xf32> to vector<8x1xf32>
    %241 = vector.broadcast %240 : vector<8x1xf32> to vector<8x128xf32>
    %c0_161 = arith.constant 0 : index
    %c0_162 = arith.constant 0 : index
    %242 = vector.load %arg16[%c0_161, %c0_162] : memref<8x128xf32, #tpu.memory_space<vmem>>, vector<8x128xf32>
    tpu.vector_store %arg16[%c0_161, %c0_162], %241 {strides = array<i32>} : memref<8x128xf32, #tpu.memory_space<vmem>>, vector<8x128xf32>,
    return
  }
  func.func @transform_0(%arg0: i32) -> (i32, i32) {
    %c0_i32 = arith.constant 0 : i32
    %c0_i32_0 = arith.constant 0 : i32
    return %arg0, %c0_i32 : i32, i32
  }
  func.func @transform_1(%arg0: i32) -> (i32, i32) {
    %c0_i32 = arith.constant 0 : i32
    %c0_i32_0 = arith.constant 0 : i32
    return %arg0, %c0_i32 : i32, i32
  }
  func.func @transform_2(%arg0: i32) -> (i32, i32, i32) {
    %c0_i32 = arith.constant 0 : i32
    %c0_i32_0 = arith.constant 0 : i32
    %c0_i32_1 = arith.constant 0 : i32
    return %arg0, %c0_i32, %c0_i32_0 : i32, i32, i32
  }
  func.func @transform_3(%arg0: i32) -> (i32, i32) {
    %c0_i32 = arith.constant 0 : i32
    %c0_i32_0 = arith.constant 0 : i32
    %c0_i32_1 = arith.constant 0 : i32
    return %c0_i32, %c0_i32_0 : i32, i32
  }
  func.func @transform_4(%arg0: i32) -> (i32, i32) {
    %c0_i32 = arith.constant 0 : i32
    %c0_i32_0 = arith.constant 0 : i32
    %c0_i32_1 = arith.constant 0 : i32
    return %c0_i32, %c0_i32_0 : i32, i32
  }
  func.func @transform_5(%arg0: i32) -> (i32, i32) {
    %c0_i32 = arith.constant 0 : i32
    %c0_i32_0 = arith.constant 0 : i32
    %c0_i32_1 = arith.constant 0 : i32
    return %c0_i32, %c0_i32_0 : i32, i32
  }
  func.func @transform_6(%arg0: i32) -> (i32, i32, i32) {
    %c0_i32 = arith.constant 0 : i32
    %c0_i32_0 = arith.constant 0 : i32
    %c0_i32_1 = arith.constant 0 : i32
    %c0_i32_2 = arith.constant 0 : i32
    return %c0_i32, %c0_i32_0, %c0_i32_1 : i32, i32, i32
  }
  func.func @transform_7(%arg0: i32) -> (i32, i32, i32) {
    %c0_i32 = arith.constant 0 : i32
    %c0_i32_0 = arith.constant 0 : i32
    %c0_i32_1 = arith.constant 0 : i32
    %c0_i32_2 = arith.constant 0 : i32
    return %c0_i32, %c0_i32_0, %c0_i32_1 : i32, i32, i32
  }
  func.func @transform_8(%arg0: i32) -> (i32, i32, i32, i32) {
    %c0_i32 = arith.constant 0 : i32
    %c0_i32_0 = arith.constant 0 : i32
    %c0_i32_1 = arith.constant 0 : i32
    %c0_i32_2 = arith.constant 0 : i32
    %c0_i32_3 = arith.constant 0 : i32
    return %c0_i32, %c0_i32_0, %c0_i32_1, %c0_i32_2 : i32, i32, i32, i32
  }
  func.func @transform_9(%arg0: i32) -> (i32, i32) {
    %c0_i32 = arith.constant 0 : i32
    %c0_i32_0 = arith.constant 0 : i32
    %c0_i32_1 = arith.constant 0 : i32
    return %c0_i32, %c0_i32_0 : i32, i32
  }
  func.func @transform_10(%arg0: i32) -> (i32, i32) {
    %c0_i32 = arith.constant 0 : i32
    %c0_i32_0 = arith.constant 0 : i32
    %c0_i32_1 = arith.constant 0 : i32
    return %c0_i32, %c0_i32_0 : i32, i32
  }
  func.func @transform_11(%arg0: i32) -> (i32, i32, i32) {
    %c0_i32 = arith.constant 0 : i32
    %c0_i32_0 = arith.constant 0 : i32
    %c0_i32_1 = arith.constant 0 : i32
    %c0_i32_2 = arith.constant 0 : i32
    return %c0_i32, %c0_i32_0, %c0_i32_1 : i32, i32, i32
  }
  func.func @transform_12(%arg0: i32) -> (i32, i32, i32) {
    %c0_i32 = arith.constant 0 : i32
    %c0_i32_0 = arith.constant 0 : i32
    %c0_i32_1 = arith.constant 0 : i32
    %c0_i32_2 = arith.constant 0 : i32
    return %c0_i32, %c0_i32_0, %c0_i32_1 : i32, i32, i32
  }
  func.func @transform_13(%arg0: i32) -> (i32, i32) {
    %c0_i32 = arith.constant 0 : i32
    %c0_i32_0 = arith.constant 0 : i32
    %c0_i32_1 = arith.constant 0 : i32
    return %c0_i32, %c0_i32_0 : i32, i32
  }
  func.func @transform_14(%arg0: i32) -> i32 {
    %c0_i32 = arith.constant 0 : i32
    %c0_i32_0 = arith.constant 0 : i32
    return %c0_i32 : i32
  }
  func.func @transform_15(%arg0: i32) -> (i32, i32) {
    %c0_i32 = arith.constant 0 : i32
    %c0_i32_0 = arith.constant 0 : i32
    return %arg0, %c0_i32 : i32, i32
  }
}

</mosaic_0001>

<bundles_post_ra>
// kernel: kcat_forward.1
= control target key start
LH: loop header
LB: loop body
LE: loop exit
PB: predicated region body
PF: predicated region fallthrough
CT: control target
= control target key end

     0   :  { %20 = vsyncpa [#allocation3], 0  ;;  %s6850_s18 = smov 0   ;;  %s8640_s0 = inlined_call_operand.vmem [shape: f32[128,32], index: 0, kind: input, shape index: {}]   ;;  %s8641_s1 = inlined_call_operand.vmem [shape: f32[256,32], index: 1, kind: input, shape index: {}]   ;;  %s8642_s2 = inlined_call_operand.vmem [shape: f32[2,64,64], index: 2, kind: input, shape index: {}]   ;;  %s8643_s3 = inlined_call_operand.vmem [shape: f32[8,64], index: 3, kind: input, shape index: {}]   ;;  %s8644_s4 = inlined_call_operand.vmem [shape: f32[8,128], index: 4, kind: input, shape index: {}]   ;;  %s8645_s5 = inlined_call_operand.vmem [shape: f32[128,8], index: 5, kind: input, shape index: {}]   ;;  %s8646_s6 = inlined_call_operand.vmem [shape: f32[2,32,32], index: 6, kind: input, shape index: {}]   ;;  %s8647_s7 = inlined_call_operand.vmem [shape: f32[2,1,32], index: 7, kind: input, shape index: {}]   ;;  %s8648_s8 = inlined_call_operand.vmem [shape: f32[2,5,32,32], index: 8, kind: input, shape index: {}]   ;;  %s8649_s9 = inlined_call_operand.vmem [shape: f32[32,32], index: 9, kind: input, shape index: {}]   ;;  %s8650_s10 = inlined_call_operand.vmem [shape: f32[1,32], index: 10, kind: input, shape index: {}]   ;;  %s8651_s11 = inlined_call_operand.vmem [shape: f32[2,64,64], index: 11, kind: input, shape index: {}]   ;;  %s8652_s12 = inlined_call_operand.vmem [shape: f32[2,1,64], index: 12, kind: input, shape index: {}]   ;;  %s8653_s13 = inlined_call_operand.vmem [shape: f32[1,64], index: 13, kind: input, shape index: {}]   ;;  %s8654_s14 = inlined_call_operand.vmem [shape: f32[3], index: 14, kind: input, shape index: {}]   ;;  %s8655_s15 = inlined_call_operand.vmem [shape: f32[16,128], index: 15, kind: output, shape index: {}]  }
   0x1 LB: > { %s6856_s19 = sadd.s32 4294967295, %s6763_s18   ;;  %p5133_p0 = scmp.ge.s32.totalorder %s6763_s18, 1  ;;  %s6763_s18 = sphi %s6850_s18, %s26_s18  }
   0x2   : > { %p387_p1 = scmp.lt.s32.totalorder %s6763_s18, 3  ;;  %s433_s22 = sshll.u32 %s8654_s14, 4  ;;  %s434_s22 = int_to_ptr.vmem [resolvable:$true] %s433_s22 }
   0x3   : > { %p6691_p3 = scmp.eq.s32.totalorder %s6856_s19, 0  ;;  %s6738_s24 = scalar_lea.vmem %s434_s22, 16 }
   0x4   : > { %p6863_p2 = pnand %p5133_p0, %p387_p1  ;;  %p6739_p6 = scmp.ne.s32.totalorder %s434_s22, %s6738_s24 }
   0x5   : > { %p6746_p10 = scmp.lt.s32.totalorder %s434_s22, %s434_s22  ;;  %p6747_p11 = scmp.lt.s32.totalorder %s6738_s24, %s6738_s24 }
   0x6   : > { %p6687_p4 = pneg %p6863_p2 }
   0x7   : > { %p6748_p12 = por %p6747_p11, %p6746_p10 }
   0x8   : > { %p6688_p5 = pnand %p6691_p3, %p6687_p4 }
   0xa   : > { %p6740_p7 = pneg %p6688_p5 }
   0xc   : > { %p6741_p8 = pnand %p6740_p7, %p6739_p6 }
   0xe   : > { %p6742_p9 = pneg %p6741_p8 }
  0x10   : > { %p6749_p13 = pnand %p6748_p12, %p6742_p9 }
  0x12   : > { %6752 = shalt.err (!%p6749_p13)
}
  0x13   : > { %s6765_s25 = smov [#allocation2]   ;;  %472 = sbr.rel (%p6863_p2) target bundleno = 3037 (0xbdd), region = 80 }
  0x14   : > { %6690 = dma.vmem_to_smem (!%p6688_p5), %s434_s22, 16, %s6765_s25, [#allocation3]  }
  0x1a   : > { %6758 = dma.done.wait (%p6691_p3), [#allocation3], 16  }
  0x1b   : > { %6760 = vsyncadd (%p6691_p3), [#allocation3], 4294967280 }
  0x1c   : > { %478 = sfence }
  0x1d   : > { %v583_v0 = vld [vmem:[%s8646_s6] sm:$0xff]  ;;  %v584_v1 = vld [vmem:[%s8646_s6 + $0x8] sm:$0xff]  ;;  %v585_v2 = vld [vmem:[%s8646_s6 + $0x10] sm:$0xff]  ;;  %s5138_s17 = sshll.u32 %s6856_s19, 3  ;;  %vm594_vm0 = vcmask 261120   ;;  %p542_p1 = scmp.lt.s32.totalorder %s6856_s19, 1 }
  0x1e   : > { %v6353_v3 = vpack.c.bf16 %v584_v1, %v583_v0  ;;  %v586_v4 = vld [vmem:[%s8646_s6 + $0x18] sm:$0xff]  ;;  %p531_p0 = scmp.lt.s32.totalorder %s5138_s17, 15  ;;  %vm8666_vm1 = vcmask 523264   ;;  %v5162_v15 = vld [vmem:[%s8646_s6 + $0x20] sm:$0xff]  ;;  %v5163_v16 = vld [vmem:[%s8646_s6 + $0x28] sm:$0xff]  ;;  %vm8668_vm2 = vmmov 0  }
  0x1f   : > { %v6357_v5 = vpack.c.bf16 %v586_v4, %v585_v2  ;;  %s6928_s26 = scalar_select %p542_p1, %s6856_s19, 1  ;;  %v6377_v17 = vpack.c.bf16 %v5163_v16, %v5162_v15  ;;  %v5145_v18 = vld [vmem:[%s8647_s7] ss:$0 sm:$0xff]  ;;  %v5164_v54 = vld [vmem:[%s8646_s6 + $0x30] sm:$0xff]  ;;  %v5165_v55 = vld [vmem:[%s8646_s6 + $0x38] sm:$0xff] }
  0x20   : > { %6354 = vmatprep.subr.bf16.mxu1 %v6353_v3  ;;  %s8752_s17 = smov (!%p531_p0, %s5138_s17), 15  ;;  %v6381_v56 = vpack.c.bf16 %v5165_v55, %v5164_v54  ;;  %s5140_s16 = sshll.u32 %s6856_s19, 4 }
  0x21   : > { %6356 = vmatpush3.bf16.msra.mxu1 %v6353_v3  ;;  %s5139_s22 = sshll.u32 %s8752_s17, 3  ;;  %s5433_s27 = sshll.u32 %s6928_s26, 6  ;;  %6378 = vmatprep.subr.bf16.mxu0 %v6377_v17 }
  0x22   : > { %6358 = vmatprep.subr.bf16.mxu1 %v6357_v5  ;;  %s534_s25 = scalar_lea.vmem %s8640_s0, %s5139_s22  ;;  %s6934_s30 = scalar_lea.vmem %s8642_s2, %s5433_s27  ;;  %6380 = vmatpush3.bf16.msra.mxu0 %v6377_v17 }
  0x23   : > { %v6894_v6 = vld [vmem:[%s534_s25] sm:$0xff]  ;;  %v6898_v7 = vld [vmem:[%s534_s25 + $0x8] sm:$0xff]  ;;  %v6900_v8 = vld [vmem:[%s534_s25 + $0x10] sm:$0xff]  ;;  %6382 = vmatprep.subr.bf16.mxu0 %v6381_v56  ;;  %p537_p2 = scmp.lt.s32.totalorder %s5140_s16, 31  ;;  %s6769_s23 = smov 32  }
  0x24   : > { %5784 = vmatprep.mubr.msk.f32.mxu1 %vm594_vm0, %v6894_v6  ;;  %v6906_v9 = vld [vmem:[%s534_s25 + $0x18] sm:$0xff]  ;;  %v6908_v10 = vld [vmem:[%s534_s25 + $0x20] sm:$0xff]  ;;  %v6914_v11 = vld [vmem:[%s534_s25 + $0x28] sm:$0xff]  ;;  %s5430_s20 = sld [smem:[#allocation2 + $0x2]]  ;;  %s5144_s22 = sshll.u32 %s6928_s26, 3 }
  0x25   : > { %6360 = vmatpush3.bf16.msra.mxu1 %v6357_v5  ;;  %v6916_v12 = vld [vmem:[%s534_s25 + $0x30] sm:$0xff]  ;;  %v6922_v13 = vld [vmem:[%s534_s25 + $0x38] sm:$0xff]  ;;  %v575_v14 = vld [vmem:[%s6934_s30] sm:$0xff]  ;;  %s8754_s16 = smov (!%p537_p2, %s5140_s16), 31  ;;  %s2889_s25 = sld [smem:[#allocation2]] }
  0x26   : > { %v6948_v47 = vld [vmem:[%s6934_s30 + $0x8] sm:$0xff]  ;;  %v6951_v48 = vld [vmem:[%s6934_s30 + $0x10] sm:$0xff]  ;;  %v6958_v49 = vld [vmem:[%s6934_s30 + $0x18] sm:$0xff]  ;;  %6384 = vmatpush3.bf16.msra.mxu0 %v6381_v56  ;;  %s5141_s17 = sshll.u32 %s8754_s16, 3 }
  0x27   : > { %v6961_v50 = vld [vmem:[%s6934_s30 + $0x20] sm:$0xff]  ;;  %v6968_v51 = vld [vmem:[%s6934_s30 + $0x28] sm:$0xff]  ;;  %v6971_v52 = vld [vmem:[%s6934_s30 + $0x30] sm:$0xff]  ;;  %s7059_s21 = scalar_lea.vmem %s8641_s1, %s5141_s17 }
  0x28   : > { %5785 = vmatmul.mubr.msk.f32.vlgmr.msra.gmra.mrb[0].mxu1 %vm594_vm0, %v6898_v7  ;;  %v6978_v53 = vld [vmem:[%s6934_s30 + $0x38] sm:$0xff]  ;;  %v7065_v56 = vld [vmem:[%s7059_s21] sm:$0xff] }
  0x29   : > { %5787 = vmatprep.mubr.msk.f32.mxu1 %vm594_vm0, %v6900_v8 }
  0x2c   : > { %5788 = vmatmul.mubr.msk.f32.gmra.mrb[2].mxu1 %vm594_vm0, %v6906_v9 }
  0x2d   : > { %5790 = vmatprep.mubr.msk.f32.mxu1 %vm594_vm0, %v6908_v10 }
  0x30   : > { %5791 = vmatmul.mubr.msk.f32.gmra.mrb[4].mxu1 %vm594_vm0, %v6914_v11 }
  0x31   : > { %5793 = vmatprep.mubr.msk.f32.mxu1 %vm594_vm0, %v6916_v12 }
  0x34   : > { %5794 = vmatmul.mubr.msk.f32.gmra.mrb[6].mxu1 %vm594_vm0, %v6922_v13 }
  0x35   : > { %5812 = vmatprep.mubr.msk.f32.mxu1 %vm8666_vm1, %v575_v14 }
  0xfb   : > { %v5786_v19 = vpop.f32.mrb[0].mxu1 }
  0xfc   : > { %v691_v20 = vadd.f32 %v5786_v19, %v5145_v18  ;;  %v685_v21 = vpop.f32.mrb[1].mxu1 }
  0xfd   : > { %v686_v22 = vadd.f32 %v5145_v18, %v685_v21 }
  0xfe   : > { %v725_v23 = vmax.f32 %v691_v20, 0.0 }
  0xff   : > { %v724_v24 = vmax.f32 %v686_v22, 0.0  ;;  %v5789_v25 = vpop.f32.mrb[2].mxu1 }
 0x100   : > { %v701_v26 = vadd.f32 %v5789_v25, %v5145_v18  ;;  %v695_v27 = vpop.f32.mrb[3].mxu1 }
 0x101   : > { %v6361_v28 = vpack.c.bf16 %v725_v23, %v724_v24  ;;  %v696_v29 = vadd.f32 %v5145_v18, %v695_v27 }
 0x102   : > { %v727_v30 = vmax.f32 %v701_v26, 0.0 }
 0x103   : > { %v726_v31 = vmax.f32 %v696_v29, 0.0  ;;  %v5792_v32 = vpop.f32.mrb[4].mxu1  ;;  %6362 = vmatprep.subr.bf16.mxu1 %v6361_v28 }
 0x104   : > { %v711_v33 = vadd.f32 %v5792_v32, %v5145_v18  ;;  %v705_v34 = vpop.f32.mrb[5].mxu1  ;;  %6364 = vmatpush3.bf16.msra.mxu1 %v6361_v28 }
 0x105   : > { %v6365_v35 = vpack.c.bf16 %v727_v30, %v726_v31  ;;  %v706_v36 = vadd.f32 %v5145_v18, %v705_v34 }
 0x106   : > { %v729_v37 = vmax.f32 %v711_v33, 0.0 }
 0x107   : > { %v728_v38 = vmax.f32 %v706_v36, 0.0  ;;  %v5795_v39 = vpop.f32.mrb[6].mxu1  ;;  %6366 = vmatprep.subr.bf16.mxu1 %v6365_v35 }
 0x108   : > { %v721_v40 = vadd.f32 %v5795_v39, %v5145_v18  ;;  %v715_v41 = vpop.f32.mrb[7].mxu1  ;;  %6368 = vmatpush3.bf16.msra.mxu1 %v6365_v35  ;;  %v8656_v39 = vmov 0.0  }
 0x109   : > { %v6369_v42 = vpack.c.bf16 %v729_v37, %v728_v38  ;;  %v716_v43 = vadd.f32 %v5145_v18, %v715_v41  ;;  %v8658_v38 = vmov 0.0|0.0   ;;  %v1207_v41 = vlaneseq }
 0x10a   : > { %v731_v44 = vmax.f32 %v721_v40, 0.0  ;;  %6401 = vmatprep.subr.bf16.mxu0 %v8658_v38 }
 0x10b   : > { %v730_v45 = vmax.f32 %v716_v43, 0.0  ;;  %6370 = vmatprep.subr.bf16.mxu1 %v6369_v42 }
 0x10c   : > { %6372 = vmatpush3.bf16.msra.mxu1 %v6369_v42 }
 0x10d   : > { %v6373_v46 = vpack.c.bf16 %v731_v44, %v730_v45 }
 0x10f   : > { %6374 = vmatprep.subr.bf16.mxu1 %v6373_v46 }
 0x110   : > { %6376 = vmatpush3.bf16.msra.mxu1 %v6373_v46 }
 0x113   : > { %5813 = vmatmul.mubr.msk.f32.vlgmr.msra.gmra.mrb[8].mxu1 %vm8666_vm1, %v6948_v47 }
 0x114   : > { %5815 = vmatprep.mubr.msk.f32.mxu1 %vm8666_vm1, %v6951_v48 }
 0x117   : > { %5816 = vmatmul.mubr.msk.f32.gmra.mrb[10].mxu1 %vm8666_vm1, %v6958_v49 }
 0x118   : > { %5818 = vmatprep.mubr.msk.f32.mxu1 %vm8666_vm1, %v6961_v50 }
 0x11b   : > { %5819 = vmatmul.mubr.msk.f32.gmra.mrb[12].mxu1 %vm8666_vm1, %v6968_v51 }
 0x11c   : > { %5821 = vmatprep.mubr.msk.f32.mxu1 %vm8666_vm1, %v6971_v52 }
 0x11f   : > { %5822 = vmatmul.mubr.msk.f32.gmra.mrb[14].mxu1 %vm8666_vm1, %v6978_v53 }
 0x120   : > { %5860 = vmatprep.mubr.msk.f32.mxu1 %vm8666_vm1, %v575_v14 }
 0x1e6   : > { %v5814_v57 = vpop.f32.mrb[8].mxu1 }
 0x1e7   : > { %v823_v58 = vpop.f32.mrb[9].mxu1  ;;  %v6993_v60 = vadd.f32 %v5814_v57, %v6898_v7  ;;  %v7068_v57 = vld [vmem:[%s7059_s21 + $0x78] sm:$0xff] }
 0x1e8   : > { %v6990_v59 = vadd.f32 %v823_v58, %v6894_v6 }
 0x1ea   : > { %v5817_v61 = vpop.f32.mrb[10].mxu1  ;;  %5832 = vmatprep.mubr.msk.f32.mxu0 %vm594_vm0, %v6990_v59 }
 0x1eb   : > { %v833_v62 = vpop.f32.mrb[11].mxu1  ;;  %5833 = vmatmul.mubr.msk.f32.vlgmr.msra.gmra.mrb[0].mxu0 %vm594_vm0, %v6993_v60  ;;  %v7003_v0 = vadd.f32 %v5817_v61, %v6906_v9  ;;  %v5167_v9 = vld [vmem:[%s8647_s7 + $0x1] ss:$0 sm:$0xff] }
 0x1ec   : > { %v7000_v63 = vadd.f32 %v833_v62, %v6900_v8  ;;  %v5185_v62 = vld [vmem:[%s8648_s8 + $0x20] sm:$0xff] }
 0x1ee   : > { %v5820_v1 = vpop.f32.mrb[12].mxu1  ;;  %5835 = vmatprep.mubr.msk.f32.mxu0 %vm594_vm0, %v7000_v63 }
 0x1ef   : > { %v843_v2 = vpop.f32.mrb[13].mxu1  ;;  %5836 = vmatmul.mubr.msk.f32.gmra.mrb[2].mxu0 %vm594_vm0, %v7003_v0  ;;  %v7013_v4 = vadd.f32 %v5820_v1, %v6914_v11  ;;  %v1548_v1 = vrot.slane %v7068_v57, 7 }
 0x1f0   : > { %v7010_v3 = vadd.f32 %v843_v2, %v6908_v10 }
 0x1f2   : > { %v5823_v5 = vpop.f32.mrb[14].mxu1  ;;  %5838 = vmatprep.mubr.msk.f32.mxu0 %vm594_vm0, %v7010_v3 }
 0x1f3   : > { %v853_v6 = vpop.f32.mrb[15].mxu1  ;;  %5839 = vmatmul.mubr.msk.f32.gmra.mrb[4].mxu0 %vm594_vm0, %v7013_v4  ;;  %v7023_v8 = vadd.f32 %v5823_v5, %v6922_v13 }
 0x1f4   : > { %v7020_v7 = vadd.f32 %v853_v6, %v6916_v12 }
 0x1f6   : > { %5841 = vmatprep.mubr.msk.f32.mxu0 %vm594_vm0, %v7020_v7 }
 0x1f7   : > { %5842 = vmatmul.mubr.msk.f32.gmra.mrb[6].mxu0 %vm594_vm0, %v7023_v8 }
 0x1f8   : > { %5888 = vmatprep.mubr.msk.f32.mxu0 %vm8668_vm2, %v8656_v39 }
 0x2be   : > { %v5834_v10 = vpop.f32.mrb[0].mxu0 }
 0x2bf   : > { %v979_v11 = vadd.f32 %v5834_v10, %v5167_v9  ;;  %v973_v14 = vpop.f32.mrb[1].mxu0 }
 0x2c0   : > { %v974_v15 = vadd.f32 %v5167_v9, %v973_v14  ;;  %v5188_v14 = vld [vmem:[%s8648_s8 + $0x38] sm:$0xff] }
 0x2c1   : > { %v1013_v16 = vmax.f32 %v979_v11, 0.0 }
 0x2c2   : > { %v1012_v12 = vmax.f32 %v974_v15, 0.0  ;;  %v5837_v17 = vpop.f32.mrb[2].mxu0  ;;  %v7107_v15 = vld [vmem:[%s7059_s21 + $0x10] sm:$0xff] }
 0x2c3   : > { %v989_v18 = vadd.f32 %v5837_v17, %v5167_v9  ;;  %v983_v13 = vpop.f32.mrb[3].mxu0 }
 0x2c4   : > { %v6385_v19 = vpack.c.bf16 %v1013_v16, %v1012_v12  ;;  %v984_v20 = vadd.f32 %v5167_v9, %v983_v13  ;;  %v1133_v16 = vld [vmem:[%s8643_s3] sm:$0xff] }
 0x2c5   : > { %v1015_v21 = vmax.f32 %v989_v18, 0.0  ;;  %v7115_v18 = vld [vmem:[%s7059_s21 + $0x8] sm:$0xff] }
 0x2c6   : > { %v1014_v22 = vmax.f32 %v984_v20, 0.0  ;;  %v5840_v23 = vpop.f32.mrb[4].mxu0  ;;  %6386 = vmatprep.subr.bf16.mxu1 %v6385_v19  ;;  %v5209_v20 = vld [vmem:[%s8648_s8 + $0x60] sm:$0xff] }
 0x2c7   : > { %v999_v24 = vadd.f32 %v5840_v23, %v5167_v9  ;;  %v993_v25 = vpop.f32.mrb[5].mxu0  ;;  %6388 = vmatpush3.bf16.msra.mxu1 %v6385_v19 }
 0x2c8   : > { %v6389_v26 = vpack.c.bf16 %v1015_v21, %v1014_v22  ;;  %v994_v27 = vadd.f32 %v5167_v9, %v993_v25  ;;  %v5210_v21 = vld [vmem:[%s8648_s8 + $0x68] sm:$0xff]  ;;  %v1535_v22 = vrot.slane %v7107_v15, 7  ;;  %v1534_v25 = vrot.slane %v7115_v18, 7 }
 0x2c9   : > { %v1017_v28 = vmax.f32 %v999_v24, 0.0  ;;  %v7134_v24 = vld [vmem:[%s7059_s21 + $0x20] sm:$0xff] }
 0x2ca   : > { %v1016_v29 = vmax.f32 %v994_v27, 0.0  ;;  %v5843_v30 = vpop.f32.mrb[6].mxu0  ;;  %6390 = vmatprep.subr.bf16.mxu1 %v6389_v26  ;;  %v7140_v27 = vld [vmem:[%s7059_s21 + $0x18] sm:$0xff] }
 0x2cb   : > { %v1009_v31 = vadd.f32 %v5843_v30, %v5167_v9  ;;  %v1003_v32 = vpop.f32.mrb[7].mxu0  ;;  %6392 = vmatpush3.bf16.msra.mxu1 %v6389_v26  ;;  %v6421_v26 = vpack.c.bf16 %v5210_v21, %v5209_v20  ;;  %v1537_v30 = vrot.slane %v7134_v24, 7  ;;  %v7244_v21 = vld [vmem:[%s7059_s21 + $0x60] sm:$0xff] }
 0x2cc   : > { %v6393_v33 = vpack.c.bf16 %v1017_v28, %v1016_v29  ;;  %v1004_v34 = vadd.f32 %v5167_v9, %v1003_v32 }
 0x2cd   : > { %v1019_v35 = vmax.f32 %v1009_v31, 0.0  ;;  %v7150_v31 = vld [vmem:[%s7059_s21 + $0x30] sm:$0xff] }
 0x2ce   : > { %v1018_v36 = vmax.f32 %v1004_v34, 0.0  ;;  %6394 = vmatprep.subr.bf16.mxu1 %v6393_v33  ;;  %v5211_v34 = vld [vmem:[%s8648_s8 + $0x70] sm:$0xff]  ;;  %v1855_v39 = vrot.slane %v7150_v31, 1 }
 0x2cf   : > { %6396 = vmatpush3.bf16.msra.mxu1 %v6393_v33 }
 0x2d0   : > { %v6397_v37 = vpack.c.bf16 %v1019_v35, %v1018_v36  ;;  %v5212_v35 = vld [vmem:[%s8648_s8 + $0x78] sm:$0xff] }
 0x2d2   : > { %6398 = vmatprep.subr.bf16.mxu1 %v6397_v37 }
 0x2d3   : > { %6400 = vmatpush3.bf16.msra.mxu1 %v6397_v37  ;;  %v1536_v37 = vrot.slane %v7140_v27, 7 }
 0x2d6   : > { %5861 = vmatmul.mubr.msk.f32.vlgmr.msra.gmra.mrb[16].mxu1 %vm8666_vm1, %v6948_v47  ;;  %v7052_v47 = vshrl.u32 %v1207_v41, 7 }
 0x2d7   : > { %5863 = vmatprep.mubr.msk.f32.mxu1 %vm8666_vm1, %v6951_v48 }
 0x2d8   : > { %vm1549_vm3 = vcmp.lt.s32.totalorder %v7052_v47, 1  ;;  %v7093_v10 = vadd.s32 32, %v7052_v47  ;;  %v7130_v23 = vadd.s32 48, %v7052_v47  ;;  %v7154_v33 = vadd.s32 64, %v7052_v47 }
 0x2d9   : > { %v1563_v29 = vsel %vm1549_vm3, %v1534_v25, %v1535_v22  ;;  %vm1865_vm12 = vcmp.lt.s32.totalorder %v7052_v47, 7 }
 0x2da   : > { %5864 = vmatmul.mubr.msk.f32.gmra.mrb[18].mxu1 %vm8666_vm1, %v6958_v49  ;;  %v8665_v19 = vand.u32 15, %v7093_v10  ;;  %v8664_v32 = vand.u32 15, %v7130_v23 }
 0x2db   : > { %5866 = vmatprep.mubr.msk.f32.mxu1 %vm8666_vm1, %v6961_v50 }
 0x2dc   : > { %v7144_v28 = vadd.s32 4294967295, %v8665_v19  ;;  %v7391_v19 = vadd.s32 88, %v7052_v47 }
 0x2de   : > { %5867 = vmatmul.mubr.msk.f32.gmra.mrb[20].mxu1 %vm8666_vm1, %v6968_v51  ;;  %vm1586_vm6 = vcmp.ge.s32.totalorder %v7144_v28, 0 }
 0x2df   : > { %5869 = vmatprep.mubr.msk.f32.mxu1 %vm8666_vm1, %v6971_v52 }
 0x2e2   : > { %5870 = vmatmul.mubr.msk.f32.gmra.mrb[22].mxu1 %vm8666_vm1, %v6978_v53  ;;  %v8670_v53 = vand.u32 15, %v7052_v47 }
 0x2e4   : > { %v7085_v2 = vadd.s32 4294967295, %v8670_v53  ;;  %v1861_v53 = vrot.slane %v7244_v21, 1 }
 0x2e6   : > { %vm1582_vm4 = vcmp.ge.s32.totalorder %v7085_v2, 0  ;;  %v5330_v2 = vld [vmem:[%s8648_s8 + $0x128] sm:$0xff] }
 0x3a9   : > { %v5862_v40 = vpop.f32.mrb[16].mxu1 }
 0x3aa   : > { %v1126_v42 = vadd.f32 %v5862_v40, %v6993_v60  ;;  %v1086_v43 = vpop.f32.mrb[17].mxu1  ;;  %v7166_v40 = vld [vmem:[%s7059_s21 + $0x28] sm:$0xff] }
 0x3ab   : > { %v1125_v44 = vadd.f32 %v1086_v43, %v6990_v59  ;;  %v7073_v59 = vadd.s32 16, %v7052_v47  ;;  %v6425_v43 = vpack.c.bf16 %v5212_v35, %v5211_v34 }
 0x3ad   : > { %v6402_v45 = vpack.c.bf16 %v1126_v42, %v1125_v44  ;;  %v5865_v46 = vpop.f32.mrb[18].mxu1  ;;  %v8667_v9 = vand.u32 15, %v7073_v59  ;;  %v1539_v42 = vrot.slane %v7150_v31, 7  ;;  %v1561_v44 = vsel %vm1549_vm3, %v1536_v37, %v1537_v30 }
 0x3ae   : > { %v1128_v48 = vadd.f32 %v5865_v46, %v7003_v0  ;;  %v1096_v49 = vpop.f32.mrb[19].mxu1  ;;  %v1533_v0 = vrot.slane %v7065_v56, 7  ;;  %v7179_v46 = vld [vmem:[%s7059_s21 + $0x40] sm:$0xff] }
 0x3af   : > { %v1127_v50 = vadd.f32 %v1096_v49, %v7000_v63  ;;  %6403 = vmatpush3.bf16.msra.mxu0 %v6402_v45  ;;  %v5186_v63 = vld [vmem:[%s8648_s8 + $0x28] sm:$0xff]  ;;  %v7119_v13 = vadd.s32 4294967295, %v8667_v9  ;;  %v7176_v45 = vadd.s32 4294967295, %v8664_v32  ;;  %v7183_v49 = vadd.s32 80, %v7052_v47 }
 0x3b0   : > { %6404 = vmatprep.subr.bf16.mxu0 %v8658_v38  ;;  %v6413_v6 = vpack.c.bf16 %v5186_v63, %v5185_v62  ;;  %v1564_v36 = vsel %vm1549_vm3, %v1533_v0, %v1534_v25 }
 0x3b1   : > { %v6405_v51 = vpack.c.bf16 %v1128_v48, %v1127_v50  ;;  %v5868_v52 = vpop.f32.mrb[20].mxu1  ;;  %vm1584_vm5 = vcmp.ge.s32.totalorder %v7119_v13, 0  ;;  %v8663_v48 = vand.u32 15, %v7154_v33  ;;  %v5229_v50 = vld [vmem:[%s8648_s8 + $0x80] sm:$0xff]  ;;  %vm1588_vm7 = vcmp.ge.s32.totalorder %v7176_v45, 0  ;;  %v4172_v45 = vld [vmem:[%s8649_s9 + $0x8] sm:$0xff] }
 0x3b2   : > { %v1130_v54 = vadd.f32 %v5868_v52, %v7013_v4  ;;  %v1106_v55 = vpop.f32.mrb[21].mxu1  ;;  %v1632_v41 = vsel %vm1584_vm5, %v1563_v29, 0.0  ;;  %v1538_v52 = vrot.slane %v7166_v40, 7  ;;  %v7254_v29 = vld [vmem:[%s7059_s21 + $0x58] sm:$0xff] }
 0x3b3   : > { %v1129_v58 = vadd.f32 %v1106_v55, %v7010_v3  ;;  %6406 = vmatpush3.bf16.msra.mxu0 %v6405_v51  ;;  %v5230_v51 = vld [vmem:[%s8648_s8 + $0x88] sm:$0xff]  ;;  %v7197_v55 = vld [vmem:[%s7059_s21 + $0x38] sm:$0xff]  ;;  %v7209_v63 = vadd.s32 4294967295, %v8663_v48 }
 0x3b4   : > { %6407 = vmatprep.subr.bf16.mxu0 %v8658_v38  ;;  %v7204_v62 = vpack.c.bf16 %v5230_v51, %v5229_v50  ;;  %v1856_v48 = vrot.slane %v7197_v55, 1 }
 0x3b5   : > { %v6408_v60 = vpack.c.bf16 %v1130_v54, %v1129_v58  ;;  %v5871_v61 = vpop.f32.mrb[22].mxu1  ;;  %v1562_v54 = vsel %vm1549_vm3, %v1535_v22, %v1536_v37  ;;  %v1634_v58 = vsel %vm1586_vm6, %v1561_v44, 0.0  ;;  %vm1590_vm8 = vcmp.ge.s32.totalorder %v7209_v63, 0 }
 0x3b6   : > { %v1132_v3 = vadd.f32 %v5871_v61, %v7023_v8  ;;  %v1116_v4 = vpop.f32.mrb[23].mxu1  ;;  %v5187_v8 = vld [vmem:[%s8648_s8 + $0x30] sm:$0xff]  ;;  %v1541_v61 = vrot.slane %v7179_v46, 7 }
 0x3b7   : > { %v1131_v5 = vadd.f32 %v1116_v4, %v7020_v7  ;;  %6409 = vmatpush3.bf16.msra.mxu0 %v6408_v60  ;;  %v1565_v7 = vsel %vm1549_vm3, %v1548_v1, %v1533_v0  ;;  %v6417_v12 = vpack.c.bf16 %v5188_v14, %v5187_v8  ;;  %v1559_v60 = vsel %vm1549_vm3, %v1538_v52, %v1539_v42  ;;  %v7212_v0 = vld [vmem:[%s7059_s21 + $0x50] sm:$0xff] }
 0x3b8   : > { %6410 = vmatprep.subr.bf16.mxu0 %v8658_v38  ;;  %v1630_v17 = vsel %vm1582_vm4, %v1565_v7, 0.0  ;;  %v7216_v4 = vadd.s32 96, %v7052_v47  ;;  %v1636_v8 = vsel %vm1588_vm7, %v1559_v60, 0.0  ;;  %v1543_v7 = vrot.slane %v7212_v0, 7 }
 0x3b9   : > { %v6411_v11 = vpack.c.bf16 %v1132_v3, %v1131_v5  ;;  %v8662_v3 = vand.u32 15, %v7183_v49  ;;  %v1540_v5 = vrot.slane %v7197_v55, 7 }
 0x3bb   : > { %6412 = vmatpush3.bf16.msra.mxu0 %v6411_v11  ;;  %v7224_v11 = vld [vmem:[%s7059_s21 + $0x48] sm:$0xff]  ;;  %v1557_v14 = vsel %vm1549_vm3, %v1540_v5, %v1541_v61  ;;  %v1558_v22 = vsel %vm1549_vm3, %v1539_v42, %v1540_v5  ;;  %v7296_v5 = vadd.s32 24, %v7052_v47 }
 0x3bc   : > { %6414 = vmatprep.subr.bf16.mxu0 %v6413_v6  ;;  %v1542_v20 = vrot.slane %v7224_v11, 7  ;;  %v1638_v25 = vsel %vm1590_vm8, %v1557_v14, 0.0  ;;  %v7272_v42 = vld [vmem:[%s7059_s21 + $0x68] sm:$0xff]  ;;  %v1850_v14 = vrot.slane %v7115_v18, 1 }
 0x3be   : > { %5889 = vmatmul.mubr.msk.f32.vlgmr.msra.gmra.mrb[8].mxu0 %vm8666_vm1, %v1133_v16  ;;  %v7235_v16 = vadd.s32 4294967295, %v8662_v3  ;;  %v1556_v37 = vsel %vm1549_vm3, %v1541_v61, %v1542_v20  ;;  %v1530_v3 = vld [vmem:[%s8648_s8 + $0x8] sm:$0xff] }
 0x3bf   : > { %6416 = vmatpush3.bf16.msra.mxu0 %v6413_v6  ;;  %5899 = vmatprep.mubr.msk.f32.mxu0 %vm594_vm0, %v1630_v17  ;;  %v1560_v6 = vsel %vm1549_vm3, %v1537_v30, %v1538_v52  ;;  %v7239_v17 = vadd.s32 112, %v7052_v47  ;;  %v1545_v30 = vrot.slane %v7244_v21, 7 }
 0x3c0   : > { %6418 = vmatprep.subr.bf16.mxu0 %v6417_v12  ;;  %vm1592_vm9 = vcmp.ge.s32.totalorder %v7235_v16, 0 }
 0x3c1   : > { %v8660_v35 = vand.u32 15, %v7239_v17 }
 0x3c3   : > { %6420 = vmatpush3.bf16.msra.mxu0 %v6417_v12  ;;  %v8661_v12 = vand.u32 15, %v7216_v4  ;;  %v7285_v52 = vadd.s32 4294967295, %v8660_v35  ;;  %v7360_v35 = vadd.s32 72, %v7052_v47 }
 0x3c4   : > { %6422 = vmatprep.subr.bf16.mxu0 %v6421_v26 }
 0x3c5   : > { %v7260_v34 = vadd.s32 4294967295, %v8661_v12  ;;  %vm1596_vm11 = vcmp.ge.s32.totalorder %v7285_v52, 0  ;;  %v1529_v12 = vld [vmem:[%s8648_s8] sm:$0xff]  ;;  %v5332_v52 = vld [vmem:[%s8648_s8 + $0x138] sm:$0xff] }
 0x3c6   : > { %5900 = vmatmul.mubr.msk.f32.vlgmr.msra.gmra.mrb[10].mxu0 %vm594_vm0, %v1564_v36  ;;  %v7265_v36 = vld [vmem:[%s7059_s21 + $0x70] sm:$0xff] }
 0x3c7   : > { %5902 = vmatprep.mubr.msk.f32.mxu0 %vm594_vm0, %v1632_v41  ;;  %6424 = vmatpush3.bf16.msra.mxu0 %v6421_v26  ;;  %v1555_v26 = vsel %vm1549_vm3, %v1542_v20, %v1543_v7  ;;  %v1544_v41 = vrot.slane %v7254_v29, 7  ;;  %vm1594_vm10 = vcmp.ge.s32.totalorder %v7260_v34, 0  ;;  %v1547_v51 = vrot.slane %v7265_v36, 7 }
 0x3c8   : > { %6426 = vmatprep.subr.bf16.mxu0 %v6425_v43  ;;  %v1640_v44 = vsel %vm1592_vm9, %v1555_v26, 0.0  ;;  %v1849_v26 = vrot.slane %v7065_v56, 1 }
 0x3c9   : > { %v1553_v50 = vsel %vm1549_vm3, %v1544_v41, %v1545_v30 }
 0x3ca   : > { %5903 = vmatmul.mubr.msk.f32.gmra.mrb[12].mxu0 %vm594_vm0, %v1562_v54  ;;  %v1546_v54 = vrot.slane %v7272_v42, 7  ;;  %v1642_v61 = vsel %vm1594_vm10, %v1553_v50, 0.0 }
 0x3cb   : > { %5905 = vmatprep.mubr.msk.f32.mxu0 %vm594_vm0, %v1634_v58  ;;  %6428 = vmatpush3.bf16.msra.mxu0 %v6425_v43  ;;  %v7275_v43 = vadd.s32 8, %v7052_v47  ;;  %v1554_v58 = vsel %vm1549_vm3, %v1543_v7, %v1544_v41  ;;  %v1851_v7 = vrot.slane %v7107_v15, 1  ;;  %v1550_v41 = vsel %vm1549_vm3, %v1547_v51, %v1548_v1  ;;  %v5231_v1 = vld [vmem:[%s8648_s8 + $0x90] sm:$0xff] }
 0x3cc   : > { %6430 = vmatprep.subr.bf16.mxu0 %v7204_v62 }
 0x3cd   : > { %v1235_v60 = vand.u32 15, %v7275_v43  ;;  %v2164_v43 = vrot.slane %v7134_v24, 2 }
 0x3ce   : > { %5906 = vmatmul.mubr.msk.f32.gmra.mrb[14].mxu0 %vm594_vm0, %v1560_v6  ;;  %v1551_v6 = vsel %vm1549_vm3, %v1546_v54, %v1547_v51  ;;  %v5232_v51 = vld [vmem:[%s8648_s8 + $0x98] sm:$0xff] }
 0x3cf   : > { %5908 = vmatprep.mubr.msk.f32.mxu0 %vm594_vm0, %v1636_v8  ;;  %v1552_v8 = vsel %vm1549_vm3, %v1545_v30, %v1546_v54  ;;  %v7309_v20 = vadd.s32 1, %v1235_v60  ;;  %v1249_v30 = vand.u32 15, %v7296_v5  ;;  %v1880_v54 = vsel %vm1865_vm12, %v1849_v26, %v1850_v14 }
 0x3d1   : > { %vm8689_vm13 = vcmp.lt.s32.totalorder %v7309_v20, 16 }
 0x3d2   : > { %5909 = vmatmul.mubr.msk.f32.gmra.mrb[16].mxu0 %vm594_vm0, %v1558_v22  ;;  %v7312_v22 = vadd.s32 40, %v7052_v47 }
 0x3d3   : > { %5911 = vmatprep.mubr.msk.f32.mxu0 %vm594_vm0, %v1638_v25  ;;  %v1644_v25 = vsel %vm1596_vm11, %v1551_v6, 0.0  ;;  %v7340_v6 = vadd.s32 1, %v1249_v30 }
 0x3d4   : > { %v1263_v50 = vand.u32 15, %v7312_v22 }
 0x3d5   : > { %vm8688_vm14 = vcmp.lt.s32.totalorder %v7340_v6, 16 }
 0x3d6   : > { %5912 = vmatmul.mubr.msk.f32.gmra.mrb[18].mxu0 %vm594_vm0, %v1556_v37  ;;  %v7321_v37 = vadd.s32 56, %v7052_v47  ;;  %v7357_v38 = vadd.s32 1, %v1263_v50 }
 0x3d7   : > { %5914 = vmatprep.mubr.msk.f32.mxu0 %vm594_vm0, %v1640_v44  ;;  %v1879_v44 = vsel %vm1865_vm12, %v1850_v14, %v1851_v7 }
 0x3d8   : > { %v8673_v14 = vand.u32 15, %v7321_v37  ;;  %vm8678_vm15 = vcmp.lt.s32.totalorder %v7357_v38, 16 }
 0x3da   : > { %5915 = vmatmul.mubr.msk.f32.gmra.mrb[20].mxu0 %vm594_vm0, %v1554_v58  ;;  %v1852_v58 = vrot.slane %v7140_v27, 1 }
 0x3db   : > { %5917 = vmatprep.mubr.msk.f32.mxu0 %vm594_vm0, %v1642_v61  ;;  %v1853_v61 = vrot.slane %v7134_v24, 1 }
 0x3de   : > { %5918 = vmatmul.mubr.msk.f32.gmra.mrb[22].mxu0 %vm594_vm0, %v1552_v8  ;;  %v1947_v8 = vsel %vm8689_vm13, %v1879_v44, 0.0  ;;  %v1877_v44 = vsel %vm1865_vm12, %v1852_v58, %v1853_v61 }
 0x3df   : > { %5920 = vmatprep.mubr.msk.f32.mxu0 %vm594_vm0, %v1644_v25  ;;  %v1854_v25 = vrot.slane %v7166_v40, 1 }
 0x3e1   : > { %v1876_v32 = vsel %vm1865_vm12, %v1853_v61, %v1854_v25  ;;  %v1858_v61 = vrot.slane %v7224_v11, 1 }
 0x3e2   : > { %5921 = vmatmul.mubr.msk.f32.gmra.mrb[24].mxu0 %vm594_vm0, %v1550_v41  ;;  %v1878_v41 = vsel %vm1865_vm12, %v1851_v7, %v1852_v58  ;;  %v1857_v7 = vrot.slane %v7179_v46, 1  ;;  %v7378_v58 = vadd.s32 1, %v8673_v14 }
 0x3e3   : > { %5931 = vmatprep.mubr.msk.f32.mxu0 %vm594_vm0, %v1880_v54  ;;  %v6433_v54 = vpack.c.bf16 %v5232_v51, %v5231_v1  ;;  %v1949_v1 = vsel %vm8688_vm14, %v1877_v44, 0.0  ;;  %v1875_v51 = vsel %vm1865_vm12, %v1854_v25, %v1855_v39  ;;  %v1859_v25 = vrot.slane %v7212_v0, 1 }
 0x3e4   : > { %v1873_v44 = vsel %vm1865_vm12, %v1856_v48, %v1857_v7  ;;  %vm8674_vm1 = vcmp.lt.s32.totalorder %v7378_v58, 16 }
 0x3e5   : > { %v1871_v9 = vsel %vm1865_vm12, %v1858_v61, %v1859_v25 }
 0x3e6   : > { %5932 = vmatmul.mubr.msk.f32.vlgmr.msra.gmra.mrb[10].mxu0 %vm594_vm0, %v1947_v8  ;;  %v8671_v8 = vand.u32 15, %v7360_v35 }
 0x3e7   : > { %5934 = vmatprep.mubr.msk.f32.mxu0 %vm594_vm0, %v1878_v41  ;;  %6432 = vmatpush3.bf16.msra.mxu0 %v7204_v62  ;;  %v7393_v41 = vpack.c.bf16 %v1530_v3, %v1529_v12  ;;  %v1951_v62 = vsel %vm8678_vm15, %v1875_v51, 0.0  ;;  %v7409_v12 = vadd.s32 104, %v7052_v47  ;;  %v8672_v51 = vand.u32 15, %v7391_v19 }
 0x3e8   : > { %6434 = vmatprep.subr.bf16.mxu0 %v6433_v54  ;;  %v7406_v3 = vadd.s32 1, %v8671_v8  ;;  %vm2176_vm15 = vcmp.lt.s32.totalorder %v7052_v47, 6 }
 0x3ea   : > { %5935 = vmatmul.mubr.msk.f32.gmra.mrb[12].mxu0 %vm594_vm0, %v1949_v1  ;;  %v1874_v1 = vsel %vm1865_vm12, %v1855_v39, %v1856_v48  ;;  %vm8675_vm2 = vcmp.lt.s32.totalorder %v7406_v3, 16  ;;  %v8676_v39 = vand.u32 15, %v7409_v12  ;;  %v1860_v48 = vrot.slane %v7254_v29, 1 }
 0x3eb   : > { %5937 = vmatprep.mubr.msk.f32.mxu0 %vm594_vm0, %v1876_v32  ;;  %6436 = vmatpush3.bf16.msra.mxu0 %v6433_v54  ;;  %v1953_v32 = vsel %vm8674_vm1, %v1873_v44, 0.0  ;;  %v1872_v54 = vsel %vm1865_vm12, %v1857_v7, %v1858_v61  ;;  %v7432_v44 = vadd.s32 120, %v7052_v47  ;;  %v1955_v7 = vsel %vm8675_vm2, %v1871_v9, 0.0 }
 0x3ec   : > { %6438 = vmatprep.subr.bf16.mxu0 %v7393_v41  ;;  %v1862_v61 = vrot.slane %v7272_v42, 1  ;;  %v7442_v8 = vadd.s32 1, %v8676_v39  ;;  %v1869_v14 = vsel %vm1865_vm12, %v1860_v48, %v1861_v53 }
 0x3ee   : > { %5938 = vmatmul.mubr.msk.f32.gmra.mrb[14].mxu0 %vm594_vm0, %v1951_v62  ;;  %v7429_v62 = vadd.s32 1, %v8672_v51  ;;  %v1870_v51 = vsel %vm1865_vm12, %v1859_v25, %v1860_v48  ;;  %vm8679_vm2 = vcmp.lt.s32.totalorder %v7442_v8, 16  ;;  %v1864_v25 = vrot.slane %v7068_v57, 1 }
 0x3ef   : > { %5940 = vmatprep.mubr.msk.f32.mxu0 %vm594_vm0, %v1874_v1  ;;  %v1863_v1 = vrot.slane %v7265_v36, 1  ;;  %v1868_v48 = vsel %vm1865_vm12, %v1861_v53, %v1862_v61  ;;  %v8680_v53 = vrot.slane %v7065_v56, 2 }
 0x3f0   : > { %vm8677_vm1 = vcmp.lt.s32.totalorder %v7429_v62, 16 }
 0x3f1   : > { %v1957_v9 = vsel %vm8677_vm1, %v1869_v14, 0.0  ;;  %v1866_v14 = vsel %vm1865_vm12, %v1863_v1, %v1864_v25 }
 0x3f2   : > { %5941 = vmatmul.mubr.msk.f32.gmra.mrb[16].mxu0 %vm594_vm0, %v1953_v32  ;;  %v1333_v32 = vand.u32 15, %v7432_v44 }
 0x3f3   : > { %5943 = vmatprep.mubr.msk.f32.mxu0 %vm594_vm0, %v1872_v54  ;;  %v1867_v54 = vsel %vm1865_vm12, %v1862_v61, %v1863_v1  ;;  %v2161_v61 = vrot.slane %v7115_v18, 2 }
 0x3f4   : > { %v7462_v39 = vadd.s32 1, %v1333_v32 }
 0x3f5   : > { %v2191_v1 = vsel %vm2176_vm15, %v8680_v53, %v2161_v61 }
 0x3f6   : > { %5944 = vmatmul.mubr.msk.f32.gmra.mrb[18].mxu0 %vm594_vm0, %v1955_v7  ;;  %v1881_v7 = vsel %vm1865_vm12, %v1864_v25, %v1849_v26  ;;  %vm8681_vm1 = vcmp.lt.s32.totalorder %v7462_v39, 16  ;;  %v2163_v25 = vrot.slane %v7140_v27, 2 }
 0x3f7   : > { %5946 = vmatprep.mubr.msk.f32.mxu0 %vm594_vm0, %v1870_v51  ;;  %v1959_v51 = vsel %vm8679_vm2, %v1867_v54, 0.0  ;;  %v7481_v54 = vadd.s32 2, %v1235_v60  ;;  %v1961_v26 = vsel %vm8681_vm1, %v1881_v7, 0.0  ;;  %v7498_v60 = vadd.s32 2, %v1249_v30 }
 0x3f8   : > { %v2165_v30 = vrot.slane %v7166_v40, 2  ;;  %v2188_v53 = vsel %vm2176_vm15, %v2163_v25, %v2164_v43 }
 0x3f9   : > { %vm8682_vm2 = vcmp.lt.s32.totalorder %v7481_v54, 16  ;;  %vm8683_vm1 = vcmp.lt.s32.totalorder %v7498_v60, 16 }
 0x3fa   : > { %5947 = vmatmul.mubr.msk.f32.gmra.mrb[20].mxu0 %vm594_vm0, %v1957_v9  ;;  %v2162_v9 = vrot.slane %v7107_v15, 2  ;;  %v2260_v22 = vsel %vm8683_vm1, %v2188_v53, 0.0 }
 0x3fb   : > { %5949 = vmatprep.mubr.msk.f32.mxu0 %vm594_vm0, %v1868_v48 }
 0x3fc   : > { %v2190_v48 = vsel %vm2176_vm15, %v2161_v61, %v2162_v9  ;;  %v2189_v5 = vsel %vm2176_vm15, %v2162_v9, %v2163_v25  ;;  %v2166_v61 = vrot.slane %v7150_v31, 2  ;;  %v5206_v9 = vld [vmem:[%s8648_s8 + $0x48] sm:$0xff] }
 0x3fd   : > { %v2258_v7 = vsel %vm8682_vm2, %v2190_v48, 0.0  ;;  %v5205_v48 = vld [vmem:[%s8648_s8 + $0x40] sm:$0xff] }
 0x3fe   : > { %5950 = vmatmul.mubr.msk.f32.gmra.mrb[22].mxu0 %vm594_vm0, %v1959_v51  ;;  %v1531_v51 = vld [vmem:[%s8648_s8 + $0x10] sm:$0xff]  ;;  %v2186_v25 = vsel %vm2176_vm15, %v2165_v30, %v2166_v61 }
 0x3ff   : > { %5952 = vmatprep.mubr.msk.f32.mxu0 %vm594_vm0, %v1866_v14  ;;  %v1532_v14 = vld [vmem:[%s8648_s8 + $0x18] sm:$0xff] }
 0x402   : > { %5953 = vmatmul.mubr.msk.f32.gmra.mrb[24].mxu0 %vm594_vm0, %v1961_v26  ;;  %v7519_v26 = vadd.s32 2, %v1263_v50  ;;  %v2187_v50 = vsel %vm2176_vm15, %v2164_v43, %v2165_v30  ;;  %v2169_v30 = vrot.slane %v7224_v11, 2 }
 0x403   : > { %5963 = vmatprep.mubr.msk.f32.mxu0 %vm594_vm0, %v2191_v1  ;;  %v6441_v1 = vpack.c.bf16 %v1532_v14, %v1531_v51  ;;  %v2167_v51 = vrot.slane %v7197_v55, 2  ;;  %v2168_v14 = vrot.slane %v7179_v46, 2 }
 0x404   : > { %vm8684_vm2 = vcmp.lt.s32.totalorder %v7519_v26, 16 }
 0x405   : > { %v2262_v53 = vsel %vm8684_vm2, %v2186_v25, 0.0  ;;  %v2185_v43 = vsel %vm2176_vm15, %v2166_v61, %v2167_v51 }
 0x406   : > { %5964 = vmatmul.mubr.msk.f32.vlgmr.msra.gmra.mrb[10].mxu0 %vm594_vm0, %v2258_v7  ;;  %v8703_v7 = vand.u32 15, %v7321_v37  ;;  %v2184_v37 = vsel %vm2176_vm15, %v2167_v51, %v2168_v14  ;;  %v8705_v51 = vand.u32 15, %v7391_v19  ;;  %v2174_v19 = vrot.slane %v7265_v36, 2 }
 0x407   : > { %5966 = vmatprep.mubr.msk.f32.mxu0 %vm594_vm0, %v2189_v5  ;;  %6440 = vmatpush3.bf16.msra.mxu0 %v7393_v41  ;;  %v7543_v41 = vpack.c.bf16 %v5206_v9, %v5205_v48  ;;  %v2170_v48 = vrot.slane %v7212_v0, 2  ;;  %v8704_v9 = vand.u32 15, %v7360_v35  ;;  %v2172_v35 = vrot.slane %v7244_v21, 2 }
 0x408   : > { %v7541_v5 = vadd.s32 2, %v8703_v7  ;;  %6442 = vmatprep.subr.bf16.mxu0 %v6441_v1  ;;  %v7574_v7 = vadd.s32 2, %v8705_v51  ;;  %v8691_v51 = vrot.slane %v7068_v57, 6 }
 0x409   : > { %v2182_v25 = vsel %vm2176_vm15, %v2169_v30, %v2170_v48 }
 0x40a   : > { %5967 = vmatmul.mubr.msk.f32.gmra.mrb[12].mxu0 %vm594_vm0, %v2260_v22  ;;  %vm8685_vm1 = vcmp.lt.s32.totalorder %v7541_v5, 16  ;;  %v7558_v22 = vadd.s32 2, %v8704_v9 }
 0x40b   : > { %5969 = vmatprep.mubr.msk.f32.mxu0 %vm594_vm0, %v2187_v50  ;;  %6444 = vmatpush3.bf16.msra.mxu0 %v6441_v1  ;;  %v2264_v61 = vsel %vm8685_vm1, %v2184_v37, 0.0  ;;  %v2183_v1 = vsel %vm2176_vm15, %v2168_v14, %v2169_v30  ;;  %v2171_v50 = vrot.slane %v7254_v29, 2  ;;  %vm8687_vm1 = vcmp.lt.s32.totalorder %v7574_v7, 16 }
 0x40c   : > { %6446 = vmatprep.subr.bf16.mxu0 %v7543_v41  ;;  %vm8686_vm2 = vcmp.lt.s32.totalorder %v7558_v22, 16  ;;  %v8706_v37 = vand.u32 15, %v7409_v12  ;;  %v7603_v12 = vadd.s32 2, %v1333_v32  ;;  %v8710_v32 = vrot.slane %v7065_v56, 2 }
 0x40d   : > { %v2266_v14 = vsel %vm8686_vm2, %v2182_v25, 0.0  ;;  %v2180_v30 = vsel %vm2176_vm15, %v2171_v50, %v2172_v35  ;;  %v1416_v25 = vrot.slane %v7065_v56, 6 }
 0x40e   : > { %5970 = vmatmul.mubr.msk.f32.gmra.mrb[14].mxu0 %vm594_vm0, %v2262_v53  ;;  %v2181_v53 = vsel %vm2176_vm15, %v2170_v48, %v2171_v50  ;;  %v7589_v9 = vadd.s32 2, %v8706_v37  ;;  %v2268_v48 = vsel %vm8687_vm1, %v2180_v30, 0.0  ;;  %v2175_v50 = vrot.slane %v7068_v57, 2  ;;  %8707 = vst [vmem:[#allocation5_spill] sm:$0xff] %v7603_v12 }
 0x40f   : > { %5972 = vmatprep.mubr.msk.f32.mxu0 %vm594_vm0, %v2185_v43  ;;  %v2173_v43 = vrot.slane %v7272_v42, 2  ;;  %vm1432_vm1 = vcmp.lt.s32.totalorder %v7052_v47, 2  ;;  %vm2240_vm14 = vcmp.lt.s32.totalorder %v7603_v12, 16  ;;  %v1418_v37 = vrot.slane %v7107_v15, 6 }
 0x410   : > { %vm8690_vm2 = vcmp.lt.s32.totalorder %v7589_v9, 16  ;;  %v2177_v44 = vsel %vm2176_vm15, %v2174_v19, %v2175_v50  ;;  %v1448_v30 = vsel %vm1432_vm1, %v8691_v51, %v1416_v25 }
 0x412   : > { %5973 = vmatmul.mubr.msk.f32.gmra.mrb[16].mxu0 %vm594_vm0, %v2264_v61  ;;  %v2179_v61 = vsel %vm2176_vm15, %v2172_v35, %v2173_v43 }
 0x413   : > { %5975 = vmatprep.mubr.msk.f32.mxu0 %vm594_vm0, %v2183_v1  ;;  %v2178_v1 = vsel %vm2176_vm15, %v2173_v43, %v2174_v19  ;;  %v2192_v43 = vsel %vm2176_vm15, %v2175_v50, %v8710_v32  ;;  %v8712_v32 = vand.u32 15, %v7093_v10 }
 0x414   : > { %v2270_v35 = vsel %vm8690_vm2, %v2178_v1, 0.0  ;;  %v2272_v19 = vsel %vm2240_vm14, %v2192_v43, 0.0  ;;  %v1417_v1 = vrot.slane %v7115_v18, 6  ;;  %v5208_v43 = vld [vmem:[%s8648_s8 + $0x58] sm:$0xff] }
 0x416   : > { %5976 = vmatmul.mubr.msk.f32.gmra.mrb[18].mxu0 %vm594_vm0, %v2266_v14  ;;  %v8708_v14 = vand.u32 15, %v7052_v47  ;;  %v8745_v47 = vmov 0.0  }
 0x417   : > { %5978 = vmatprep.mubr.msk.f32.mxu0 %vm594_vm0, %v2181_v53 }
 0x418   : > { %v7609_v53 = vadd.s32 4294967294, %v8708_v14  ;;  %v1446_v14 = vsel %vm1432_vm1, %v1417_v1, %v1418_v37 }
 0x41a   : > { %8709 = vst [vmem:[#allocation6_spill] sm:$0xff] %v7609_v53  ;;  %5979 = vmatmul.mubr.msk.f32.gmra.mrb[20].mxu0 %vm594_vm0, %v2268_v48  ;;  %vm8692_vm13 = vcmp.ge.s32.totalorder %v7609_v53, 0  ;;  %v8711_v48 = vand.u32 15, %v7073_v59  ;;  %v1420_v59 = vrot.slane %v7134_v24, 6  ;;  %v1422_v53 = vrot.slane %v7150_v31, 6 }
 0x41b   : > { %5981 = vmatprep.mubr.msk.f32.mxu0 %vm594_vm0, %v2179_v61  ;;  %v1513_v50 = vsel %vm8692_vm13, %v1448_v30, 0.0  ;;  %v1447_v30 = vsel %vm1432_vm1, %v1416_v25, %v1417_v1  ;;  %v1421_v1 = vrot.slane %v7166_v40, 6 }
 0x41c   : > { %v7631_v61 = vadd.s32 4294967294, %v8711_v48  ;;  %v1419_v48 = vrot.slane %v7140_v27, 6 }
 0x41e   : > { %5982 = vmatmul.mubr.msk.f32.gmra.mrb[22].mxu0 %vm594_vm0, %v2270_v35  ;;  %vm8695_vm2 = vcmp.ge.s32.totalorder %v7631_v61, 0  ;;  %v7646_v35 = vadd.s32 4294967294, %v8712_v32  ;;  %v1444_v51 = vsel %vm1432_vm1, %v1419_v48, %v1420_v59  ;;  %v1445_v25 = vsel %vm1432_vm1, %v1418_v37, %v1419_v48 }
 0x41f   : > { %5984 = vmatprep.mubr.msk.f32.mxu0 %vm594_vm0, %v2177_v44  ;;  %v5207_v44 = vld [vmem:[%s8648_s8 + $0x50] sm:$0xff]  ;;  %v1515_v10 = vsel %vm8695_vm2, %v1446_v14, 0.0  ;;  %v1424_v14 = vrot.slane %v7179_v46, 6  ;;  %v8715_v48 = vand.u32 15, %v7183_v49  ;;  %v1428_v49 = vrot.slane %v7244_v21, 6 }
 0x420   : > { %v6449_v32 = vpack.c.bf16 %v5208_v43, %v5207_v44  ;;  %vm8696_vm13 = vcmp.ge.s32.totalorder %v7646_v35, 0  ;;  %v8714_v44 = vand.u32 15, %v7154_v33  ;;  %v1426_v33 = vrot.slane %v7212_v0, 6 }
 0x422   : > { %5985 = vmatmul.mubr.msk.f32.gmra.mrb[24].mxu0 %vm594_vm0, %v2272_v19  ;;  %v8713_v19 = vand.u32 15, %v7130_v23  ;;  %v1442_v23 = vsel %vm1432_vm1, %v1421_v1, %v1422_v53  ;;  %v7683_v43 = vadd.s32 4294967294, %v8714_v44 }
 0x423   : > { %5995 = vmatprep.mubr.msk.f32.mxu0 %vm594_vm0, %v1513_v50  ;;  %v1517_v50 = vsel %vm8696_vm13, %v1444_v51, 0.0  ;;  %v1423_v51 = vrot.slane %v7197_v55, 6 }
 0x424   : > { %v7667_v12 = vadd.s32 4294967294, %v8713_v19  ;;  %vm8698_vm13 = vcmp.ge.s32.totalorder %v7683_v43, 0 }
 0x426   : > { %5996 = vmatmul.mubr.msk.f32.vlgmr.msra.gmra.mrb[10].mxu0 %vm594_vm0, %v1447_v30  ;;  %vm8697_vm2 = vcmp.ge.s32.totalorder %v7667_v12, 0  ;;  %v1440_v30 = vsel %vm1432_vm1, %v1423_v51, %v1424_v14 }
 0x427   : > { %5998 = vmatprep.mubr.msk.f32.mxu0 %vm594_vm0, %v1515_v10  ;;  %6448 = vmatpush3.bf16.msra.mxu0 %v7543_v41  ;;  %v1443_v41 = vsel %vm1432_vm1, %v1420_v59, %v1421_v1  ;;  %v1519_v37 = vsel %vm8697_vm2, %v1442_v23, 0.0  ;;  %v7698_v10 = vadd.s32 4294967294, %v8715_v48  ;;  %v1441_v59 = vsel %vm1432_vm1, %v1422_v53, %v1423_v51 }
 0x428   : > { %6450 = vmatprep.subr.bf16.mxu0 %v6449_v32  ;;  %v1521_v19 = vsel %vm8698_vm13, %v1440_v30, 0.0  ;;  %v8716_v1 = vand.u32 15, %v7216_v4  ;;  %v1427_v23 = vrot.slane %v7254_v29, 6  ;;  %v1430_v4 = vrot.slane %v7265_v36, 6 }
 0x429   : > { %vm8699_vm2 = vcmp.ge.s32.totalorder %v7698_v10, 0  ;;  %v8717_v51 = vand.u32 15, %v7239_v17  ;;  %v1429_v30 = vrot.slane %v7272_v42, 6 }
 0x42a   : > { %5999 = vmatmul.mubr.msk.f32.gmra.mrb[12].mxu0 %vm594_vm0, %v1445_v25 }
 0x42b   : > { %6001 = vmatprep.mubr.msk.f32.mxu0 %vm594_vm0, %v1517_v50  ;;  %6452 = vmatpush3.bf16.msra.mxu0 %v6449_v32  ;;  %v1425_v32 = vrot.slane %v7224_v11, 6  ;;  %v7713_v50 = vadd.s32 4294967294, %v8716_v1  ;;  %v1435_v17 = vsel %vm1432_vm1, %v1428_v49, %v1429_v30 }
 0x42d   : > { %v1438_v25 = vsel %vm1432_vm1, %v1425_v32, %v1426_v33  ;;  %v1439_v53 = vsel %vm1432_vm1, %v1424_v14, %v1425_v32  ;;  %vm1477_vm13 = vcmp.ge.s32.totalorder %v7713_v50, 0  ;;  %v1437_v14 = vsel %vm1432_vm1, %v1426_v33, %v1427_v23 }
 0x42e   : > { %6002 = vmatmul.mubr.msk.f32.gmra.mrb[14].mxu0 %vm594_vm0, %v1443_v41  ;;  %v1523_v44 = vsel %vm8699_vm2, %v1438_v25, 0.0  ;;  %v1436_v41 = vsel %vm1432_vm1, %v1427_v23, %v1428_v49  ;;  %v8718_v32 = vrot.slane %v7068_v57, 6 }
 0x42f   : > { %6004 = vmatprep.mubr.msk.f32.mxu0 %vm594_vm0, %v1519_v37  ;;  %v7728_v37 = vadd.s32 4294967294, %v8717_v51  ;;  %v1525_v48 = vsel %vm1477_vm13, %v1436_v41, 0.0  ;;  %v7807_v41 = vstv %s2889_s25  ;;  %s5381_s25 = sld [smem:[#allocation2 + $0x1]] }
 0x431   : > { %vm1479_vm2 = vcmp.ge.s32.totalorder %v7728_v37, 0 }
 0x432   : > { %6005 = vmatmul.mubr.msk.f32.gmra.mrb[16].mxu0 %vm594_vm0, %v1441_v59  ;;  %v1434_v59 = vsel %vm1432_vm1, %v1429_v30, %v1430_v4 }
 0x433   : > { %6007 = vmatprep.mubr.msk.f32.mxu0 %vm594_vm0, %v1521_v19  ;;  %v1527_v33 = vsel %vm1479_vm2, %v1434_v59, 0.0  ;;  %v1433_v19 = vsel %vm1432_vm1, %v1430_v4, %v8718_v32 }
 0x436   : > { %6008 = vmatmul.mubr.msk.f32.gmra.mrb[18].mxu0 %vm594_vm0, %v1439_v53 }
 0x437   : > { %6010 = vmatprep.mubr.msk.f32.mxu0 %vm594_vm0, %v1523_v44 }
 0x43a   : > { %6011 = vmatmul.mubr.msk.f32.gmra.mrb[20].mxu0 %vm594_vm0, %v1437_v14 }
 0x43b   : > { %6013 = vmatprep.mubr.msk.f32.mxu0 %vm594_vm0, %v1525_v48 }
 0x43e   : > { %6014 = vmatmul.mubr.msk.f32.gmra.mrb[22].mxu0 %vm594_vm0, %v1435_v17 }
 0x43f   : > { %6016 = vmatprep.mubr.msk.f32.mxu0 %vm594_vm0, %v1527_v33 }
 0x442   : > { %6017 = vmatmul.mubr.msk.f32.gmra.mrb[24].mxu0 %vm594_vm0, %v1433_v19 }
 0x443   : > { %6027 = vmatprep.mubr.msk.f32.mxu0 %vm594_vm0, %v7065_v56 }
 0x446   : > { %6028 = vmatmul.mubr.msk.f32.vlgmr.msra.gmra.mrb[10].mxu0 %vm594_vm0, %v7115_v18  ;;  %v5285_v18 = vld [vmem:[%s8648_s8 + $0xc0] sm:$0xff] }
 0x447   : > { %6030 = vmatprep.mubr.msk.f32.mxu0 %vm594_vm0, %v7107_v15 }
 0x44a   : > { %6031 = vmatmul.mubr.msk.f32.gmra.mrb[12].mxu0 %vm594_vm0, %v7140_v27 }
 0x44b   : > { %6033 = vmatprep.mubr.msk.f32.mxu0 %vm594_vm0, %v7134_v24  ;;  %v5286_v24 = vld [vmem:[%s8648_s8 + $0xc8] sm:$0xff] }
 0x44c   : > { %v6453_v27 = vpack.c.bf16 %v5286_v24, %v5285_v18 }
 0x44e   : > { %6034 = vmatmul.mubr.msk.f32.gmra.mrb[14].mxu0 %vm594_vm0, %v7166_v40  ;;  %6454 = vmatprep.subr.bf16.mxu1 %v6453_v27 }
 0x44f   : > { %6036 = vmatprep.mubr.msk.f32.mxu0 %vm594_vm0, %v7150_v31  ;;  %6456 = vmatpush3.bf16.msra.mxu1 %v6453_v27  ;;  %v5287_v31 = vld [vmem:[%s8648_s8 + $0xd0] sm:$0xff] }
 0x452   : > { %6037 = vmatmul.mubr.msk.f32.gmra.mrb[16].mxu0 %vm594_vm0, %v7197_v55  ;;  %v5310_v55 = vld [vmem:[%s8648_s8 + $0x108] sm:$0xff] }
 0x453   : > { %6039 = vmatprep.mubr.msk.f32.mxu0 %vm594_vm0, %v7179_v46  ;;  %v5309_v46 = vld [vmem:[%s8648_s8 + $0x100] sm:$0xff] }
 0x456   : > { %6040 = vmatmul.mubr.msk.f32.gmra.mrb[18].mxu0 %vm594_vm0, %v7224_v11 }
 0x457   : > { %6042 = vmatprep.mubr.msk.f32.mxu0 %vm594_vm0, %v7212_v0  ;;  %v6461_v0 = vpack.c.bf16 %v5310_v55, %v5309_v46 }
 0x45a   : > { %6043 = vmatmul.mubr.msk.f32.gmra.mrb[20].mxu0 %vm594_vm0, %v7254_v29 }
 0x45b   : > { %6045 = vmatprep.mubr.msk.f32.mxu0 %vm594_vm0, %v7244_v21 }
 0x45e   : > { %6046 = vmatmul.mubr.msk.f32.gmra.mrb[22].mxu0 %vm594_vm0, %v7272_v42 }
 0x45f   : > { %6048 = vmatprep.mubr.msk.f32.mxu0 %vm594_vm0, %v7265_v36 }
 0x462   : > { %6049 = vmatmul.mubr.msk.f32.gmra.mrb[24].mxu0 %vm594_vm0, %v7068_v57  ;;  %v5288_v57 = vld [vmem:[%s8648_s8 + $0xd8] sm:$0xff] }
 0x463   : > { %v6457_v40 = vpack.c.bf16 %v5288_v57, %v5287_v31 }
 0x465   : > { %6458 = vmatprep.subr.bf16.mxu1 %v6457_v40 }
 0x466   : > { %6460 = vmatpush3.bf16.msra.mxu1 %v6457_v40 }
 0x467   : > { %6462 = vmatprep.subr.bf16.mxu1 %v6461_v0 }
 0x491   : > { %v7785_v56 = vpop.f32.mrb[8].mxu0 }
 0x492   : > { %8719 = vst [vmem:[#allocation7_spill] sm:$0xff] %v7785_v56  ;;  %v5890_v15 = vpop.f32.mrb[9].mxu0 }
 0x499   : > { %v8747_v37 = vld [vmem:[#allocation7_spill] sm:$0xff] }
 0x519   : > { %v6029_v11 = vpop.f32.mrb[10].mxu0 }
 0x51a   : > { %v2778_v21 = vpop.f32.mrb[11].mxu0  ;;  %v2892_v14 = vadd.f32 %v6029_v11, %v7807_v41 }
 0x51b   : > { %v2891_v48 = vadd.f32 %v7807_v41, %v2778_v21 }
 0x51c   : > { %v7817_v32 = vmax.f32 %v2892_v14, 0.0 }
 0x51d   : > { %v6032_v29 = vpop.f32.mrb[12].mxu0  ;;  %v7819_v15 = vmax.f32 %v2891_v48, 0.0 }
 0x51e   : > { %v2788_v36 = vpop.f32.mrb[13].mxu0  ;;  %v2894_v18 = vadd.f32 %v6032_v29, %v7807_v41  ;;  %v2977_v55 = vrot.slane %v7817_v32, 7 }
 0x51f   : > { %v2893_v51 = vadd.f32 %v7807_v41, %v2788_v36  ;;  %v2976_v36 = vrot.slane %v7819_v15, 7 }
 0x520   : > { %v7830_v11 = vmax.f32 %v2894_v18, 0.0 }
 0x521   : > { %v6035_v42 = vpop.f32.mrb[14].mxu0  ;;  %v7814_v17 = vmax.f32 %v2893_v51, 0.0 }
 0x522   : > { %v2798_v25 = vpop.f32.mrb[15].mxu0  ;;  %v2896_v21 = vadd.f32 %v6035_v42, %v7807_v41 }
 0x523   : > { %v2895_v33 = vadd.f32 %v7807_v41, %v2798_v25  ;;  %v2978_v31 = vrot.slane %v7814_v17, 7  ;;  %v5311_v25 = vld [vmem:[%s8648_s8 + $0x110] sm:$0xff] }
 0x525   : > { %v6038_v49 = vpop.f32.mrb[16].mxu0  ;;  %v7824_v57 = vmax.f32 %v2895_v33, 0.0  ;;  %v3005_v51 = vsel %vm1549_vm3, %v2977_v55, %v2978_v31 }
 0x526   : > { %v2808_v1 = vpop.f32.mrb[17].mxu0  ;;  %v2898_v56 = vadd.f32 %v6038_v49, %v7807_v41  ;;  %v3010_v49 = vsel %vm1584_vm5, %v3005_v51, 0.0  ;;  %vm8724_vm5 = vcmp.lt.s32.totalorder %v7357_v38, 16 }
 0x527   : > { %v2897_v40 = vadd.f32 %v7807_v41, %v2808_v1  ;;  %v5312_v1 = vld [vmem:[%s8648_s8 + $0x118] sm:$0xff]  ;;  %v2980_v33 = vrot.slane %v7824_v57, 7 }
 0x528   : > { %v6465_v18 = vpack.c.bf16 %v5312_v1, %v5311_v25 }
 0x529   : > { %v6041_v53 = vpop.f32.mrb[18].mxu0  ;;  %v7843_v14 = vmax.f32 %v2897_v40, 0.0  ;;  %v2979_v40 = vrot.slane %v7830_v11, 7 }
 0x52a   : > { %v2818_v23 = vpop.f32.mrb[19].mxu0  ;;  %v2900_v13 = vadd.f32 %v6041_v53, %v7807_v41 }
 0x52b   : > { %v2899_v48 = vadd.f32 %v7807_v41, %v2818_v23  ;;  %v3006_v23 = vsel %vm1549_vm3, %v2976_v36, %v2977_v55  ;;  %v3003_v55 = vsel %vm1549_vm3, %v2979_v40, %v2980_v33  ;;  %v3004_v51 = vsel %vm1549_vm3, %v2978_v31, %v2979_v40 }
 0x52c   : > { %v7895_v31 = vmax.f32 %v2900_v13, 0.0 }
 0x52d   : > { %v7805_v44 = vpop.f32.mrb[20].mxu0 }
 0x52e   : > { %v2828_v4 = vpop.f32.mrb[21].mxu0  ;;  %v2902_v28 = vadd.f32 %v7805_v44, %v7807_v41 }
 0x52f   : > { %v2901_v25 = vadd.f32 %v7807_v41, %v2828_v4 }
 0x531   : > { %v7811_v30 = vpop.f32.mrb[22].mxu0 }
 0x532   : > { %v2838_v59 = vpop.f32.mrb[23].mxu0 }
 0x535   : > { %v6050_v19 = vpop.f32.mrb[24].mxu0 }
 0x536   : > { %v2906_v24 = vadd.f32 %v6050_v19, %v7807_v41  ;;  %v2848_v27 = vpop.f32.mrb[25].mxu0 }
 0x538   : > { %v7827_v46 = vmax.f32 %v2906_v24, 0.0  ;;  %v7853_v24 = vmax.f32 %v2896_v21, 0.0  ;;  %v7869_v21 = vmax.f32 %v2899_v48, 0.0  ;;  %v7887_v48 = vmax.f32 %v2901_v25, 0.0 }
 0x53a   : > { %v8701_v29 = vrot.slane %v7827_v46, 7  ;;  %v2981_v4 = vrot.slane %v7853_v24, 7  ;;  %v2984_v53 = vrot.slane %v7869_v21, 7  ;;  %v2986_v44 = vrot.slane %v7887_v48, 7 }
 0x53c   : > { %v3007_v42 = vsel %vm1549_vm3, %v8701_v29, %v2976_v36  ;;  %v5329_v29 = vld [vmem:[%s8648_s8 + $0x120] sm:$0xff]  ;;  %v2982_v36 = vrot.slane %v7843_v14, 7 }
 0x53d   : > { %v3008_v19 = vsel %vm1582_vm4, %v3007_v42, 0.0  ;;  %v7876_v1 = vpack.c.bf16 %v5330_v2, %v5329_v29  ;;  %v7878_v42 = vmax.f32 %v2898_v56, 0.0  ;;  %v3002_v29 = vsel %vm1549_vm3, %v2980_v33, %v2981_v4  ;;  %v4171_v33 = vld [vmem:[%s8649_s9] sm:$0xff] }
 0x53e   : > { %6059 = vmatprep.mubr.msk.f32.mxu1 %vm594_vm0, %v3008_v19  ;;  %v2903_v19 = vadd.f32 %v7807_v41, %v2838_v59  ;;  %v3001_v56 = vsel %vm1549_vm3, %v2981_v4, %v2982_v36  ;;  %vm8723_vm4 = vcmp.lt.s32.totalorder %v7340_v6, 16 }
 0x53f   : > { %6060 = vmatmul.mubr.msk.f32.vlgmr.msra.gmra.mrb[24].mxu1 %vm594_vm0, %v3006_v23  ;;  %v2983_v59 = vrot.slane %v7878_v42, 7  ;;  %v3014_v23 = vsel %vm1588_vm7, %v3001_v56, 0.0  ;;  %vm8726_vm7 = vcmp.lt.s32.totalorder %v7406_v3, 16 }
 0x540   : > { %6062 = vmatprep.mubr.msk.f32.mxu1 %vm594_vm0, %v3010_v49  ;;  %6464 = vmatpush3.bf16.msra.mxu1 %v6461_v0  ;;  %v3012_v0 = vsel %vm1586_vm6, %v3003_v55, 0.0  ;;  %v7905_v40 = vmax.f32 %v2903_v19, 0.0  ;;  %v7918_v49 = vmax.f32 %v2902_v28, 0.0  ;;  %v2985_v55 = vrot.slane %v7895_v31, 7 }
 0x541   : > { %6466 = vmatprep.subr.bf16.mxu1 %v6465_v18  ;;  %v2999_v2 = vsel %vm1549_vm3, %v2983_v59, %v2984_v53  ;;  %v3000_v25 = vsel %vm1549_vm3, %v2982_v36, %v2983_v59  ;;  %vm8725_vm6 = vcmp.lt.s32.totalorder %v7378_v58, 16 }
 0x542   : > { %v3016_v13 = vsel %vm1590_vm8, %v2999_v2, 0.0  ;;  %v2998_v36 = vsel %vm1549_vm3, %v2984_v53, %v2985_v55  ;;  %v2987_v63 = vrot.slane %v7918_v49, 7  ;;  %v4173_v53 = vld [vmem:[%s8649_s9 + $0x10] sm:$0xff]  ;;  %vm8727_vm8 = vcmp.lt.s32.totalorder %v7429_v62, 16 }
 0x543   : > { %6063 = vmatmul.mubr.msk.f32.gmra.mrb[26].mxu1 %vm594_vm0, %v3004_v51  ;;  %v7928_v51 = vpack.c.bf16 %v4172_v45, %v4171_v33  ;;  %v8720_v33 = vmov 0.0|0.0   ;;  %v3229_v45 = vrot.slane %v7814_v17, 1  ;;  %v3475_v62 = vrot.slane %v7814_v17, 2 }
 0x544   : > { %6065 = vmatprep.mubr.msk.f32.mxu1 %vm594_vm0, %v3012_v0  ;;  %6468 = vmatpush3.bf16.msra.mxu1 %v6465_v18  ;;  %v2905_v18 = vadd.f32 %v7807_v41, %v2848_v27  ;;  %v2904_v27 = vadd.f32 %v7811_v30, %v7807_v41  ;;  %v2997_v0 = vsel %vm1549_vm3, %v2985_v55, %v2986_v44  ;;  %v2988_v41 = vrot.slane %v7905_v40, 7 }
 0x545   : > { %6470 = vmatprep.subr.bf16.mxu1 %v7876_v1  ;;  %6494 = vmatprep.subr.bf16.mxu0 %v7928_v51  ;;  %v3018_v19 = vsel %vm1592_vm9, %v2997_v0, 0.0  ;;  %v2996_v16 = vsel %vm1549_vm3, %v2986_v44, %v2987_v63  ;;  %v8721_v55 = vrot.slane %v7827_v46, 7  ;;  %v5331_v0 = vld [vmem:[%s8648_s8 + $0x130] sm:$0xff]  ;;  %vm8728_vm9 = vcmp.lt.s32.totalorder %v7442_v8, 16 }
 0x546   : > { %v7930_v4 = vmax.f32 %v2905_v18, 0.0  ;;  %v7937_v30 = vmax.f32 %v2904_v27, 0.0  ;;  %6496 = vmatpush3.bf16.msra.mxu0 %v7928_v51  ;;  %v2995_v56 = vsel %vm1549_vm3, %v2987_v63, %v2988_v41  ;;  %v3227_v27 = vrot.slane %v7819_v15, 1 }
 0x547   : > { %6066 = vmatmul.mubr.msk.f32.gmra.mrb[28].mxu1 %vm594_vm0, %v3002_v29  ;;  %v4174_v29 = vld [vmem:[%s8649_s9 + $0x18] sm:$0xff]  ;;  %v3020_v18 = vsel %vm1594_vm10, %v2995_v56, 0.0  ;;  %v3230_v63 = vrot.slane %v7830_v11, 1  ;;  %v6473_v56 = vpack.c.bf16 %v5332_v52, %v5331_v0  ;;  %v3236_v0 = vrot.slane %v7895_v31, 1 }
 0x548   : > { %6068 = vmatprep.mubr.msk.f32.mxu1 %vm594_vm0, %v3014_v23  ;;  %v2990_v28 = vrot.slane %v7930_v4, 7  ;;  %v7956_v59 = vpack.c.bf16 %v4174_v29, %v4173_v53  ;;  %v2989_v23 = vrot.slane %v7937_v30, 7  ;;  %v5281_v53 = vld [vmem:[%s8648_s8 + $0xa0] sm:$0xff]  ;;  %v5282_v29 = vld [vmem:[%s8648_s8 + $0xa8] sm:$0xff]  ;;  %v3237_v52 = vrot.slane %v7887_v48, 1 }
 0x549   : > { %vm8729_vm10 = vcmp.lt.s32.totalorder %v7462_v39, 16  ;;  %v3476_v39 = vrot.slane %v7830_v11, 2 }
 0x54a   : > { %6498 = vmatprep.subr.bf16.mxu0 %v7956_v59  ;;  %v2993_v2 = vsel %vm1549_vm3, %v2989_v23, %v2990_v28  ;;  %v2994_v44 = vsel %vm1549_vm3, %v2988_v41, %v2989_v23 }
 0x54b   : > { %6069 = vmatmul.mubr.msk.f32.gmra.mrb[30].mxu1 %vm594_vm0, %v3000_v25  ;;  %6500 = vmatpush3.bf16.msra.mxu0 %v7956_v59  ;;  %v3022_v34 = vsel %vm1596_vm11, %v2993_v2, 0.0  ;;  %v3228_v25 = vrot.slane %v7817_v32, 1  ;;  %v8016_v2 = vpack.c.bf16 %v5282_v29, %v5281_v53  ;;  %v3240_v53 = vrot.slane %v7937_v30, 1 }
 0x54c   : > { %6071 = vmatprep.mubr.msk.f32.mxu1 %vm594_vm0, %v3016_v13  ;;  %6507 = vmatprep.subr.bf16.mxu0 %v8720_v33  ;;  %v2992_v13 = vsel %vm1549_vm3, %v2990_v28, %v8721_v55  ;;  %vm8722_vm3 = vcmp.lt.s32.totalorder %v7309_v20, 16  ;;  %v3233_v20 = vrot.slane %v7843_v14, 1  ;;  %v3235_v55 = vrot.slane %v7869_v21, 1 }
 0x54d   : > { %v3257_v41 = vsel %vm1865_vm12, %v3227_v27, %v3228_v25  ;;  %v3241_v29 = vrot.slane %v7930_v4, 1  ;;  %vm8730_vm11 = vcmp.lt.s32.totalorder %v7481_v54, 16  ;;  %v3479_v54 = vrot.slane %v7843_v14, 2 }
 0x54e   : > { %v3249_v38 = vsel %vm1865_vm12, %v3235_v55, %v3236_v0 }
 0x54f   : > { %6072 = vmatmul.mubr.msk.f32.gmra.mrb[32].mxu1 %vm594_vm0, %v2998_v36  ;;  %v3256_v36 = vsel %vm1865_vm12, %v3228_v25, %v3229_v45  ;;  %v3234_v25 = vrot.slane %v7878_v42, 1 }
 0x550   : > { %6074 = vmatprep.mubr.msk.f32.mxu1 %vm594_vm0, %v3018_v19  ;;  %v3231_v19 = vrot.slane %v7824_v57, 1  ;;  %v3260_v28 = vsel %vm8722_vm3, %v3256_v36, 0.0  ;;  %v3248_v36 = vsel %vm1865_vm12, %v3236_v0, %v3237_v52  ;;  %vm8732_vm3 = vcmp.lt.s32.totalorder %v7519_v26, 16 }
 0x552   : > { %v3254_v23 = vsel %vm1865_vm12, %v3230_v63, %v3231_v19 }
 0x553   : > { %6075 = vmatmul.mubr.msk.f32.gmra.mrb[34].mxu1 %vm594_vm0, %v2996_v16  ;;  %v3255_v16 = vsel %vm1865_vm12, %v3229_v45, %v3230_v63  ;;  %v3238_v63 = vrot.slane %v7918_v49, 1 }
 0x554   : > { %6077 = vmatprep.mubr.msk.f32.mxu1 %vm594_vm0, %v3020_v18  ;;  %v3232_v18 = vrot.slane %v7853_v24, 1 }
 0x555   : > { %v3247_v58 = vsel %vm1865_vm12, %v3237_v52, %v3238_v63 }
 0x556   : > { %v3253_v45 = vsel %vm1865_vm12, %v3231_v19, %v3232_v18  ;;  %v3239_v19 = vrot.slane %v7905_v40, 1 }
 0x557   : > { %6078 = vmatmul.mubr.msk.f32.gmra.mrb[36].mxu1 %vm594_vm0, %v2994_v44  ;;  %v3262_v44 = vsel %vm8723_vm4, %v3254_v23, 0.0  ;;  %v3244_v23 = vsel %vm1865_vm12, %v3240_v53, %v3241_v29  ;;  %vm8733_vm4 = vcmp.lt.s32.totalorder %v7541_v5, 16 }
 0x558   : > { %6080 = vmatprep.mubr.msk.f32.mxu1 %vm594_vm0, %v3022_v34  ;;  %v3252_v34 = vsel %vm1865_vm12, %v3232_v18, %v3233_v20  ;;  %v3245_v3 = vsel %vm1865_vm12, %v3239_v19, %v3240_v53  ;;  %v3242_v18 = vrot.slane %v7827_v46, 1 }
 0x559   : > { %v3264_v6 = vsel %vm8724_vm5, %v3252_v34, 0.0  ;;  %vm8734_vm5 = vcmp.lt.s32.totalorder %v7558_v22, 16 }
 0x55a   : > { %v3258_v34 = vsel %vm1865_vm12, %v3242_v18, %v3227_v27 }
 0x55b   : > { %6081 = vmatmul.mubr.msk.f32.gmra.mrb[38].mxu1 %vm594_vm0, %v2992_v13  ;;  %v3250_v13 = vsel %vm1865_vm12, %v3234_v25, %v3235_v55  ;;  %v3274_v8 = vsel %vm8729_vm10, %v3258_v34, 0.0  ;;  %v5283_v55 = vld [vmem:[%s8648_s8 + $0xb0] sm:$0xff]  ;;  %vm8743_vm10 = vcmp.ge.s32.totalorder %v7683_v43, 0 }
 0x55c   : > { %6091 = vmatprep.mubr.msk.f32.mxu1 %vm594_vm0, %v3257_v41  ;;  %v3266_v41 = vsel %vm8725_vm6, %v3250_v13, 0.0  ;;  %v3477_v13 = vrot.slane %v7824_v57, 2  ;;  %vm8735_vm6 = vcmp.lt.s32.totalorder %v7574_v7, 16  ;;  %v2923_v7 = vrot.slane %v7819_v15, 6 }
 0x55f   : > { %6092 = vmatmul.mubr.msk.f32.vlgmr.msra.gmra.mrb[24].mxu1 %vm594_vm0, %v3260_v28  ;;  %v3246_v28 = vsel %vm1865_vm12, %v3238_v63, %v3239_v19  ;;  %v3500_v63 = vsel %vm2176_vm15, %v3476_v39, %v3477_v13  ;;  %v3478_v19 = vrot.slane %v7853_v24, 2 }
 0x560   : > { %6094 = vmatprep.mubr.msk.f32.mxu1 %vm594_vm0, %v3255_v16  ;;  %6472 = vmatpush3.bf16.msra.mxu1 %v7876_v1  ;;  %v3251_v1 = vsel %vm1865_vm12, %v3233_v20, %v3234_v25  ;;  %v3270_v16 = vsel %vm8727_vm8, %v3246_v28, 0.0  ;;  %v3272_v20 = vsel %vm8728_vm9, %v3244_v23, 0.0  ;;  %v3473_v25 = vrot.slane %v7819_v15, 2 }
 0x561   : > { %6474 = vmatprep.subr.bf16.mxu1 %v6473_v56  ;;  %v3499_v28 = vsel %vm2176_vm15, %v3477_v13, %v3478_v19  ;;  %v3498_v53 = vsel %vm2176_vm15, %v3478_v19, %v3479_v54  ;;  %v3482_v23 = vrot.slane %v7895_v31, 2  ;;  %v2938_v13 = vrot.slane %v7827_v46, 6 }
 0x562   : > { %v2924_v19 = vrot.slane %v7817_v32, 6  ;;  %vm8741_vm8 = vcmp.ge.s32.totalorder %v7646_v35, 0  ;;  %vm8742_vm9 = vcmp.ge.s32.totalorder %v7667_v12, 0 }
 0x563   : > { %6095 = vmatmul.mubr.msk.f32.gmra.mrb[26].mxu1 %vm594_vm0, %v3262_v44  ;;  %v3474_v44 = vrot.slane %v7817_v32, 2 }
 0x564   : > { %6097 = vmatprep.mubr.msk.f32.mxu1 %vm594_vm0, %v3253_v45  ;;  %6476 = vmatpush3.bf16.msra.mxu1 %v6473_v56  ;;  %v3268_v56 = vsel %vm8726_vm7, %v3248_v36, 0.0  ;;  %v3243_v45 = vsel %vm1865_vm12, %v3241_v29, %v3242_v18  ;;  %v3501_v36 = vsel %vm2176_vm15, %v3475_v62, %v3476_v39  ;;  %vm8731_vm12 = vcmp.lt.s32.totalorder %v7498_v60, 16 }
 0x565   : > { %6478 = vmatprep.subr.bf16.mxu1 %v8016_v2  ;;  %v3503_v27 = vsel %vm2176_vm15, %v3473_v25, %v3474_v44  ;;  %v3480_v29 = vrot.slane %v7878_v42, 2  ;;  %v3510_v60 = vsel %vm8732_vm3, %v3498_v53, 0.0  ;;  %v3483_v18 = vrot.slane %v7887_v48, 2 }
 0x566   : > { %v3488_v39 = vrot.slane %v7827_v46, 2  ;;  %vm8736_vm7 = vcmp.lt.s32.totalorder %v7589_v9, 16  ;;  %v2954_v9 = vsel %vm1432_vm1, %v2938_v13, %v2923_v7 }
 0x567   : > { %6098 = vmatmul.mubr.msk.f32.gmra.mrb[28].mxu1 %vm594_vm0, %v3264_v6  ;;  %v5284_v6 = vld [vmem:[%s8648_s8 + $0xb8] sm:$0xff] }
 0x568   : > { %6100 = vmatprep.mubr.msk.f32.mxu1 %vm594_vm0, %v3251_v1  ;;  %v3502_v1 = vsel %vm2176_vm15, %v3474_v44, %v3475_v62  ;;  %v6481_v0 = vpack.c.bf16 %v5284_v6, %v5283_v55  ;;  %v3494_v44 = vsel %vm2176_vm15, %v3482_v23, %v3483_v18  ;;  %v3484_v62 = vrot.slane %v7918_v49, 2 }
 0x569   : > { %v3506_v52 = vsel %vm8730_vm11, %v3502_v1, 0.0  ;;  %v3514_v34 = vsel %vm8734_vm5, %v3494_v44, 0.0  ;;  %v3486_v55 = vrot.slane %v7937_v30, 2  ;;  %v3487_v6 = vrot.slane %v7930_v4, 2 }
 0x56a   : > { %v3493_v5 = vsel %vm2176_vm15, %v3483_v18, %v3484_v62  ;;  %v2929_v18 = vrot.slane %v7843_v14, 6  ;;  %v2931_v44 = vrot.slane %v7869_v21, 6  ;;  %vm8744_vm11 = vcmp.ge.s32.totalorder %v7698_v10, 0 }
 0x56b   : > { %6101 = vmatmul.mubr.msk.f32.gmra.mrb[30].mxu1 %vm594_vm0, %v3266_v41  ;;  %v5305_v41 = vld [vmem:[%s8648_s8 + $0xe0] sm:$0xff]  ;;  %v3490_v1 = vsel %vm2176_vm15, %v3486_v55, %v3487_v6 }
 0x56c   : > { %6103 = vmatprep.mubr.msk.f32.mxu1 %vm594_vm0, %v3249_v38  ;;  %v5306_v38 = vld [vmem:[%s8648_s8 + $0xe8] sm:$0xff] }
 0x56f   : > { %6104 = vmatmul.mubr.msk.f32.gmra.mrb[32].mxu1 %vm594_vm0, %v3268_v56  ;;  %v6485_v56 = vpack.c.bf16 %v5306_v38, %v5305_v41  ;;  %v3504_v41 = vsel %vm2176_vm15, %v3488_v39, %v3473_v25  ;;  %v2925_v38 = vrot.slane %v7814_v17, 6  ;;  %v5308_v25 = vld [vmem:[%s8648_s8 + $0xf8] sm:$0xff] }
 0x570   : > { %6106 = vmatprep.mubr.msk.f32.mxu1 %vm594_vm0, %v3247_v58  ;;  %v3508_v58 = vsel %vm8731_vm12, %v3500_v63, 0.0  ;;  %v3520_v63 = vsel %vm2240_vm14, %v3504_v41, 0.0  ;;  %vm8740_vm14 = vcmp.ge.s32.totalorder %v7631_v61, 0 }
 0x571   : > { %v2952_v53 = vsel %vm1432_vm1, %v2924_v19, %v2925_v38 }
 0x573   : > { %6107 = vmatmul.mubr.msk.f32.gmra.mrb[34].mxu1 %vm594_vm0, %v3270_v16  ;;  %v3481_v16 = vrot.slane %v7869_v21, 2 }
 0x574   : > { %6109 = vmatprep.mubr.msk.f32.mxu1 %vm594_vm0, %v3245_v3 }
 0x575   : > { %v3496_v3 = vsel %vm2176_vm15, %v3480_v29, %v3481_v16  ;;  %v3495_v26 = vsel %vm2176_vm15, %v3481_v16, %v3482_v23 }
 0x577   : > { %6110 = vmatmul.mubr.msk.f32.gmra.mrb[36].mxu1 %vm594_vm0, %v3272_v20  ;;  %v3512_v20 = vsel %vm8733_vm4, %v3496_v3, 0.0  ;;  %v2957_v3 = vsel %vm8740_vm14, %v2952_v53, 0.0 }
 0x578   : > { %6112 = vmatprep.mubr.msk.f32.mxu1 %vm594_vm0, %v3243_v45  ;;  %v3485_v45 = vrot.slane %v7905_v40, 2 }
 0x57a   : > { %v3491_v22 = vsel %vm2176_vm15, %v3485_v45, %v3486_v55  ;;  %v2932_v55 = vrot.slane %v7895_v31, 6 }
 0x57b   : > { %6113 = vmatmul.mubr.msk.f32.gmra.mrb[38].mxu1 %vm594_vm0, %v3274_v8  ;;  %v3492_v8 = vsel %vm2176_vm15, %v3484_v62, %v3485_v45  ;;  %v2930_v45 = vrot.slane %v7878_v42, 6 }
 0x57c   : > { %6123 = vmatprep.mubr.msk.f32.mxu1 %vm594_vm0, %v3503_v27  ;;  %v3516_v27 = vsel %vm8735_vm6, %v3492_v8, 0.0 }
 0x57d   : > { %v2947_v8 = vsel %vm1432_vm1, %v2929_v18, %v2930_v45 }
 0x57f   : > { %6124 = vmatmul.mubr.msk.f32.vlgmr.msra.gmra.mrb[24].mxu1 %vm594_vm0, %v3506_v52  ;;  %v3489_v52 = vsel %vm2176_vm15, %v3487_v6, %v3488_v39 }
 0x580   : > { %6126 = vmatprep.mubr.msk.f32.mxu1 %vm594_vm0, %v3501_v36  ;;  %6480 = vmatpush3.bf16.msra.mxu1 %v8016_v2  ;;  %v3497_v2 = vsel %vm2176_vm15, %v3479_v54, %v3480_v29  ;;  %v5307_v54 = vld [vmem:[%s8648_s8 + $0xf0] sm:$0xff]  ;;  %v2927_v29 = vrot.slane %v7824_v57, 6 }
 0x581   : > { %6482 = vmatprep.subr.bf16.mxu1 %v6481_v0  ;;  %v6489_v16 = vpack.c.bf16 %v5308_v25, %v5307_v54 }
 0x583   : > { %6127 = vmatmul.mubr.msk.f32.gmra.mrb[26].mxu1 %vm594_vm0, %v3508_v58  ;;  %v8738_v58 = vld [vmem:[#allocation6_spill] sm:$0xff] }
 0x584   : > { %6129 = vmatprep.mubr.msk.f32.mxu1 %vm594_vm0, %v3499_v28  ;;  %6484 = vmatpush3.bf16.msra.mxu1 %v6481_v0  ;;  %v3518_v0 = vsel %vm8736_vm7, %v3490_v1, 0.0  ;;  %vm8739_vm15 = vcmp.ge.s32.totalorder %v8738_v58, 0  ;;  %v2934_v1 = vrot.slane %v7918_v49, 6 }
 0x585   : > { %6486 = vmatprep.subr.bf16.mxu1 %v6485_v56  ;;  %v2955_v28 = vsel %vm8739_vm15, %v2954_v9, 0.0 }
 0x587   : > { %6130 = vmatmul.mubr.msk.f32.gmra.mrb[28].mxu1 %vm594_vm0, %v3510_v60  ;;  %v2953_v60 = vsel %vm1432_vm1, %v2923_v7, %v2924_v19 }
 0x588   : > { %6132 = vmatprep.mubr.msk.f32.mxu1 %vm594_vm0, %v3497_v2  ;;  %v2926_v2 = vrot.slane %v7830_v11, 6 }
 0x58a   : > { %v2950_v23 = vsel %vm1432_vm1, %v2926_v2, %v2927_v29 }
 0x58b   : > { %6133 = vmatmul.mubr.msk.f32.gmra.mrb[30].mxu1 %vm594_vm0, %v3512_v20  ;;  %v2951_v20 = vsel %vm1432_vm1, %v2925_v38, %v2926_v2  ;;  %v2959_v61 = vsel %vm8741_vm8, %v2950_v23, 0.0 }
 0x58c   : > { %6135 = vmatprep.mubr.msk.f32.mxu1 %vm594_vm0, %v3495_v26  ;;  %v2928_v26 = vrot.slane %v7853_v24, 6 }
 0x58e   : > { %v2949_v62 = vsel %vm1432_vm1, %v2927_v29, %v2928_v26 }
 0x58f   : > { %6136 = vmatmul.mubr.msk.f32.gmra.mrb[32].mxu1 %vm594_vm0, %v3514_v34  ;;  %v2946_v34 = vsel %vm1432_vm1, %v2930_v45, %v2931_v44 }
 0x590   : > { %6138 = vmatprep.mubr.msk.f32.mxu1 %vm594_vm0, %v3493_v5  ;;  %v2933_v5 = vrot.slane %v7887_v48, 6  ;;  %v2963_v6 = vsel %vm8743_vm10, %v2946_v34, 0.0 }
 0x592   : > { %v2944_v12 = vsel %vm1432_vm1, %v2932_v55, %v2933_v5  ;;  %v2943_v7 = vsel %vm1432_vm1, %v2933_v5, %v2934_v1 }
 0x593   : > { %6139 = vmatmul.mubr.msk.f32.gmra.mrb[34].mxu1 %vm594_vm0, %v3516_v27  ;;  %v2935_v27 = vrot.slane %v7905_v40, 6  ;;  %v2965_v39 = vsel %vm8744_vm11, %v2944_v12, 0.0 }
 0x594   : > { %6141 = vmatprep.mubr.msk.f32.mxu1 %vm594_vm0, %v3491_v22  ;;  %v2945_v22 = vsel %vm1432_vm1, %v2931_v44, %v2932_v55 }
 0x595   : > { %v2942_v43 = vsel %vm1432_vm1, %v2934_v1, %v2935_v27 }
 0x596   : > { %v2967_v41 = vsel %vm1477_vm13, %v2942_v43, 0.0  ;;  %vm8748_vm13 = vcmask 523264  }
 0x597   : > { %6142 = vmatmul.mubr.msk.f32.gmra.mrb[36].mxu1 %vm594_vm0, %v3518_v0  ;;  %v2937_v0 = vrot.slane %v7930_v4, 6 }
 0x598   : > { %6144 = vmatprep.mubr.msk.f32.mxu1 %vm594_vm0, %v3489_v52  ;;  %v2936_v52 = vrot.slane %v7937_v30, 6 }
 0x599   : > { %v2939_v50 = vsel %vm1432_vm1, %v2937_v0, %v2938_v13 }
 0x59a   : > { %v2940_v10 = vsel %vm1432_vm1, %v2936_v52, %v2937_v0  ;;  %v2941_v9 = vsel %vm1432_vm1, %v2935_v27, %v2936_v52  ;;  %v8328_v27 = vld [vmem:[%s8650_s10] ss:$0 sm:$0xff]  ;;  %v4466_v52 = vld [vmem:[%s8645_s5 + $0x8] sm:$0xff] }
 0x59b   : > { %6145 = vmatmul.mubr.msk.f32.gmra.mrb[38].mxu1 %vm594_vm0, %v3520_v63  ;;  %v2969_v38 = vsel %vm1479_vm2, %v2940_v10, 0.0  ;;  %vm4481_vm2 = vcmask 64512   ;;  %v4468_v10 = vld [vmem:[%s8645_s5 + $0x18] sm:$0xff] }
 0x59c   : > { %6155 = vmatprep.mubr.msk.f32.mxu1 %vm594_vm0, %v2955_v28 }
 0x59f   : > { %6156 = vmatmul.mubr.msk.f32.vlgmr.msra.gmra.mrb[24].mxu1 %vm594_vm0, %v2953_v60 }
 0x5a0   : > { %6158 = vmatprep.mubr.msk.f32.mxu1 %vm594_vm0, %v2957_v3  ;;  %6488 = vmatpush3.bf16.msra.mxu1 %v6485_v56  ;;  %v2948_v56 = vsel %vm1432_vm1, %v2928_v26, %v2929_v18  ;;  %vm8746_vm1 = vmmov 0  }
 0x5a1   : > { %6490 = vmatprep.subr.bf16.mxu1 %v6489_v16  ;;  %v2961_v35 = vsel %vm8742_vm9, %v2948_v56, 0.0 }
 0x5a3   : > { %6159 = vmatmul.mubr.msk.f32.gmra.mrb[26].mxu1 %vm594_vm0, %v2951_v20 }
 0x5a4   : > { %6161 = vmatprep.mubr.msk.f32.mxu1 %vm594_vm0, %v2959_v61  ;;  %6492 = vmatpush3.bf16.msra.mxu1 %v6489_v16 }
 0x5a5   : > { %6501 = vmatprep.subr.bf16.mxu1 %v8720_v33 }
 0x5a7   : > { %6162 = vmatmul.mubr.msk.f32.gmra.mrb[28].mxu1 %vm594_vm0, %v2949_v62 }
 0x5a8   : > { %6164 = vmatprep.mubr.msk.f32.mxu1 %vm594_vm0, %v2961_v35 }
 0x5ab   : > { %6165 = vmatmul.mubr.msk.f32.gmra.mrb[30].mxu1 %vm594_vm0, %v2947_v8 }
 0x5ac   : > { %6167 = vmatprep.mubr.msk.f32.mxu1 %vm594_vm0, %v2963_v6 }
 0x5af   : > { %6168 = vmatmul.mubr.msk.f32.gmra.mrb[32].mxu1 %vm594_vm0, %v2945_v22 }
 0x5b0   : > { %6170 = vmatprep.mubr.msk.f32.mxu1 %vm594_vm0, %v2965_v39 }
 0x5b3   : > { %6171 = vmatmul.mubr.msk.f32.gmra.mrb[34].mxu1 %vm594_vm0, %v2943_v7 }
 0x5b4   : > { %6173 = vmatprep.mubr.msk.f32.mxu1 %vm594_vm0, %v2967_v41  ;;  %v4467_v41 = vld [vmem:[%s8645_s5 + $0x10] sm:$0xff] }
 0x5b7   : > { %6174 = vmatmul.mubr.msk.f32.gmra.mrb[36].mxu1 %vm594_vm0, %v2941_v9  ;;  %v4469_v9 = vld [vmem:[%s8645_s5 + $0x20] sm:$0xff] }
 0x5b8   : > { %6176 = vmatprep.mubr.msk.f32.mxu1 %vm594_vm0, %v2969_v38  ;;  %v4470_v38 = vld [vmem:[%s8645_s5 + $0x28] sm:$0xff] }
 0x5bb   : > { %6177 = vmatmul.mubr.msk.f32.gmra.mrb[38].mxu1 %vm594_vm0, %v2939_v50  ;;  %v4471_v50 = vld [vmem:[%s8645_s5 + $0x30] sm:$0xff] }
 0x5bc   : > { %6187 = vmatprep.mubr.msk.f32.mxu1 %vm594_vm0, %v7819_v15 }
 0x5bf   : > { %6188 = vmatmul.mubr.msk.f32.vlgmr.msra.gmra.mrb[24].mxu1 %vm594_vm0, %v7817_v32  ;;  %v4138_v32 = vstv %s5381_s25  ;;  %s550_s25 = scalar_lea.vmem %s8655_s15, %s5144_s22 }
 0x5c0   : > { %6190 = vmatprep.mubr.msk.f32.mxu1 %vm594_vm0, %v7814_v17  ;;  %6503 = vmatpush3.bf16.msra.mxu1 %v7928_v51  ;;  %v4465_v17 = vld [vmem:[%s8645_s5] sm:$0xff] }
 0x5c1   : > { %6504 = vmatprep.subr.bf16.mxu1 %v8720_v33 }
 0x5c3   : > { %6191 = vmatmul.mubr.msk.f32.gmra.mrb[26].mxu1 %vm594_vm0, %v7830_v11 }
 0x5c4   : > { %6193 = vmatprep.mubr.msk.f32.mxu1 %vm594_vm0, %v7824_v57  ;;  %6506 = vmatpush3.bf16.msra.mxu1 %v7956_v59 }
 0x5c7   : > { %6194 = vmatmul.mubr.msk.f32.gmra.mrb[28].mxu1 %vm594_vm0, %v7853_v24 }
 0x5c8   : > { %6196 = vmatprep.mubr.msk.f32.mxu1 %vm594_vm0, %v7843_v14 }
 0x5cb   : > { %6197 = vmatmul.mubr.msk.f32.gmra.mrb[30].mxu1 %vm594_vm0, %v7878_v42 }
 0x5cc   : > { %6199 = vmatprep.mubr.msk.f32.mxu1 %vm594_vm0, %v7869_v21 }
 0x5cf   : > { %6200 = vmatmul.mubr.msk.f32.gmra.mrb[32].mxu1 %vm594_vm0, %v7895_v31 }
 0x5d0   : > { %6202 = vmatprep.mubr.msk.f32.mxu1 %vm594_vm0, %v7887_v48 }
 0x5d3   : > { %6203 = vmatmul.mubr.msk.f32.gmra.mrb[34].mxu1 %vm594_vm0, %v7918_v49 }
 0x5d4   : > { %6205 = vmatprep.mubr.msk.f32.mxu1 %vm594_vm0, %v7905_v40 }
 0x5d7   : > { %6206 = vmatmul.mubr.msk.f32.gmra.mrb[36].mxu1 %vm594_vm0, %v7937_v30 }
 0x5d8   : > { %6208 = vmatprep.mubr.msk.f32.mxu1 %vm594_vm0, %v7930_v4 }
 0x5db   : > { %6209 = vmatmul.mubr.msk.f32.gmra.mrb[38].mxu1 %vm594_vm0, %v7827_v46 }
 0x5dc   : > { %6251 = vmatprep.mubr.msk.f32.mxu1 %vm8746_vm1, %v8745_v47 }
 0x5df   : > { %6252 = vmatmul.mubr.msk.f32.vlgmr.msra.gmra.mrb[40].mxu1 %vm594_vm0, %v8747_v37 }
 0x5e0   : > { %6256 = vmatprep.mubr.msk.f32.mxu1 %vm4481_vm2, %v4465_v17  ;;  %v4472_v17 = vld [vmem:[%s8645_s5 + $0x38] sm:$0xff] }
 0x692   : > { %v6189_v15 = vpop.f32.mrb[24].mxu1 }
 0x693   : > { %v4140_v57 = vadd.f32 %v6189_v15, %v4138_v32  ;;  %v4026_v11 = vpop.f32.mrb[25].mxu1  ;;  %v4474_v15 = vld [vmem:[%s8645_s5 + $0x48] sm:$0xff] }
 0x694   : > { %v4139_v14 = vadd.f32 %v4138_v32, %v4026_v11  ;;  %v4476_v11 = vld [vmem:[%s8645_s5 + $0x58] sm:$0xff] }
 0x695   : > { %v4156_v21 = vmax.f32 %v4140_v57, 0.0  ;;  %v4475_v57 = vld [vmem:[%s8645_s5 + $0x50] sm:$0xff] }
 0x696   : > { %v4155_v46 = vmax.f32 %v4139_v14, 0.0  ;;  %v6192_v24 = vpop.f32.mrb[26].mxu1  ;;  %v4477_v14 = vld [vmem:[%s8645_s5 + $0x60] sm:$0xff] }
 0x697   : > { %v4142_v42 = vadd.f32 %v6192_v24, %v4138_v32  ;;  %v4036_v48 = vpop.f32.mrb[27].mxu1  ;;  %v4479_v24 = vld [vmem:[%s8645_s5 + $0x70] sm:$0xff] }
 0x698   : > { %v4141_v31 = vadd.f32 %v4138_v32, %v4036_v48  ;;  %6219 = vmatprep.mubr.msk.f32.mxu0 %vm594_vm0, %v4155_v46  ;;  %v4478_v46 = vld [vmem:[%s8645_s5 + $0x68] sm:$0xff] }
 0x699   : > { %6220 = vmatmul.mubr.msk.f32.vlgmr.msra.gmra.mrb[26].mxu0 %vm594_vm0, %v4156_v21  ;;  %v4158_v51 = vmax.f32 %v4142_v42, 0.0  ;;  %v4480_v21 = vld [vmem:[%s8645_s5 + $0x78] sm:$0xff] }
 0x69a   : > { %v4157_v40 = vmax.f32 %v4141_v31, 0.0  ;;  %v6195_v49 = vpop.f32.mrb[28].mxu1 }
 0x69b   : > { %v4144_v4 = vadd.f32 %v6195_v49, %v4138_v32  ;;  %v4046_v30 = vpop.f32.mrb[29].mxu1 }
 0x69c   : > { %v4143_v59 = vadd.f32 %v4138_v32, %v4046_v30  ;;  %6222 = vmatprep.mubr.msk.f32.mxu0 %vm594_vm0, %v4157_v40 }
 0x69d   : > { %6223 = vmatmul.mubr.msk.f32.gmra.mrb[28].mxu0 %vm594_vm0, %v4158_v51  ;;  %v4160_v63 = vmax.f32 %v4144_v4, 0.0 }
 0x69e   : > { %v4159_v13 = vmax.f32 %v4143_v59, 0.0  ;;  %v6198_v36 = vpop.f32.mrb[30].mxu1 }
 0x69f   : > { %v4146_v19 = vadd.f32 %v6198_v36, %v4138_v32  ;;  %v4056_v54 = vpop.f32.mrb[31].mxu1 }
 0x6a0   : > { %v4145_v25 = vadd.f32 %v4138_v32, %v4056_v54  ;;  %6225 = vmatprep.mubr.msk.f32.mxu0 %vm594_vm0, %v4159_v13 }
 0x6a1   : > { %6226 = vmatmul.mubr.msk.f32.gmra.mrb[30].mxu0 %vm594_vm0, %v4160_v63  ;;  %v4162_v53 = vmax.f32 %v4146_v19, 0.0 }
 0x6a2   : > { %v4161_v58 = vmax.f32 %v4145_v25, 0.0  ;;  %v6201_v28 = vpop.f32.mrb[32].mxu1 }
 0x6a3   : > { %v4148_v29 = vadd.f32 %v6201_v28, %v4138_v32  ;;  %v4066_v16 = vpop.f32.mrb[33].mxu1 }
 0x6a4   : > { %v4147_v60 = vadd.f32 %v4138_v32, %v4066_v16  ;;  %6228 = vmatprep.mubr.msk.f32.mxu0 %vm594_vm0, %v4161_v58 }
 0x6a5   : > { %6229 = vmatmul.mubr.msk.f32.gmra.mrb[32].mxu0 %vm594_vm0, %v4162_v53  ;;  %v4164_v23 = vmax.f32 %v4148_v29, 0.0 }
 0x6a6   : > { %v4163_v2 = vmax.f32 %v4147_v60, 0.0  ;;  %v6204_v3 = vpop.f32.mrb[34].mxu1 }
 0x6a7   : > { %v4150_v18 = vadd.f32 %v6204_v3, %v4138_v32  ;;  %v4076_v20 = vpop.f32.mrb[35].mxu1 }
 0x6a8   : > { %v4149_v26 = vadd.f32 %v4138_v32, %v4076_v20  ;;  %6231 = vmatprep.mubr.msk.f32.mxu0 %vm594_vm0, %v4163_v2 }
 0x6a9   : > { %6232 = vmatmul.mubr.msk.f32.gmra.mrb[34].mxu0 %vm594_vm0, %v4164_v23  ;;  %v4166_v44 = vmax.f32 %v4150_v18, 0.0 }
 0x6aa   : > { %v4165_v61 = vmax.f32 %v4149_v26, 0.0  ;;  %v6207_v56 = vpop.f32.mrb[36].mxu1 }
 0x6ab   : > { %v4152_v62 = vadd.f32 %v6207_v56, %v4138_v32  ;;  %v4086_v45 = vpop.f32.mrb[37].mxu1 }
 0x6ac   : > { %v4151_v35 = vadd.f32 %v4138_v32, %v4086_v45  ;;  %6234 = vmatprep.mubr.msk.f32.mxu0 %vm594_vm0, %v4165_v61 }
 0x6ad   : > { %6235 = vmatmul.mubr.msk.f32.gmra.mrb[36].mxu0 %vm594_vm0, %v4166_v44  ;;  %v4168_v8 = vmax.f32 %v4152_v62, 0.0 }
 0x6ae   : > { %v4167_v34 = vmax.f32 %v4151_v35, 0.0  ;;  %v6210_v5 = vpop.f32.mrb[38].mxu1 }
 0x6af   : > { %v4154_v55 = vadd.f32 %v6210_v5, %v4138_v32  ;;  %v4096_v6 = vpop.f32.mrb[39].mxu1 }
 0x6b0   : > { %v4153_v12 = vadd.f32 %v4138_v32, %v4096_v6  ;;  %6237 = vmatprep.mubr.msk.f32.mxu0 %vm594_vm0, %v4167_v34  ;;  %v4473_v32 = vld [vmem:[%s8645_s5 + $0x40] sm:$0xff] }
 0x6b1   : > { %6238 = vmatmul.mubr.msk.f32.gmra.mrb[38].mxu0 %vm594_vm0, %v4168_v8  ;;  %v4170_v39 = vmax.f32 %v4154_v55, 0.0 }
 0x6b2   : > { %v4169_v22 = vmax.f32 %v4153_v12, 0.0  ;;  %v4460_v1 = vpop.f32.mrb[40].mxu1 }
 0x6b3   : > { %v4461_v43 = vadd.f32 %v8328_v27, %v4460_v1  ;;  %v6253_v0 = vpop.f32.mrb[41].mxu1 }
 0x6b4   : > { %6240 = vmatprep.mubr.msk.f32.mxu0 %vm594_vm0, %v4169_v22 }
 0x6b5   : > { %v4464_v7 = vmax.f32 %v4461_v43, 0.0  ;;  %6241 = vmatmul.mubr.msk.f32.gmra.mrb[40].mxu0 %vm594_vm0, %v4170_v39 }
 0x6b6   : > { %6312 = vmatprep.mubr.msk.f32.mxu0 %vm8746_vm1, %v8745_v47 }
 0x6b7   : > { %6254 = vmatprep.subr.mxu1 %v4464_v7 }
 0x6b8   : > { %6255 = vmatpush3.msra.mxu1 %v4464_v7 }
 0x6b9   : > { %6257 = vmatmul.mubr.msk.f32.vlgmr.msra.gmra.mrb[42].mxu1 %vm4481_vm2, %v4466_v52  ;;  %6531 = vmatprep.subr.bf16.mxu1 %v8720_v33 }
 0x6ba   : > { %6259 = vmatprep.mubr.msk.f32.mxu1 %vm4481_vm2, %v4467_v41 }
 0x6bd   : > { %6260 = vmatmul.mubr.msk.f32.gmra.mrb[44].mxu1 %vm4481_vm2, %v4468_v10 }
 0x6be   : > { %6262 = vmatprep.mubr.msk.f32.mxu1 %vm4481_vm2, %v4469_v9 }
 0x6c1   : > { %6263 = vmatmul.mubr.msk.f32.gmra.mrb[46].mxu1 %vm4481_vm2, %v4470_v38 }
 0x6c2   : > { %6265 = vmatprep.mubr.msk.f32.mxu1 %vm4481_vm2, %v4471_v50 }
 0x6c5   : > { %6266 = vmatmul.mubr.msk.f32.gmra.mrb[48].mxu1 %vm4481_vm2, %v4472_v17 }
 0x6c6   : > { %6268 = vmatprep.mubr.msk.f32.mxu1 %vm4481_vm2, %v4473_v32 }
 0x6c9   : > { %6269 = vmatmul.mubr.msk.f32.gmra.mrb[50].mxu1 %vm4481_vm2, %v4474_v15 }
 0x6ca   : > { %6271 = vmatprep.mubr.msk.f32.mxu1 %vm4481_vm2, %v4475_v57 }
 0x6cd   : > { %6272 = vmatmul.mubr.msk.f32.gmra.mrb[52].mxu1 %vm4481_vm2, %v4476_v11 }
 0x6ce   : > { %6274 = vmatprep.mubr.msk.f32.mxu1 %vm4481_vm2, %v4477_v14 }
 0x6d1   : > { %6275 = vmatmul.mubr.msk.f32.gmra.mrb[54].mxu1 %vm4481_vm2, %v4478_v46 }
 0x6d2   : > { %6277 = vmatprep.mubr.msk.f32.mxu1 %vm4481_vm2, %v4479_v24 }
 0x6d5   : > { %6278 = vmatmul.mubr.msk.f32.gmra.mrb[56].mxu1 %vm4481_vm2, %v4480_v21 }
 0x6d6   : > { %6331 = vmatprep.mubr.msk.f32.mxu1 %vm8746_vm1, %v8745_v47 }
 0x76c   : > { %v6221_v42 = vpop.f32.mrb[26].mxu0 }
 0x76d   : > { %v4296_v48 = vpop.f32.mrb[27].mxu0  ;;  %v8409_v53 = vadd.f32 %v6221_v42, %v8328_v27 }
 0x76e   : > { %v8402_v25 = vadd.f32 %v8328_v27, %v4296_v48 }
 0x76f   : > { %v4376_v23 = vmax.f32 %v8409_v53, 0.0 }
 0x770   : > { %v6224_v31 = vpop.f32.mrb[28].mxu0  ;;  %v4375_v16 = vmax.f32 %v8402_v25, 0.0 }
 0x771   : > { %v4306_v40 = vpop.f32.mrb[29].mxu0  ;;  %v8412_v29 = vadd.f32 %v6224_v31, %v8328_v27 }
 0x772   : > { %v8416_v2 = vadd.f32 %v8328_v27, %v4306_v40 }
 0x773   : > { %v4378_v20 = vmax.f32 %v8412_v29, 0.0 }
 0x774   : > { %v6227_v49 = vpop.f32.mrb[30].mxu0  ;;  %v4377_v62 = vmax.f32 %v8416_v2, 0.0 }
 0x775   : > { %v4316_v51 = vpop.f32.mrb[31].mxu0  ;;  %v8430_v45 = vadd.f32 %v6227_v49, %v8328_v27 }
 0x776   : > { %v8423_v26 = vadd.f32 %v8328_v27, %v4316_v51 }
 0x777   : > { %v4380_v1 = vmax.f32 %v8430_v45, 0.0 }
 0x778   : > { %v6230_v4 = vpop.f32.mrb[32].mxu0  ;;  %v4379_v55 = vmax.f32 %v8423_v26, 0.0 }
 0x779   : > { %v4326_v30 = vpop.f32.mrb[33].mxu0  ;;  %v8444_v39 = vadd.f32 %v6230_v4, %v8328_v27 }
 0x77a   : > { %v8439_v6 = vadd.f32 %v8328_v27, %v4326_v30 }
 0x77b   : > { %v4382_v50 = vmax.f32 %v8444_v39, 0.0 }
 0x77c   : > { %v6233_v59 = vpop.f32.mrb[34].mxu0  ;;  %v4381_v41 = vmax.f32 %v8439_v6, 0.0 }
 0x77d   : > { %v4336_v13 = vpop.f32.mrb[35].mxu0  ;;  %v8458_v17 = vadd.f32 %v6233_v59, %v8328_v27 }
 0x77e   : > { %v8453_v10 = vadd.f32 %v8328_v27, %v4336_v13 }
 0x77f   : > { %v4384_v42 = vmax.f32 %v8458_v17, 0.0 }
 0x780   : > { %v6236_v36 = vpop.f32.mrb[36].mxu0  ;;  %v4383_v14 = vmax.f32 %v8453_v10, 0.0 }
 0x781   : > { %v4346_v63 = vpop.f32.mrb[37].mxu0  ;;  %v8472_v48 = vadd.f32 %v6236_v36, %v8328_v27 }
 0x782   : > { %v8467_v46 = vadd.f32 %v8328_v27, %v4346_v63 }
 0x783   : > { %v4386_v36 = vmax.f32 %v8472_v48, 0.0 }
 0x784   : > { %v8399_v19 = vpop.f32.mrb[38].mxu0  ;;  %v4385_v4 = vmax.f32 %v8467_v46, 0.0 }
 0x785   : > { %v4356_v54 = vpop.f32.mrb[39].mxu0  ;;  %v8487_v63 = vadd.f32 %v8399_v19, %v8328_v27 }
 0x786   : > { %v8481_v30 = vadd.f32 %v8328_v27, %v4356_v54 }
 0x788   : > { %v8404_v58 = vpop.f32.mrb[40].mxu0 }
 0x789   : > { %v8406_v28 = vpop.f32.mrb[41].mxu0 }
 0x78c   : > { %v6258_v60 = vpop.f32.mrb[42].mxu1 }
 0x78d   : > { %v4596_v3 = vpop.f32.mrb[43].mxu1  ;;  %v4676_v61 = vmul.f32 %v6258_v60, %v4376_v23 }
 0x78e   : > { %v4675_v18 = vmul.f32 %v4596_v3, %v4375_v16 }
 0x78f   : > { %v4694_v22 = vsel %vm594_vm0, %v4676_v61, 0.0  ;;  %v4387_v61 = vmax.f32 %v8481_v30, 0.0 }
 0x790   : > { %v6261_v56 = vpop.f32.mrb[44].mxu1  ;;  %v4691_v44 = vsel %vm594_vm0, %v4675_v18, 0.0 }
 0x791   : > { %v4678_v35 = vmul.f32 %v6261_v56, %v4378_v20  ;;  %4692 = vadd.xlane.f32.xlu0 %v4691_v44  ;;  %v4606_v34 = vpop.f32.mrb[45].mxu1  ;;  %v8497_v56 = vadd.f32 %v8328_v27, %v8406_v28 }
 0x792   : > { %v4677_v5 = vmul.f32 %v4606_v34, %v4377_v62  ;;  %v8503_v34 = vadd.f32 %v8404_v58, %v8328_v27 }
 0x793   : > { %v4700_v8 = vsel %vm594_vm0, %v4678_v35, 0.0  ;;  %v4388_v35 = vmax.f32 %v8487_v63, 0.0  ;;  %v4755_v63 = vld [vmem:[%s8644_s4] sm:$0xff] }
 0x794   : > { %4701 = vadd.xlane.f32.xlu1 %v4700_v8  ;;  %v6264_v12 = vpop.f32.mrb[46].mxu1  ;;  %v4697_v52 = vsel %vm594_vm0, %v4677_v5, 0.0 }
 0x795   : > { %4695 = vadd.xlane.f32.xlu0 %v4694_v22  ;;  %v4616_v43 = vpop.f32.mrb[47].mxu1  ;;  %v4680_v7 = vmul.f32 %v6264_v12, %v4380_v1  ;;  %v4389_v22 = vmax.f32 %v8497_v56, 0.0  ;;  %v4848_v56 = vld [vmem:[%s8651_s11 + $0x8] sm:$0xff] }
 0x796   : > { %v4679_v0 = vmul.f32 %v4616_v43, %v4379_v55 }
 0x797   : > { %v4706_v11 = vsel %vm594_vm0, %v4680_v7, 0.0  ;;  %v4390_v7 = vmax.f32 %v8503_v34, 0.0 }
 0x798   : > { %4698 = vadd.xlane.f32.xlu1 %v4697_v52  ;;  %v6267_v9 = vpop.f32.mrb[48].mxu1  ;;  %v4703_v38 = vsel %vm594_vm0, %v4679_v0, 0.0 }
 0x799   : > { %4704 = vadd.xlane.f32.xlu0 %v4703_v38  ;;  %v4626_v32 = vpop.f32.mrb[49].mxu1  ;;  %v4682_v57 = vmul.f32 %v6267_v9, %v4382_v50 }
 0x79a   : > { %v4681_v15 = vmul.f32 %v4626_v32, %v4381_v41 }
 0x79b   : > { %v4712_v51 = vsel %vm594_vm0, %v4682_v57, 0.0 }
 0x79c   : > { %4707 = vadd.xlane.f32.xlu1 %v4706_v11  ;;  %v6270_v24 = vpop.f32.mrb[50].mxu1  ;;  %v4709_v21 = vsel %vm594_vm0, %v4681_v15, 0.0 }
 0x79d   : > { %4710 = vadd.xlane.f32.xlu0 %v4709_v21  ;;  %v4636_v31 = vpop.f32.mrb[51].mxu1  ;;  %v4684_v49 = vmul.f32 %v6270_v24, %v4384_v42 }
 0x79e   : > { %v4683_v40 = vmul.f32 %v4636_v31, %v4383_v14 }
 0x79f   : > { %v4718_v54 = vsel %vm594_vm0, %v4684_v49, 0.0 }
 0x7a0   : > { %4713 = vadd.xlane.f32.xlu1 %v4712_v51  ;;  %v6273_v59 = vpop.f32.mrb[52].mxu1  ;;  %v4715_v13 = vsel %vm594_vm0, %v4683_v40, 0.0 }
 0x7a1   : > { %4716 = vadd.xlane.f32.xlu0 %v4715_v13  ;;  %v4646_v60 = vpop.f32.mrb[53].mxu1  ;;  %v4686_v18 = vmul.f32 %v6273_v59, %v4386_v36 }
 0x7a2   : > { %v4685_v3 = vmul.f32 %v4646_v60, %v4385_v4 }
 0x7a3   : > { %v4724_v28 = vsel %vm594_vm0, %v4686_v18, 0.0 }
 0x7a4   : > { %4719 = vadd.xlane.f32.xlu1 %v4718_v54  ;;  %v6276_v44 = vpop.f32.mrb[54].mxu1  ;;  %v4721_v19 = vsel %vm594_vm0, %v4685_v3, 0.0 }
 0x7a5   : > { %4722 = vadd.xlane.f32.xlu0 %v4721_v19  ;;  %v4656_v5 = vpop.f32.mrb[55].mxu1  ;;  %v4688_v12 = vmul.f32 %v6276_v44, %v4388_v35 }
 0x7a6   : > { %v4687_v8 = vmul.f32 %v4656_v5, %v4387_v61 }
 0x7a7   : > { %v4730_v9 = vsel %vm594_vm0, %v4688_v12, 0.0 }
 0x7a8   : > { %4725 = vadd.xlane.f32.xlu1 %v4724_v28  ;;  %v6279_v43 = vpop.f32.mrb[56].mxu1  ;;  %v4727_v0 = vsel %vm594_vm0, %v4687_v8, 0.0 }
 0x7a9   : > { %4728 = vadd.xlane.f32.xlu0 %v4727_v0  ;;  %v4666_v27 = vpop.f32.mrb[57].mxu1  ;;  %v4690_v52 = vmul.f32 %v6279_v43, %v4390_v7 }
 0x7aa   : > { %v4689_v58 = vmul.f32 %v4666_v27, %v4389_v22 }
 0x7ab   : > { %v4736_v32 = vsel %vm594_vm0, %v4690_v52, 0.0 }
 0x7ac   : > { %4731 = vadd.xlane.f32.xlu1 %v4730_v9  ;;  %v4733_v38 = vsel %vm594_vm0, %v4689_v58, 0.0 }
 0x7ad   : > { %4734 = vadd.xlane.f32.xlu0 %v4733_v38 }
 0x7b0   : > { %4737 = vadd.xlane.f32.xlu1 %v4736_v32 }
 0x81e   : > { %v4693_v15 = vpop.xlane.xlu0 %4692 }
 0x81f   : > { %6706 = vtanh.f32 %v4693_v15 }
 0x821   : > { %v4702_v57 = vpop.xlane.xlu1 %4701 }
 0x822   : > { %v4696_v11 = vpop.xlane.xlu0 %4695 }
 0x823   : > { %6708 = vtanh.f32 %v4696_v11  ;;  %v4852_v11 = vld [vmem:[%s8651_s11 + $0x28] sm:$0xff] }
 0x824   : > { %6710 = vtanh.f32 %v4702_v57 }
 0x825   : > { %v4699_v24 = vpop.xlane.xlu1 %4698 }
 0x826   : > { %6712 = vtanh.f32 %v4699_v24  ;;  %v4705_v21 = vpop.xlane.xlu0 %4704 }
 0x827   : > { %6714 = vtanh.f32 %v4705_v21  ;;  %v4853_v21 = vld [vmem:[%s8651_s11 + $0x30] sm:$0xff] }
 0x829   : > { %v4708_v31 = vpop.xlane.xlu1 %4707  ;;  %v6707_v49 = vpop.eup %6706 }
 0x82a   : > { %6716 = vtanh.f32 %v4708_v31  ;;  %v4711_v40 = vpop.xlane.xlu0 %4710  ;;  %v4756_v3 = vmul.f32 %v6707_v49, %v4375_v16  ;;  %v4854_v31 = vld [vmem:[%s8651_s11 + $0x38] sm:$0xff]  ;;  %v5418_v49 = vld [vmem:[%s8651_s11 + $0x40] sm:$0xff] }
 0x82b   : > { %6718 = vtanh.f32 %v4711_v40  ;;  %v6541_v40 = vpack.c.bf16 %v4854_v31, %v4853_v21 }
 0x82d   : > { %v6709_v51 = vpop.eup %6708  ;;  %v4714_v59 = vpop.xlane.xlu1 %4713 }
 0x82e   : > { %v6711_v13 = vpop.eup %6710  ;;  %6720 = vtanh.f32 %v4714_v59  ;;  %v4717_v60 = vpop.xlane.xlu0 %4716  ;;  %v4757_v18 = vmul.f32 %v6709_v51, %v4376_v23  ;;  %v5419_v51 = vld [vmem:[%s8651_s11 + $0x48] sm:$0xff]  ;;  %v5420_v59 = vld [vmem:[%s8651_s11 + $0x50] sm:$0xff] }
 0x82f   : > { %6722 = vtanh.f32 %v4717_v60  ;;  %v4759_v8 = vmul.f32 %v6711_v13, %v4378_v20  ;;  %v6544_v13 = vpack.c.bf16 %v5419_v51, %v5418_v49  ;;  %v5421_v60 = vld [vmem:[%s8651_s11 + $0x58] sm:$0xff] }
 0x830   : > { %v6713_v54 = vpop.eup %6712  ;;  %v6508_v44 = vpack.c.bf16 %v4757_v18, %v4756_v3  ;;  %v6547_v3 = vpack.c.bf16 %v5421_v60, %v5420_v59  ;;  %v5422_v18 = vld [vmem:[%s8651_s11 + $0x60] sm:$0xff] }
 0x831   : > { %v4720_v19 = vpop.xlane.xlu1 %4719  ;;  %v4758_v5 = vmul.f32 %v6713_v54, %v4377_v62  ;;  %v6715_v12 = vpop.eup %6714  ;;  %v5423_v54 = vld [vmem:[%s8651_s11 + $0x68] sm:$0xff] }
 0x832   : > { %6724 = vtanh.f32 %v4720_v19  ;;  %6509 = vmatpush3.bf16.msra.mxu0 %v6508_v44  ;;  %v4723_v28 = vpop.xlane.xlu0 %4722  ;;  %v4760_v23 = vmul.f32 %v6715_v12, %v4379_v55  ;;  %v6550_v44 = vpack.c.bf16 %v5423_v54, %v5422_v18 }
 0x833   : > { %6510 = vmatprep.subr.bf16.mxu0 %v8720_v33  ;;  %v6511_v25 = vpack.c.bf16 %v4759_v8, %v4758_v5  ;;  %6726 = vtanh.f32 %v4723_v28  ;;  %v5424_v28 = vld [vmem:[%s8651_s11 + $0x70] sm:$0xff] }
 0x834   : > { %v6717_v16 = vpop.eup %6716 }
 0x835   : > { %v4726_v53 = vpop.xlane.xlu1 %4725  ;;  %v4761_v2 = vmul.f32 %v6717_v16, %v4380_v1  ;;  %v6719_v62 = vpop.eup %6718 }
 0x836   : > { %6728 = vtanh.f32 %v4726_v53  ;;  %6512 = vmatpush3.bf16.msra.mxu0 %v6511_v25  ;;  %v4729_v29 = vpop.xlane.xlu0 %4728  ;;  %v4762_v27 = vmul.f32 %v6719_v62, %v4381_v41  ;;  %v5425_v25 = vld [vmem:[%s8651_s11 + $0x78] sm:$0xff]  ;;  %v5427_v62 = vld [vmem:[%s8652_s12 + $0x1] ss:$0 sm:$0xff] }
 0x837   : > { %6513 = vmatprep.subr.bf16.mxu0 %v8720_v33  ;;  %v6514_v20 = vpack.c.bf16 %v4761_v2, %v4760_v23  ;;  %6730 = vtanh.f32 %v4729_v29  ;;  %v6553_v16 = vpack.c.bf16 %v5425_v25, %v5424_v28 }
 0x838   : > { %v6721_v43 = vpop.eup %6720 }
 0x839   : > { %v4732_v0 = vpop.xlane.xlu1 %4731  ;;  %v4763_v26 = vmul.f32 %v6721_v43, %v4382_v50  ;;  %v6723_v55 = vpop.eup %6722 }
 0x83a   : > { %6732 = vtanh.f32 %v4732_v0  ;;  %6515 = vmatpush3.bf16.msra.mxu0 %v6514_v20  ;;  %v4735_v45 = vpop.xlane.xlu0 %4734  ;;  %v4764_v9 = vmul.f32 %v6723_v55, %v4383_v14  ;;  %v5429_v0 = vld [vmem:[%s8653_s13] ss:$0 sm:$0xff] }
 0x83b   : > { %6516 = vmatprep.subr.bf16.mxu0 %v8720_v33  ;;  %v6517_v1 = vpack.c.bf16 %v4763_v26, %v4762_v27  ;;  %6734 = vtanh.f32 %v4735_v45  ;;  %v5039_v45 = vstv %s5430_s20 }
 0x83c   : > { %v6725_v58 = vpop.eup %6724 }
 0x83d   : > { %v4738_v52 = vpop.xlane.xlu1 %4737  ;;  %v4765_v6 = vmul.f32 %v6725_v58, %v4384_v42  ;;  %v6727_v41 = vpop.eup %6726 }
 0x83e   : > { %6736 = vtanh.f32 %v4738_v52  ;;  %6518 = vmatpush3.bf16.msra.mxu0 %v6517_v1  ;;  %v4766_v38 = vmul.f32 %v6727_v41, %v4385_v4 }
 0x83f   : > { %6519 = vmatprep.subr.bf16.mxu0 %v8720_v33  ;;  %v6520_v39 = vpack.c.bf16 %v4765_v6, %v4764_v9 }
 0x840   : > { %v6729_v50 = vpop.eup %6728 }
 0x841   : > { %v4767_v32 = vmul.f32 %v6729_v50, %v4386_v36  ;;  %v6731_v15 = vpop.eup %6730 }
 0x842   : > { %6521 = vmatpush3.bf16.msra.mxu0 %v6520_v39  ;;  %v4768_v14 = vmul.f32 %v6731_v15, %v4387_v61  ;;  %v4847_v61 = vld [vmem:[%s8651_s11] sm:$0xff] }
 0x843   : > { %6522 = vmatprep.subr.bf16.mxu0 %v8720_v33  ;;  %v6523_v10 = vpack.c.bf16 %v4767_v32, %v4766_v38  ;;  %v6532_v34 = vpack.c.bf16 %v4848_v56, %v4847_v61 }
 0x844   : > { %v6733_v17 = vpop.eup %6732 }
 0x845   : > { %v4769_v42 = vmul.f32 %v6733_v17, %v4388_v35  ;;  %v6735_v57 = vpop.eup %6734  ;;  %v4849_v35 = vld [vmem:[%s8651_s11 + $0x10] sm:$0xff]  ;;  %6533 = vmatpush3.bf16.msra.mxu1 %v6532_v34 }
 0x846   : > { %6524 = vmatpush3.bf16.msra.mxu0 %v6523_v10  ;;  %v4770_v48 = vmul.f32 %v6735_v57, %v4389_v22  ;;  %v4850_v22 = vld [vmem:[%s8651_s11 + $0x18] sm:$0xff]  ;;  %6534 = vmatprep.subr.bf16.mxu1 %v8720_v33 }
 0x847   : > { %6525 = vmatprep.subr.bf16.mxu0 %v8720_v33  ;;  %v6526_v46 = vpack.c.bf16 %v4769_v42, %v4768_v14 }
 0x848   : > { %v6737_v4 = vpop.eup %6736 }
 0x849   : > { %v4771_v36 = vmul.f32 %v6737_v4, %v4390_v7  ;;  %v6535_v7 = vpack.c.bf16 %v4850_v22, %v4849_v35 }
 0x84a   : > { %6527 = vmatpush3.bf16.msra.mxu0 %v6526_v46 }
 0x84b   : > { %6528 = vmatprep.subr.bf16.mxu0 %v8720_v33  ;;  %v6529_v30 = vpack.c.bf16 %v4771_v36, %v4770_v48  ;;  %6536 = vmatpush3.bf16.msra.mxu1 %v6535_v7 }
 0x84c   : > { %6537 = vmatprep.subr.bf16.mxu1 %v8720_v33 }
 0x84e   : > { %6530 = vmatpush3.bf16.msra.mxu0 %v6529_v30 }
 0x84f   : > { %6543 = vmatprep.subr.bf16.mxu0 %v8720_v33 }
 0x851   : > { %6313 = vmatmul.mubr.f32.vlgmr.msra.gmra.mrb[42].mxu0 %v4755_v63 }
 0x852   : > { %6350 = vmatprep.mubr.msk.f32.mxu0 %vm8746_vm1, %v8745_v47  ;;  %v4851_v47 = vld [vmem:[%s8651_s11 + $0x20] sm:$0xff]  ;;  %6545 = vmatpush3.bf16.msra.mxu0 %v6544_v13 }
 0x853   : > { %v6538_v24 = vpack.c.bf16 %v4852_v11, %v4851_v47  ;;  %6546 = vmatprep.subr.bf16.mxu0 %v8720_v33 }
 0x855   : > { %6539 = vmatpush3.bf16.msra.mxu1 %v6538_v24 }
 0x856   : > { %6540 = vmatprep.subr.bf16.mxu1 %v8720_v33  ;;  %6548 = vmatpush3.bf16.msra.mxu0 %v6547_v3 }
 0x857   : > { %6549 = vmatprep.subr.bf16.mxu0 %v8720_v33 }
 0x859   : > { %6542 = vmatpush3.bf16.msra.mxu1 %v6541_v40 }
 0x85a   : > { %6551 = vmatpush3.bf16.msra.mxu0 %v6550_v44 }
 0x85b   : > { %6552 = vmatprep.subr.bf16.mxu0 %v8720_v33  ;;  %v5416_v33 = vld [vmem:[%s8652_s12] ss:$0 sm:$0xff] }
 0x85e   : > { %6554 = vmatpush3.bf16.msra.mxu0 %v6553_v16 }
 0x924   : > { %v4838_v19 = vpop.f32.mrb[42].mxu0 }
 0x925   : > { %4843 = vrot.lane.b32.xlu0 %v4838_v19, %s6769_s23  ;;  %v6314_v5 = vpop.f32.mrb[43].mxu0 }
 0x997   : > { %v4844_v8 = vpop.permute.xlu0 %4843 }
 0x998   : > { %v4846_v12 = vsel %vm594_vm0, %v8747_v37, %v4844_v8  ;;  %vm8749_vm0 = vmmov %vm8748_vm13 }
 0x999   : > { %6332 = vmatmul.mubr.msk.f32.vlgmr.msra.gmra.mrb[58].mxu1 %vm8748_vm13, %v4846_v12  ;;  %vm8750_vm12 = vmmov %vm8749_vm0 }
 0xa6c   : > { %v4931_v53 = vpop.f32.mrb[58].mxu1 }
 0xa6d   : > { %v4932_v23 = vadd.f32 %v5416_v33, %v4931_v53  ;;  %v6333_v37 = vpop.f32.mrb[59].mxu1 }
 0xa6f   : > { %v4935_v2 = vmax.f32 %v4932_v23, 0.0 }
 0xa71   : > { %6351 = vmatmul.mubr.msk.f32.vlgmr.msra.gmra.mrb[44].mxu0 %vm8749_vm0, %v4935_v2 }
 0xb44   : > { %v5022_v29 = vpop.f32.mrb[44].mxu0 }
 0xb45   : > { %v5023_v20 = vadd.f32 %v5427_v62, %v5022_v29  ;;  %v6352_v43 = vpop.f32.mrb[45].mxu0 }
 0xb47   : > { %v5026_v27 = vmax.f32 %v5023_v20, 0.0 }
 0xb49   : > { %v5034_v26 = vmul.f32 %v5429_v0, %v5026_v27 }
 0xb4b   : > { %v5035_v55 = vsel %vm8750_vm12, %v5034_v26, 0.0 }
 0xb4c   : > { %5036 = vadd.xlane.f32.xlu1 %v5035_v55 }
 0xbd9   : > { %v5037_v1 = vpop.xlane.xlu1 %5036 }
 0xbda   : > { %v5040_v58 = vadd.f32 %v5039_v45, %v5037_v1 }
 0xbdc   : > { %5041 = vst [vmem:[%s550_s25] sm:$0xff] %v5040_v58 }
 0xbdd PF: > { %s26_s18 = sadd.s32 1, %s6763_s18  }
 0xbde   : > { %p23_p3 = scmp.ge.s32.totalorder %s26_s18, 4  }
 0xbe0   :  { %25 = sbr.rel (!%p23_p3) target bundleno = 1 (0x1), region = 134 }
 0xbe7   :  { %5061 = vsyncpa [#allocation3], 1 }
 0xbe8   :  { %5063 = vsyncpa [#allocation3 + $0x1], 1 }

</bundles_post_ra>
